<compile_context>
chip_gen: v7x
topology: tpu7x:2x2x1
jax: 0.10.0
libtpu: 0.0.40
codegen_flags: <defaults>
</compile_context>

<pallas_src>
import functools

import jax
import jax.numpy as jnp
from jax.experimental import pallas as pl
from jax.experimental.pallas import tpu as pltpu

BN_EPS = 1e-5


# ---------------------------------------------------------------------------
# In-kernel 3x3 conv over a flattened (rows, channels) VMEM window
# ---------------------------------------------------------------------------
def _conv3x3_from_window(win_ref, w_ref, *, wp, l):
    """9 accumulating MXU matmuls over row-shifted slices of the VMEM window.

    win_ref: ((TH + HK) * WP, Cp) bf16 -- TH output rows + halo, (h, w) flattened.
    w_ref:   (9, Cp, Cp) bf16, tap-major (t = dh * 3 + dw).
    Returns an (l, Cp) f32 accumulator, l = TH * WP.
    """
    acc = None
    for t in range(9):
        dh, dw = divmod(t, 3)
        xs = win_ref[pl.ds(dh * wp + dw, l), :]
        part = jnp.dot(xs, w_ref[t], preferred_element_type=jnp.float32)
        acc = part if acc is None else acc + part
    return acc


# ---------------------------------------------------------------------------
# Pass 1: conv1 tile + partial BatchNorm statistics (per-tile sum / sumsq)
# ---------------------------------------------------------------------------
def _conv1_stats_kernel(xa_ref, xb_ref, w_ref, y_ref, stats_ref, win_ref, *, wp, w_valid):
    la = xa_ref.shape[1]
    win_ref[0:la, :] = xa_ref[0]          # main row block
    win_ref[la:, :] = xb_ref[0]           # halo rows (start of the next row block)
    l = y_ref.shape[1]
    y = _conv3x3_from_window(win_ref, w_ref, wp=wp, l=l)
    y_ref[0] = y
    # Partial BN stats; mask junk columns c >= W that only exist because W was padded
    # to WP for sublane alignment.
    col = jax.lax.broadcasted_iota(jnp.int32, (l, 1), 0) % wp
    ym = jnp.where(col < w_valid, y, 0.0)
    stats_ref[0, 0] = jnp.concatenate(
        [jnp.sum(ym, axis=0, keepdims=True),
         jnp.sum(ym * ym, axis=0, keepdims=True)], axis=0)


# ---------------------------------------------------------------------------
# Pass 2: conv2 tile + residual add
# ---------------------------------------------------------------------------
def _conv2_residual_kernel(ra_ref, rb_ref, w_ref, res_ref, o_ref, win_ref, *, wp):
    la = ra_ref.shape[1]
    win_ref[0:la, :] = ra_ref[0]
    win_ref[la:, :] = rb_ref[0]
    l = o_ref.shape[1]
    y = _conv3x3_from_window(win_ref, w_ref, wp=wp, l=l)
    o_ref[0] = res_ref[0] + y             # residual add in f32


# ---------------------------------------------------------------------------
# Host-side helpers
# ---------------------------------------------------------------------------
def _round_up(x, m):
    return (x + m - 1) // m * m


def _choose_row_tile(h):
    """Pick TH (output rows per grid step, divides H) and HK (halo block rows,
    divides TH, >= 3 so the window covers the 2 halo rows plus slack)."""
    for th in (64, 32, 16, 8, 4):
        if h % th == 0 and h // th >= 2:
            return th, 4
    for th in (64, 32, 16, 8, 4):
        if h % th == 0:
            return th, 4
    th = h
    for k in range(3, th + 1):
        if th % k == 0:
            return th, k
    return th, th


def _prep_weight(w_oihw, cp):
    """PyTorch (O, I, kh, kw) -> (9, Cp, Cp) bf16, tap-major, zero padded channels."""
    o, i, kh, kw = w_oihw.shape
    wt = jnp.transpose(w_oihw, (2, 3, 1, 0)).reshape(kh * kw, i, o)
    wt = jnp.pad(wt, ((0, 0), (0, cp - i), (0, cp - o)))
    return wt.astype(jnp.bfloat16)


@jax.jit
def res_block_forward(x_nchw, w1, gamma, beta, w2):
    """ResBlock forward: x + conv2(relu(bn(conv1(x)))).  NCHW in / NCHW out."""
    n, cin, h, w = x_nchw.shape
    cout = w2.shape[0]
    assert cin == cout, "residual add requires in_channel == out_channel"
    assert h >= 3 and w >= 1

    cp = _round_up(max(cin, cout), 128)          # lane-dense channel padding
    wp = _round_up(w + 2, 8)                     # conv W-pad + sublane alignment
    th, hk = _choose_row_tile(h)                 # rows per tile / halo block rows
    num_t = h // th
    l = th * wp                                  # output rows per tile (flattened)

    x_nhwc = jnp.transpose(x_nchw, (0, 2, 3, 1)).astype(jnp.float32)

    # Conv-padded, W-padded, channel-padded input; extra zero rows at the bottom keep
    # the halo stream's blocks in bounds.  Flattened to (N, rows, Cp), bf16 for the MXU.
    xpad = jnp.pad(x_nhwc, ((0, 0), (1, hk - 1), (1, wp - w - 1), (0, cp - cin)))
    xpad_flat = xpad.reshape(n, (h + hk) * wp, cp).astype(jnp.bfloat16)

    w1m = _prep_weight(w1, cp)
    w2m = _prep_weight(w2, cp)

    row_spec = pl.BlockSpec((1, l, cp), lambda b, i: (b, i, 0))
    halo_spec = pl.BlockSpec((1, hk * wp, cp), lambda b, i: (b, (i + 1) * (th // hk), 0))
    wgt_spec = pl.BlockSpec((9, cp, cp), lambda b, i: (0, 0, 0))
    parallel2 = pltpu.CompilerParams(dimension_semantics=("parallel", "parallel"))
    conv_flops = 2 * n * h * wp * 9 * cp * cp

    # ---- Pass 1: conv1 + partial BN statistics ----
    kernel1 = functools.partial(_conv1_stats_kernel, wp=wp, w_valid=w)
    y1, stats = pl.pallas_call(
        kernel1,
        grid=(n, num_t),
        in_specs=[row_spec, halo_spec, wgt_spec],
        out_specs=(row_spec,
                   pl.BlockSpec((1, 1, 2, cp), lambda b, i: (b, i, 0, 0))),
        out_shape=(jax.ShapeDtypeStruct((n, h * wp, cp), jnp.float32),
                   jax.ShapeDtypeStruct((n, num_t, 2, cp), jnp.float32)),
        scratch_shapes=[pltpu.VMEM(((th + hk) * wp, cp), jnp.bfloat16)],
        compiler_params=parallel2,
        cost_estimate=pl.CostEstimate(
            flops=conv_flops, transcendentals=0,
            bytes_accessed=2 * xpad_flat.size + 4 * n * h * wp * cp),
    )(xpad_flat, xpad_flat, w1m)

    # ---- BN finalize (tiny per-channel math) ----
    count = n * h * w
    sums = jnp.sum(stats[:, :, 0, :], axis=(0, 1))
    sumsq = jnp.sum(stats[:, :, 1, :], axis=(0, 1))
    mean = sums / count
    var = jnp.maximum(sumsq / count - mean * mean, 0.0)   # biased variance (PyTorch train)
    gamma_p = jnp.pad(gamma.astype(jnp.float32), (0, cp - cin))
    beta_p = jnp.pad(beta.astype(jnp.float32), (0, cp - cin))
    scale = gamma_p * jax.lax.rsqrt(var + BN_EPS)
    bias = beta_p - mean * scale

    # ---- Normalize + ReLU fused into the repad that builds pass-2's input (one bf16
    #      HBM round trip for the ReLU intermediate; borders stay exactly zero). ----
    y1_4d = y1.reshape(n, h, wp, cp)
    r = jnp.maximum(y1_4d * scale + bias, 0.0)[:, :, :w, :]
    rpad = jnp.pad(r, ((0, 0), (1, hk - 1), (1, wp - w - 1), (0, 0)))
    rpad_flat = rpad.reshape(n, (h + hk) * wp, cp).astype(jnp.bfloat16)

    # Residual stream in the output layout (f32, aliased to the output buffer).
    xres = jnp.pad(x_nhwc, ((0, 0), (0, 0), (0, wp - w), (0, cp - cin)))
    xres_flat = xres.reshape(n, h * wp, cp)

    # ---- Pass 2: conv2 + residual add ----
    kernel2 = functools.partial(_conv2_residual_kernel, wp=wp)
    out_flat = pl.pallas_call(
        kernel2,
        grid=(n, num_t),
        in_specs=[row_spec, halo_spec, wgt_spec, row_spec],
        out_specs=row_spec,
        out_shape=jax.ShapeDtypeStruct((n, h * wp, cp), jnp.float32),
        scratch_shapes=[pltpu.VMEM(((th + hk) * wp, cp), jnp.bfloat16)],
        input_output_aliases={3: 0},
        compiler_params=parallel2,
        cost_estimate=pl.CostEstimate(
            flops=conv_flops, transcendentals=0,
            bytes_accessed=2 * rpad_flat.size + 8 * n * h * wp * cp),
    )(rpad_flat, rpad_flat, w2m, xres_flat)

    out = out_flat.reshape(n, h, wp, cp)[:, :, :w, :cout]
    return jnp.transpose(out, (0, 3, 1, 2))


# ---------------------------------------------------------------------------
# Pure-JAX reference (for correctness check)
# ---------------------------------------------------------------------------
def res_block_reference(x, w1, gamma, beta, w2):
    dn = jax.lax.conv_dimension_numbers(x.shape, w1.shape, ("NCHW", "OIHW", "NCHW"))
    y = jax.lax.conv_general_dilated(x, w1, (1, 1), ((1, 1), (1, 1)), dimension_numbers=dn)
    mean = jnp.mean(y, axis=(0, 2, 3), keepdims=True)
    var = jnp.mean(jnp.square(y - mean), axis=(0, 2, 3), keepdims=True)
    y = (y - mean) * jax.lax.rsqrt(var + BN_EPS)
    y = y * gamma.reshape(1, -1, 1, 1) + beta.reshape(1, -1, 1, 1)
    y = jnp.maximum(y, 0.0)
    z = jax.lax.conv_general_dilated(y, w2, (1, 1), ((1, 1), (1, 1)), dimension_numbers=dn)
    return x + z


if __name__ == "__main__":
    # Small deterministic shapes: N=2, C_in=C_out=8, H=W=16 (residual needs Cin==Cout).
    N, C, H, W = 2, 8, 16, 16

    key = jax.random.PRNGKey(0)
    kx, kw1, kw2, kg, kb = jax.random.split(key, 5)

    x = jax.random.normal(kx, (N, C, H, W), dtype=jnp.float32)
    w1 = 0.1 * jax.random.normal(kw1, (C, C, 3, 3), dtype=jnp.float32)   # conv1 weight
    w2 = 0.1 * jax.random.normal(kw2, (C, C, 3, 3), dtype=jnp.float32)   # conv2 weight
    gamma = 1.0 + 0.1 * jax.random.normal(kg, (C,), dtype=jnp.float32)   # BN weight
    beta = 0.1 * jax.random.normal(kb, (C,), dtype=jnp.float32)          # BN bias

    out = jax.block_until_ready(res_block_forward(x, w1, gamma, beta, w2))
    ref = jax.block_until_ready(res_block_reference(x, w1, gamma, beta, w2))

    assert out.shape == (N, C, H, W), out.shape
    max_err = float(jnp.max(jnp.abs(out - ref)))
    # Tolerance accounts for bf16 matmul operands (f32 accumulation) vs. the f32 reference.
    assert jnp.allclose(out, ref, atol=5e-2, rtol=5e-2), max_err

    print("KERNEL_OK")
</pallas_src>

<mosaic_0001>
module attributes {stable_mosaic.version = 11 : i64} {
  func.func @_conv1_stats_kernel(%arg0: i32, %arg1: i32, %arg2: memref<1x192x128xbf16, #tpu.memory_space<vmem>>, %arg3: memref<1x96x128xbf16, #tpu.memory_space<vmem>>, %arg4: memref<9x128x128xbf16, #tpu.memory_space<vmem>>, %arg5: memref<1x192x128xf32, #tpu.memory_space<vmem>>, %arg6: memref<1x1x2x128xf32, #tpu.memory_space<vmem>>, %arg7: memref<288x128xbf16, #tpu.memory_space<vmem>>) attributes {dimension_semantics = [#tpu.dimension_semantics<parallel>, #tpu.dimension_semantics<parallel>], iteration_bounds = array<i64: 2, 2>, scalar_prefetch = 0 : i64, scratch_operands = 1 : i64, tpu.core_type = #tpu.core_type<tc>, window_params = [{transform_indices = @transform_0, window_bounds = array<i64: 1, 192, 128>}, {transform_indices = @transform_1, window_bounds = array<i64: 1, 96, 128>}, {pipeline_mode = #tpu.pipeline_mode<synchronous>, transform_indices = @transform_2, window_bounds = array<i64: 9, 128, 128>}, {transform_indices = @transform_3, window_bounds = array<i64: 1, 192, 128>}, {transform_indices = @transform_4, window_bounds = array<i64: 1, 1, 2, 128>}]} {
    %c0 = arith.constant 0 : index
    %c0_0 = arith.constant 0 : index
    %c0_1 = arith.constant 0 : index
    %0 = vector.load %arg2[%c0, %c0_0, %c0_1] : memref<1x192x128xbf16, #tpu.memory_space<vmem>>, vector<1x192x128xbf16>
    %1 = vector.shape_cast %0 : vector<1x192x128xbf16> to vector<192x128xbf16>
    %c0_2 = arith.constant 0 : index
    %c0_3 = arith.constant 0 : index
    %2 = vector.load %arg7[%c0_2, %c0_3] : memref<288x128xbf16, #tpu.memory_space<vmem>>, vector<192x128xbf16>
    tpu.vector_store %arg7[%c0_2, %c0_3], %1 {strides = array<i32>} : memref<288x128xbf16, #tpu.memory_space<vmem>>, vector<192x128xbf16>,
    %c0_4 = arith.constant 0 : index
    %c0_5 = arith.constant 0 : index
    %c0_6 = arith.constant 0 : index
    %3 = vector.load %arg3[%c0_4, %c0_5, %c0_6] : memref<1x96x128xbf16, #tpu.memory_space<vmem>>, vector<1x96x128xbf16>
    %4 = vector.shape_cast %3 : vector<1x96x128xbf16> to vector<96x128xbf16>
    %c192 = arith.constant 192 : index
    %c0_7 = arith.constant 0 : index
    %5 = vector.load %arg7[%c192, %c0_7] : memref<288x128xbf16, #tpu.memory_space<vmem>>, vector<96x128xbf16>
    tpu.vector_store %arg7[%c192, %c0_7], %4 {strides = array<i32>} : memref<288x128xbf16, #tpu.memory_space<vmem>>, vector<96x128xbf16>,
    %c0_8 = arith.constant 0 : index
    %c0_9 = arith.constant 0 : index
    %6 = vector.load %arg7[%c0_8, %c0_9] : memref<288x128xbf16, #tpu.memory_space<vmem>>, vector<192x128xbf16>
    %c0_10 = arith.constant 0 : index
    %c0_11 = arith.constant 0 : index
    %c0_12 = arith.constant 0 : index
    %7 = vector.load %arg4[%c0_10, %c0_11, %c0_12] : memref<9x128x128xbf16, #tpu.memory_space<vmem>>, vector<1x128x128xbf16>
    %8 = vector.shape_cast %7 : vector<1x128x128xbf16> to vector<128x128xbf16>
    %cst = arith.constant dense<0.000000e+00> : vector<192x128xf32>
    %9 = tpu.matmul %6, %8, %cst {dimension_numbers = #tpu.dot_dimension_numbers<[1], [0], [0], [1], [0, 0, 1, 1], [], []>} : vector<192x128xbf16>, vector<128x128xbf16>, vector<192x128xf32> -> vector<192x128xf32>
    %c1 = arith.constant 1 : index
    %c0_13 = arith.constant 0 : index
    %10 = vector.load %arg7[%c1, %c0_13] : memref<288x128xbf16, #tpu.memory_space<vmem>>, vector<192x128xbf16>
    %c1_14 = arith.constant 1 : index
    %c0_15 = arith.constant 0 : index
    %c0_16 = arith.constant 0 : index
    %11 = vector.load %arg4[%c1_14, %c0_15, %c0_16] : memref<9x128x128xbf16, #tpu.memory_space<vmem>>, vector<1x128x128xbf16>
    %12 = vector.shape_cast %11 : vector<1x128x128xbf16> to vector<128x128xbf16>
    %cst_17 = arith.constant dense<0.000000e+00> : vector<192x128xf32>
    %13 = tpu.matmul %10, %12, %cst_17 {dimension_numbers = #tpu.dot_dimension_numbers<[1], [0], [0], [1], [0, 0, 1, 1], [], []>} : vector<192x128xbf16>, vector<128x128xbf16>, vector<192x128xf32> -> vector<192x128xf32>
    %14 = arith.addf %9, %13 : vector<192x128xf32>
    %c2 = arith.constant 2 : index
    %c0_18 = arith.constant 0 : index
    %15 = vector.load %arg7[%c2, %c0_18] : memref<288x128xbf16, #tpu.memory_space<vmem>>, vector<192x128xbf16>
    %c2_19 = arith.constant 2 : index
    %c0_20 = arith.constant 0 : index
    %c0_21 = arith.constant 0 : index
    %16 = vector.load %arg4[%c2_19, %c0_20, %c0_21] : memref<9x128x128xbf16, #tpu.memory_space<vmem>>, vector<1x128x128xbf16>
    %17 = vector.shape_cast %16 : vector<1x128x128xbf16> to vector<128x128xbf16>
    %cst_22 = arith.constant dense<0.000000e+00> : vector<192x128xf32>
    %18 = tpu.matmul %15, %17, %cst_22 {dimension_numbers = #tpu.dot_dimension_numbers<[1], [0], [0], [1], [0, 0, 1, 1], [], []>} : vector<192x128xbf16>, vector<128x128xbf16>, vector<192x128xf32> -> vector<192x128xf32>
    %19 = arith.addf %14, %18 : vector<192x128xf32>
    %c24 = arith.constant 24 : index
    %c0_23 = arith.constant 0 : index
    %20 = vector.load %arg7[%c24, %c0_23] : memref<288x128xbf16, #tpu.memory_space<vmem>>, vector<192x128xbf16>
    %c3 = arith.constant 3 : index
    %c0_24 = arith.constant 0 : index
    %c0_25 = arith.constant 0 : index
    %21 = vector.load %arg4[%c3, %c0_24, %c0_25] : memref<9x128x128xbf16, #tpu.memory_space<vmem>>, vector<1x128x128xbf16>
    %22 = vector.shape_cast %21 : vector<1x128x128xbf16> to vector<128x128xbf16>
    %cst_26 = arith.constant dense<0.000000e+00> : vector<192x128xf32>
    %23 = tpu.matmul %20, %22, %cst_26 {dimension_numbers = #tpu.dot_dimension_numbers<[1], [0], [0], [1], [0, 0, 1, 1], [], []>} : vector<192x128xbf16>, vector<128x128xbf16>, vector<192x128xf32> -> vector<192x128xf32>
    %24 = arith.addf %19, %23 : vector<192x128xf32>
    %c25 = arith.constant 25 : index
    %c0_27 = arith.constant 0 : index
    %25 = vector.load %arg7[%c25, %c0_27] : memref<288x128xbf16, #tpu.memory_space<vmem>>, vector<192x128xbf16>
    %c4 = arith.constant 4 : index
    %c0_28 = arith.constant 0 : index
    %c0_29 = arith.constant 0 : index
    %26 = vector.load %arg4[%c4, %c0_28, %c0_29] : memref<9x128x128xbf16, #tpu.memory_space<vmem>>, vector<1x128x128xbf16>
    %27 = vector.shape_cast %26 : vector<1x128x128xbf16> to vector<128x128xbf16>
    %cst_30 = arith.constant dense<0.000000e+00> : vector<192x128xf32>
    %28 = tpu.matmul %25, %27, %cst_30 {dimension_numbers = #tpu.dot_dimension_numbers<[1], [0], [0], [1], [0, 0, 1, 1], [], []>} : vector<192x128xbf16>, vector<128x128xbf16>, vector<192x128xf32> -> vector<192x128xf32>
    %29 = arith.addf %24, %28 : vector<192x128xf32>
    %c26 = arith.constant 26 : index
    %c0_31 = arith.constant 0 : index
    %30 = vector.load %arg7[%c26, %c0_31] : memref<288x128xbf16, #tpu.memory_space<vmem>>, vector<192x128xbf16>
    %c5 = arith.constant 5 : index
    %c0_32 = arith.constant 0 : index
    %c0_33 = arith.constant 0 : index
    %31 = vector.load %arg4[%c5, %c0_32, %c0_33] : memref<9x128x128xbf16, #tpu.memory_space<vmem>>, vector<1x128x128xbf16>
    %32 = vector.shape_cast %31 : vector<1x128x128xbf16> to vector<128x128xbf16>
    %cst_34 = arith.constant dense<0.000000e+00> : vector<192x128xf32>
    %33 = tpu.matmul %30, %32, %cst_34 {dimension_numbers = #tpu.dot_dimension_numbers<[1], [0], [0], [1], [0, 0, 1, 1], [], []>} : vector<192x128xbf16>, vector<128x128xbf16>, vector<192x128xf32> -> vector<192x128xf32>
    %34 = arith.addf %29, %33 : vector<192x128xf32>
    %c48 = arith.constant 48 : index
    %c0_35 = arith.constant 0 : index
    %35 = vector.load %arg7[%c48, %c0_35] : memref<288x128xbf16, #tpu.memory_space<vmem>>, vector<192x128xbf16>
    %c6 = arith.constant 6 : index
    %c0_36 = arith.constant 0 : index
    %c0_37 = arith.constant 0 : index
    %36 = vector.load %arg4[%c6, %c0_36, %c0_37] : memref<9x128x128xbf16, #tpu.memory_space<vmem>>, vector<1x128x128xbf16>
    %37 = vector.shape_cast %36 : vector<1x128x128xbf16> to vector<128x128xbf16>
    %cst_38 = arith.constant dense<0.000000e+00> : vector<192x128xf32>
    %38 = tpu.matmul %35, %37, %cst_38 {dimension_numbers = #tpu.dot_dimension_numbers<[1], [0], [0], [1], [0, 0, 1, 1], [], []>} : vector<192x128xbf16>, vector<128x128xbf16>, vector<192x128xf32> -> vector<192x128xf32>
    %39 = arith.addf %34, %38 : vector<192x128xf32>
    %c49 = arith.constant 49 : index
    %c0_39 = arith.constant 0 : index
    %40 = vector.load %arg7[%c49, %c0_39] : memref<288x128xbf16, #tpu.memory_space<vmem>>, vector<192x128xbf16>
    %c7 = arith.constant 7 : index
    %c0_40 = arith.constant 0 : index
    %c0_41 = arith.constant 0 : index
    %41 = vector.load %arg4[%c7, %c0_40, %c0_41] : memref<9x128x128xbf16, #tpu.memory_space<vmem>>, vector<1x128x128xbf16>
    %42 = vector.shape_cast %41 : vector<1x128x128xbf16> to vector<128x128xbf16>
    %cst_42 = arith.constant dense<0.000000e+00> : vector<192x128xf32>
    %43 = tpu.matmul %40, %42, %cst_42 {dimension_numbers = #tpu.dot_dimension_numbers<[1], [0], [0], [1], [0, 0, 1, 1], [], []>} : vector<192x128xbf16>, vector<128x128xbf16>, vector<192x128xf32> -> vector<192x128xf32>
    %44 = arith.addf %39, %43 : vector<192x128xf32>
    %c50 = arith.constant 50 : index
    %c0_43 = arith.constant 0 : index
    %45 = vector.load %arg7[%c50, %c0_43] : memref<288x128xbf16, #tpu.memory_space<vmem>>, vector<192x128xbf16>
    %c8 = arith.constant 8 : index
    %c0_44 = arith.constant 0 : index
    %c0_45 = arith.constant 0 : index
    %46 = vector.load %arg4[%c8, %c0_44, %c0_45] : memref<9x128x128xbf16, #tpu.memory_space<vmem>>, vector<1x128x128xbf16>
    %47 = vector.shape_cast %46 : vector<1x128x128xbf16> to vector<128x128xbf16>
    %cst_46 = arith.constant dense<0.000000e+00> : vector<192x128xf32>
    %48 = tpu.matmul %45, %47, %cst_46 {dimension_numbers = #tpu.dot_dimension_numbers<[1], [0], [0], [1], [0, 0, 1, 1], [], []>} : vector<192x128xbf16>, vector<128x128xbf16>, vector<192x128xf32> -> vector<192x128xf32>
    %49 = arith.addf %44, %48 : vector<192x128xf32>
    %c0_47 = arith.constant 0 : index
    %c0_48 = arith.constant 0 : index
    %c0_49 = arith.constant 0 : index
    %50 = vector.load %arg5[%c0_47, %c0_48, %c0_49] : memref<1x192x128xf32, #tpu.memory_space<vmem>>, vector<1x192x128xf32>
    %51 = vector.shape_cast %50 : vector<1x192x128xf32> to vector<192x128xf32>
    %52 = vector.shape_cast %49 : vector<192x128xf32> to vector<1x192x128xf32>
    tpu.vector_store %arg5[%c0_47, %c0_48, %c0_49], %52 {strides = array<i32>} : memref<1x192x128xf32, #tpu.memory_space<vmem>>, vector<1x192x128xf32>,
    %53 = tpu.iota {dimensions = array<i32: 0>} : vector<192x1xi32>
    %c24_i32 = arith.constant 24 : i32
    %c0_i32 = arith.constant 0 : i32
    %54 = arith.cmpi eq, %c24_i32, %c0_i32 : i32
    %c1_i32 = arith.constant 1 : i32
    %55 = arith.select %54, %c1_i32, %c24_i32 : i32
    %56 = vector.broadcast %55 : i32 to vector<192x1xi32>
    %57 = arith.remsi %53, %56 : vector<192x1xi32>
    %c0_i32_50 = arith.constant 0 : i32
    %58 = vector.broadcast %c0_i32_50 : i32 to vector<192x1xi32>
    %59 = arith.cmpi ne, %57, %58 : vector<192x1xi32>
    %c0_i32_51 = arith.constant 0 : i32
    %60 = vector.broadcast %c0_i32_51 : i32 to vector<192x1xi32>
    %61 = arith.cmpi slt, %57, %60 : vector<192x1xi32>
    %c0_i32_52 = arith.constant 0 : i32
    %62 = arith.cmpi slt, %55, %c0_i32_52 : i32
    %63 = vector.broadcast %62 : i1 to vector<192x1xi1>
    %64 = vector.broadcast %63 : vector<192x1xi1> to vector<192x1xi1>
    %65 = arith.xori %61, %64 : vector<192x1xi1>
    %66 = arith.andi %65, %59 : vector<192x1xi1>
    %67 = vector.broadcast %55 : i32 to vector<192x1xi32>
    %68 = arith.addi %57, %67 : vector<192x1xi32>
    %69 = arith.select %66, %68, %57 : vector<192x1xi1>, vector<192x1xi32>
    %c16_i32 = arith.constant 16 : i32
    %70 = vector.broadcast %c16_i32 : i32 to vector<192x1xi32>
    %71 = arith.cmpi slt, %69, %70 : vector<192x1xi32>
    %cst_53 = arith.constant 0.000000e+00 : f32
    %72 = vector.shape_cast %71 : vector<192x1xi1> to vector<192x1xi1>
    %73 = vector.broadcast %72 : vector<192x1xi1> to vector<192x128xi1>
    %74 = vector.broadcast %cst_53 : f32 to vector<192x128xf32>
    %75 = arith.select %73, %49, %74 : vector<192x128xi1>, vector<192x128xf32>
    %cst_54 = arith.constant dense<0.000000e+00> : vector<128xf32>
    %76 = vector.multi_reduction <add>, %75, %cst_54 [0] : vector<192x128xf32> to vector<128xf32>
    %77 = vector.shape_cast %76 : vector<128xf32> to vector<1x128xf32>
    %78 = arith.mulf %75, %75 : vector<192x128xf32>
    %cst_55 = arith.constant dense<0.000000e+00> : vector<128xf32>
    %79 = vector.multi_reduction <add>, %78, %cst_55 [0] : vector<192x128xf32> to vector<128xf32>
    %80 = vector.shape_cast %79 : vector<128xf32> to vector<1x128xf32>
    %81 = tpu.concatenate %77, %80 in 0 : vector<1x128xf32>, vector<1x128xf32> -> vector<2x128xf32>
    %c0_56 = arith.constant 0 : index
    %c0_57 = arith.constant 0 : index
    %c0_58 = arith.constant 0 : index
    %c0_59 = arith.constant 0 : index
    %82 = vector.load %arg6[%c0_56, %c0_57, %c0_58, %c0_59] : memref<1x1x2x128xf32, #tpu.memory_space<vmem>>, vector<1x1x2x128xf32>
    %83 = vector.shape_cast %82 : vector<1x1x2x128xf32> to vector<2x128xf32>
    %84 = vector.shape_cast %81 : vector<2x128xf32> to vector<1x1x2x128xf32>
    tpu.vector_store %arg6[%c0_56, %c0_57, %c0_58, %c0_59], %84 {strides = array<i32>} : memref<1x1x2x128xf32, #tpu.memory_space<vmem>>, vector<1x1x2x128xf32>,
    return
  }
  func.func @transform_0(%arg0: i32, %arg1: i32) -> (i32, i32, i32) {
    %c0_i32 = arith.constant 0 : i32
    %c0_i32_0 = arith.constant 0 : i32
    return %arg0, %arg1, %c0_i32 : i32, i32, i32
  }
  func.func @transform_1(%arg0: i32, %arg1: i32) -> (i32, i32, i32) {
    %c1_i32 = arith.constant 1 : i32
    %0 = arith.addi %arg1, %c1_i32 : i32
    %c2_i32 = arith.constant 2 : i32
    %1 = arith.muli %0, %c2_i32 : i32
    %c0_i32 = arith.constant 0 : i32
    %c0_i32_0 = arith.constant 0 : i32
    return %arg0, %1, %c0_i32 : i32, i32, i32
  }
  func.func @transform_2(%arg0: i32, %arg1: i32) -> (i32, i32, i32) {
    %c0_i32 = arith.constant 0 : i32
    %c0_i32_0 = arith.constant 0 : i32
    %c0_i32_1 = arith.constant 0 : i32
    %c0_i32_2 = arith.constant 0 : i32
    return %c0_i32, %c0_i32_0, %c0_i32_1 : i32, i32, i32
  }
  func.func @transform_3(%arg0: i32, %arg1: i32) -> (i32, i32, i32) {
    %c0_i32 = arith.constant 0 : i32
    %c0_i32_0 = arith.constant 0 : i32
    return %arg0, %arg1, %c0_i32 : i32, i32, i32
  }
  func.func @transform_4(%arg0: i32, %arg1: i32) -> (i32, i32, i32, i32) {
    %c0_i32 = arith.constant 0 : i32
    %c0_i32_0 = arith.constant 0 : i32
    %c0_i32_1 = arith.constant 0 : i32
    return %arg0, %arg1, %c0_i32, %c0_i32_0 : i32, i32, i32, i32
  }
}

module attributes {stable_mosaic.version = 11 : i64} {
  func.func @_conv2_residual_kernel(%arg0: i32, %arg1: i32, %arg2: memref<1x192x128xbf16, #tpu.memory_space<vmem>>, %arg3: memref<1x96x128xbf16, #tpu.memory_space<vmem>>, %arg4: memref<9x128x128xbf16, #tpu.memory_space<vmem>>, %arg5: memref<1x192x128xf32, #tpu.memory_space<vmem>>, %arg6: memref<1x192x128xf32, #tpu.memory_space<vmem>>, %arg7: memref<288x128xbf16, #tpu.memory_space<vmem>>) attributes {dimension_semantics = [#tpu.dimension_semantics<parallel>, #tpu.dimension_semantics<parallel>], iteration_bounds = array<i64: 2, 2>, scalar_prefetch = 0 : i64, scratch_operands = 1 : i64, tpu.core_type = #tpu.core_type<tc>, window_params = [{transform_indices = @transform_0, window_bounds = array<i64: 1, 192, 128>}, {transform_indices = @transform_1, window_bounds = array<i64: 1, 96, 128>}, {pipeline_mode = #tpu.pipeline_mode<synchronous>, transform_indices = @transform_2, window_bounds = array<i64: 9, 128, 128>}, {transform_indices = @transform_3, window_bounds = array<i64: 1, 192, 128>}, {transform_indices = @transform_4, window_bounds = array<i64: 1, 192, 128>}]} {
    %c0 = arith.constant 0 : index
    %c0_0 = arith.constant 0 : index
    %c0_1 = arith.constant 0 : index
    %0 = vector.load %arg2[%c0, %c0_0, %c0_1] : memref<1x192x128xbf16, #tpu.memory_space<vmem>>, vector<1x192x128xbf16>
    %1 = vector.shape_cast %0 : vector<1x192x128xbf16> to vector<192x128xbf16>
    %c0_2 = arith.constant 0 : index
    %c0_3 = arith.constant 0 : index
    %2 = vector.load %arg7[%c0_2, %c0_3] : memref<288x128xbf16, #tpu.memory_space<vmem>>, vector<192x128xbf16>
    tpu.vector_store %arg7[%c0_2, %c0_3], %1 {strides = array<i32>} : memref<288x128xbf16, #tpu.memory_space<vmem>>, vector<192x128xbf16>,
    %c0_4 = arith.constant 0 : index
    %c0_5 = arith.constant 0 : index
    %c0_6 = arith.constant 0 : index
    %3 = vector.load %arg3[%c0_4, %c0_5, %c0_6] : memref<1x96x128xbf16, #tpu.memory_space<vmem>>, vector<1x96x128xbf16>
    %4 = vector.shape_cast %3 : vector<1x96x128xbf16> to vector<96x128xbf16>
    %c192 = arith.constant 192 : index
    %c0_7 = arith.constant 0 : index
    %5 = vector.load %arg7[%c192, %c0_7] : memref<288x128xbf16, #tpu.memory_space<vmem>>, vector<96x128xbf16>
    tpu.vector_store %arg7[%c192, %c0_7], %4 {strides = array<i32>} : memref<288x128xbf16, #tpu.memory_space<vmem>>, vector<96x128xbf16>,
    %c0_8 = arith.constant 0 : index
    %c0_9 = arith.constant 0 : index
    %6 = vector.load %arg7[%c0_8, %c0_9] : memref<288x128xbf16, #tpu.memory_space<vmem>>, vector<192x128xbf16>
    %c0_10 = arith.constant 0 : index
    %c0_11 = arith.constant 0 : index
    %c0_12 = arith.constant 0 : index
    %7 = vector.load %arg4[%c0_10, %c0_11, %c0_12] : memref<9x128x128xbf16, #tpu.memory_space<vmem>>, vector<1x128x128xbf16>
    %8 = vector.shape_cast %7 : vector<1x128x128xbf16> to vector<128x128xbf16>
    %cst = arith.constant dense<0.000000e+00> : vector<192x128xf32>
    %9 = tpu.matmul %6, %8, %cst {dimension_numbers = #tpu.dot_dimension_numbers<[1], [0], [0], [1], [0, 0, 1, 1], [], []>} : vector<192x128xbf16>, vector<128x128xbf16>, vector<192x128xf32> -> vector<192x128xf32>
    %c1 = arith.constant 1 : index
    %c0_13 = arith.constant 0 : index
    %10 = vector.load %arg7[%c1, %c0_13] : memref<288x128xbf16, #tpu.memory_space<vmem>>, vector<192x128xbf16>
    %c1_14 = arith.constant 1 : index
    %c0_15 = arith.constant 0 : index
    %c0_16 = arith.constant 0 : index
    %11 = vector.load %arg4[%c1_14, %c0_15, %c0_16] : memref<9x128x128xbf16, #tpu.memory_space<vmem>>, vector<1x128x128xbf16>
    %12 = vector.shape_cast %11 : vector<1x128x128xbf16> to vector<128x128xbf16>
    %cst_17 = arith.constant dense<0.000000e+00> : vector<192x128xf32>
    %13 = tpu.matmul %10, %12, %cst_17 {dimension_numbers = #tpu.dot_dimension_numbers<[1], [0], [0], [1], [0, 0, 1, 1], [], []>} : vector<192x128xbf16>, vector<128x128xbf16>, vector<192x128xf32> -> vector<192x128xf32>
    %14 = arith.addf %9, %13 : vector<192x128xf32>
    %c2 = arith.constant 2 : index
    %c0_18 = arith.constant 0 : index
    %15 = vector.load %arg7[%c2, %c0_18] : memref<288x128xbf16, #tpu.memory_space<vmem>>, vector<192x128xbf16>
    %c2_19 = arith.constant 2 : index
    %c0_20 = arith.constant 0 : index
    %c0_21 = arith.constant 0 : index
    %16 = vector.load %arg4[%c2_19, %c0_20, %c0_21] : memref<9x128x128xbf16, #tpu.memory_space<vmem>>, vector<1x128x128xbf16>
    %17 = vector.shape_cast %16 : vector<1x128x128xbf16> to vector<128x128xbf16>
    %cst_22 = arith.constant dense<0.000000e+00> : vector<192x128xf32>
    %18 = tpu.matmul %15, %17, %cst_22 {dimension_numbers = #tpu.dot_dimension_numbers<[1], [0], [0], [1], [0, 0, 1, 1], [], []>} : vector<192x128xbf16>, vector<128x128xbf16>, vector<192x128xf32> -> vector<192x128xf32>
    %19 = arith.addf %14, %18 : vector<192x128xf32>
    %c24 = arith.constant 24 : index
    %c0_23 = arith.constant 0 : index
    %20 = vector.load %arg7[%c24, %c0_23] : memref<288x128xbf16, #tpu.memory_space<vmem>>, vector<192x128xbf16>
    %c3 = arith.constant 3 : index
    %c0_24 = arith.constant 0 : index
    %c0_25 = arith.constant 0 : index
    %21 = vector.load %arg4[%c3, %c0_24, %c0_25] : memref<9x128x128xbf16, #tpu.memory_space<vmem>>, vector<1x128x128xbf16>
    %22 = vector.shape_cast %21 : vector<1x128x128xbf16> to vector<128x128xbf16>
    %cst_26 = arith.constant dense<0.000000e+00> : vector<192x128xf32>
    %23 = tpu.matmul %20, %22, %cst_26 {dimension_numbers = #tpu.dot_dimension_numbers<[1], [0], [0], [1], [0, 0, 1, 1], [], []>} : vector<192x128xbf16>, vector<128x128xbf16>, vector<192x128xf32> -> vector<192x128xf32>
    %24 = arith.addf %19, %23 : vector<192x128xf32>
    %c25 = arith.constant 25 : index
    %c0_27 = arith.constant 0 : index
    %25 = vector.load %arg7[%c25, %c0_27] : memref<288x128xbf16, #tpu.memory_space<vmem>>, vector<192x128xbf16>
    %c4 = arith.constant 4 : index
    %c0_28 = arith.constant 0 : index
    %c0_29 = arith.constant 0 : index
    %26 = vector.load %arg4[%c4, %c0_28, %c0_29] : memref<9x128x128xbf16, #tpu.memory_space<vmem>>, vector<1x128x128xbf16>
    %27 = vector.shape_cast %26 : vector<1x128x128xbf16> to vector<128x128xbf16>
    %cst_30 = arith.constant dense<0.000000e+00> : vector<192x128xf32>
    %28 = tpu.matmul %25, %27, %cst_30 {dimension_numbers = #tpu.dot_dimension_numbers<[1], [0], [0], [1], [0, 0, 1, 1], [], []>} : vector<192x128xbf16>, vector<128x128xbf16>, vector<192x128xf32> -> vector<192x128xf32>
    %29 = arith.addf %24, %28 : vector<192x128xf32>
    %c26 = arith.constant 26 : index
    %c0_31 = arith.constant 0 : index
    %30 = vector.load %arg7[%c26, %c0_31] : memref<288x128xbf16, #tpu.memory_space<vmem>>, vector<192x128xbf16>
    %c5 = arith.constant 5 : index
    %c0_32 = arith.constant 0 : index
    %c0_33 = arith.constant 0 : index
    %31 = vector.load %arg4[%c5, %c0_32, %c0_33] : memref<9x128x128xbf16, #tpu.memory_space<vmem>>, vector<1x128x128xbf16>
    %32 = vector.shape_cast %31 : vector<1x128x128xbf16> to vector<128x128xbf16>
    %cst_34 = arith.constant dense<0.000000e+00> : vector<192x128xf32>
    %33 = tpu.matmul %30, %32, %cst_34 {dimension_numbers = #tpu.dot_dimension_numbers<[1], [0], [0], [1], [0, 0, 1, 1], [], []>} : vector<192x128xbf16>, vector<128x128xbf16>, vector<192x128xf32> -> vector<192x128xf32>
    %34 = arith.addf %29, %33 : vector<192x128xf32>
    %c48 = arith.constant 48 : index
    %c0_35 = arith.constant 0 : index
    %35 = vector.load %arg7[%c48, %c0_35] : memref<288x128xbf16, #tpu.memory_space<vmem>>, vector<192x128xbf16>
    %c6 = arith.constant 6 : index
    %c0_36 = arith.constant 0 : index
    %c0_37 = arith.constant 0 : index
    %36 = vector.load %arg4[%c6, %c0_36, %c0_37] : memref<9x128x128xbf16, #tpu.memory_space<vmem>>, vector<1x128x128xbf16>
    %37 = vector.shape_cast %36 : vector<1x128x128xbf16> to vector<128x128xbf16>
    %cst_38 = arith.constant dense<0.000000e+00> : vector<192x128xf32>
    %38 = tpu.matmul %35, %37, %cst_38 {dimension_numbers = #tpu.dot_dimension_numbers<[1], [0], [0], [1], [0, 0, 1, 1], [], []>} : vector<192x128xbf16>, vector<128x128xbf16>, vector<192x128xf32> -> vector<192x128xf32>
    %39 = arith.addf %34, %38 : vector<192x128xf32>
    %c49 = arith.constant 49 : index
    %c0_39 = arith.constant 0 : index
    %40 = vector.load %arg7[%c49, %c0_39] : memref<288x128xbf16, #tpu.memory_space<vmem>>, vector<192x128xbf16>
    %c7 = arith.constant 7 : index
    %c0_40 = arith.constant 0 : index
    %c0_41 = arith.constant 0 : index
    %41 = vector.load %arg4[%c7, %c0_40, %c0_41] : memref<9x128x128xbf16, #tpu.memory_space<vmem>>, vector<1x128x128xbf16>
    %42 = vector.shape_cast %41 : vector<1x128x128xbf16> to vector<128x128xbf16>
    %cst_42 = arith.constant dense<0.000000e+00> : vector<192x128xf32>
    %43 = tpu.matmul %40, %42, %cst_42 {dimension_numbers = #tpu.dot_dimension_numbers<[1], [0], [0], [1], [0, 0, 1, 1], [], []>} : vector<192x128xbf16>, vector<128x128xbf16>, vector<192x128xf32> -> vector<192x128xf32>
    %44 = arith.addf %39, %43 : vector<192x128xf32>
    %c50 = arith.constant 50 : index
    %c0_43 = arith.constant 0 : index
    %45 = vector.load %arg7[%c50, %c0_43] : memref<288x128xbf16, #tpu.memory_space<vmem>>, vector<192x128xbf16>
    %c8 = arith.constant 8 : index
    %c0_44 = arith.constant 0 : index
    %c0_45 = arith.constant 0 : index
    %46 = vector.load %arg4[%c8, %c0_44, %c0_45] : memref<9x128x128xbf16, #tpu.memory_space<vmem>>, vector<1x128x128xbf16>
    %47 = vector.shape_cast %46 : vector<1x128x128xbf16> to vector<128x128xbf16>
    %cst_46 = arith.constant dense<0.000000e+00> : vector<192x128xf32>
    %48 = tpu.matmul %45, %47, %cst_46 {dimension_numbers = #tpu.dot_dimension_numbers<[1], [0], [0], [1], [0, 0, 1, 1], [], []>} : vector<192x128xbf16>, vector<128x128xbf16>, vector<192x128xf32> -> vector<192x128xf32>
    %49 = arith.addf %44, %48 : vector<192x128xf32>
    %c0_47 = arith.constant 0 : index
    %c0_48 = arith.constant 0 : index
    %c0_49 = arith.constant 0 : index
    %50 = vector.load %arg5[%c0_47, %c0_48, %c0_49] : memref<1x192x128xf32, #tpu.memory_space<vmem>>, vector<1x192x128xf32>
    %51 = vector.shape_cast %50 : vector<1x192x128xf32> to vector<192x128xf32>
    %52 = arith.addf %51, %49 : vector<192x128xf32>
    %c0_50 = arith.constant 0 : index
    %c0_51 = arith.constant 0 : index
    %c0_52 = arith.constant 0 : index
    %53 = vector.load %arg6[%c0_50, %c0_51, %c0_52] : memref<1x192x128xf32, #tpu.memory_space<vmem>>, vector<1x192x128xf32>
    %54 = vector.shape_cast %53 : vector<1x192x128xf32> to vector<192x128xf32>
    %55 = vector.shape_cast %52 : vector<192x128xf32> to vector<1x192x128xf32>
    tpu.vector_store %arg6[%c0_50, %c0_51, %c0_52], %55 {strides = array<i32>} : memref<1x192x128xf32, #tpu.memory_space<vmem>>, vector<1x192x128xf32>,
    return
  }
  func.func @transform_0(%arg0: i32, %arg1: i32) -> (i32, i32, i32) {
    %c0_i32 = arith.constant 0 : i32
    %c0_i32_0 = arith.constant 0 : i32
    return %arg0, %arg1, %c0_i32 : i32, i32, i32
  }
  func.func @transform_1(%arg0: i32, %arg1: i32) -> (i32, i32, i32) {
    %c1_i32 = arith.constant 1 : i32
    %0 = arith.addi %arg1, %c1_i32 : i32
    %c2_i32 = arith.constant 2 : i32
    %1 = arith.muli %0, %c2_i32 : i32
    %c0_i32 = arith.constant 0 : i32
    %c0_i32_0 = arith.constant 0 : i32
    return %arg0, %1, %c0_i32 : i32, i32, i32
  }
  func.func @transform_2(%arg0: i32, %arg1: i32) -> (i32, i32, i32) {
    %c0_i32 = arith.constant 0 : i32
    %c0_i32_0 = arith.constant 0 : i32
    %c0_i32_1 = arith.constant 0 : i32
    %c0_i32_2 = arith.constant 0 : i32
    return %c0_i32, %c0_i32_0, %c0_i32_1 : i32, i32, i32
  }
  func.func @transform_3(%arg0: i32, %arg1: i32) -> (i32, i32, i32) {
    %c0_i32 = arith.constant 0 : i32
    %c0_i32_0 = arith.constant 0 : i32
    return %arg0, %arg1, %c0_i32 : i32, i32, i32
  }
  func.func @transform_4(%arg0: i32, %arg1: i32) -> (i32, i32, i32) {
    %c0_i32 = arith.constant 0 : i32
    %c0_i32_0 = arith.constant 0 : i32
    return %arg0, %arg1, %c0_i32 : i32, i32, i32
  }
}

</mosaic_0001>

<bundles_post_ra>
// kernel: res_block_forward.3
= control target key start
LH: loop header
LB: loop body
LE: loop exit
PB: predicated region body
PF: predicated region fallthrough
CT: control target
= control target key end

     0   :  { %s4413_s15 = smov 0   ;;  %s4415_s16 = smov 0   ;;  %s5223_s0 = inlined_call_operand.vmem [shape: bf16[2,480,128], index: 0, kind: input, shape index: {}, may-alias: {0,1}]   ;;  %s5224_s1 = inlined_call_operand.vmem [shape: bf16[2,480,128], index: 1, kind: input, shape index: {}, may-alias: {0,1}]   ;;  %s5225_s2 = inlined_call_operand.vmem [shape: bf16[9,128,128], index: 2, kind: input, shape index: {}]   ;;  %s5226_s3 = inlined_call_operand.vmem [shape: f32[2,384,128], index: 3, kind: input, shape index: {}, may-alias: {3,4}]   ;;  %s5227_s4 = inlined_call_operand.vmem [shape: f32[2,384,128], index: 4, kind: output, shape index: {}, may-alias: {3,4}]  }
   0x1   :  { %s4417_s17 = smov 0   ;;  %s4419_s18 = smov 0  }
   0x2   :  { %s4421_s19 = smov 0  }
   0x3 LB: > { %s23_s20 = sadd.s32 1, %s4378_s17  ;;  %s26_s21 = sadd.s32 1, %s4382_s18  ;;  %s4386_s19 = sphi %s4421_s19, %s14_s19   ;;  %s4382_s18 = sphi %s4419_s18, %s5231_s18   ;;  %s4378_s17 = sphi %s4417_s17, %s5230_s17   ;;  %s4374_s16 = sphi %s4415_s16, %s5229_s16   ;;  %s4370_s15 = sphi %s4413_s15, %s5228_s15  }
   0x4   : > { %p24_p0 = scmp.ge.s32.totalorder %s23_s20, 2  ;;  %p3224_p1 = scmp.ge.s32.totalorder %s4386_s19, 1 }
   0x5   : > { %p233_p2 = scmp.lt.s32.totalorder %s4386_s19, 5 }
   0x6   : > { %s5233_s20 = smov (%p24_p0, %s23_s20), 0  ;;  %s5235_s21 = smov (!%p24_p0, %s26_s21), %s4382_s18 }
   0x7   : > { %p234_p3 = pnand %p3224_p1, %p233_p2  ;;  %p28_p4 = scmp.ge.s32.totalorder %s5235_s21, 2 }
   0x8   : > { %v4247_v0 = vld [vmem:[%s5225_s2 + $0x40] sm:$0xff] (!%p234_p3)   ;;  %s291_s24 = smul.u32 (!%p234_p3), 24, %s4370_s15  ;;  %p296_p5 = scmp.lt.s32.totalorder (!%p234_p3), %s4374_s16, 1  ;;  %v4249_v2 = vld [vmem:[%s5225_s2 + $0x48] sm:$0xff] (!%p234_p3)   ;;  %v4251_v4 = vld [vmem:[%s5225_s2 + $0x50] sm:$0xff] (!%p234_p3)   ;;  %vm1939_vm2 = vcmask (!%p234_p3), 1042432  }
   0x9   : > { %s5237_s21 = smov (%p28_p4, %s5235_s21), 0  ;;  %237 = sbr.rel (%p234_p3) target bundleno = 471 (0x1d7), region = 36 }
   0xa   : > { %v4248_v1 = vld [vmem:[%s5225_s2 + $0x100] sm:$0xff] (!%p234_p3)   ;;  %3637 = vmatprep.subr.bf16.mxu1 (!%p234_p3), %v4247_v0  ;;  %p298_p6 = scmp.lt.s32.totalorder (!%p234_p3), %s291_s24, 59  ;;  %v4250_v3 = vld [vmem:[%s5225_s2 + $0x108] sm:$0xff] (!%p234_p3)   ;;  %v4252_v5 = vld [vmem:[%s5225_s2 + $0x110] sm:$0xff] (!%p234_p3)   ;;  %p326_p7 = scmp.lt.s32.totalorder (!%p234_p3), %s291_s24, 47  ;;  %vm1050_vm3 = vcmask (!%p234_p3), 1046528  }
   0xb   : > { %3797 = vmatprep.subr.bf16.mxu0 (!%p234_p3), %v4248_v1  ;;  %3638 = vmatpush3.bf16.msra.mxu1 (!%p234_p3), %v4247_v0  ;;  %v4253_v6 = vld [vmem:[%s5225_s2 + $0x58] sm:$0xff] (!%p234_p3)   ;;  %v4255_v8 = vld [vmem:[%s5225_s2 + $0x60] sm:$0xff] (!%p234_p3)   ;;  %v4257_v10 = vld [vmem:[%s5225_s2 + $0x68] sm:$0xff] (!%p234_p3)   ;;  %s309_s12 = sadd.s32 (!%p234_p3), 1, %s4370_s15  ;;  %vm552_vm0 = vsmask.f32 (!%p234_p3), 7424 }
   0xc   : > { %3798 = vmatpush3.bf16.msra.mxu0 (!%p234_p3), %v4248_v1  ;;  %3639 = vmatprep.subr.bf16.mxu1 (!%p234_p3), %v4249_v2  ;;  %v4254_v7 = vld [vmem:[%s5225_s2 + $0x118] sm:$0xff] (!%p234_p3)   ;;  %v4256_v9 = vld [vmem:[%s5225_s2 + $0x120] sm:$0xff] (!%p234_p3)   ;;  %v4258_v11 = vld [vmem:[%s5225_s2 + $0x128] sm:$0xff] (!%p234_p3)   ;;  %vm1589_vm1 = vsmask.f32 (!%p234_p3), 3328  ;;  %vm1332_vm4 = vcmask (!%p234_p3), 1043456  }
   0xd   : > { %3799 = vmatprep.subr.bf16.mxu0 (!%p234_p3), %v4250_v3  ;;  %v4259_v15 = vld [vmem:[%s5225_s2 + $0x70] sm:$0xff] (!%p234_p3)   ;;  %v4261_v25 = vld [vmem:[%s5225_s2 + $0x78] sm:$0xff] (!%p234_p3)   ;;  %v4266_v38 = vld [vmem:[%s5225_s2] sm:$0xff] (!%p234_p3)  }
   0xe   : > { %v4260_v19 = vld [vmem:[%s5225_s2 + $0x130] sm:$0xff] (!%p234_p3)   ;;  %v4262_v28 = vld [vmem:[%s5225_s2 + $0x138] sm:$0xff] (!%p234_p3)   ;;  %v4268_v45 = vld [vmem:[%s5225_s2 + $0x140] sm:$0xff] (!%p234_p3)  }
   0xf   : > { %3640 = vmatpush3.bf16.msra.mxu1 (!%p234_p3), %v4249_v2  ;;  %v4269_v58 = vld [vmem:[%s5225_s2 + $0x8] sm:$0xff] (!%p234_p3)  }
  0x10   : > { %s5239_s16 = smov (!%p296_p5, %s4374_s16), 1  ;;  %3800 = vmatpush3.bf16.msra.mxu0 %v4250_v3  ;;  %3641 = vmatprep.subr.bf16.mxu1 %v4251_v4  ;;  %v4270_v1 = vld [vmem:[%s5225_s2 + $0x148] sm:$0xff]  }
  0x11   : > { %s299_s7 = scalar_select %p298_p6, %s291_s24, 59  ;;  %3801 = vmatprep.subr.bf16.mxu0 %v4252_v5 }
  0x12   : > { %s4205_s10 = smul.u32 60, %s5239_s16  ;;  %s5241_s24 = smov (!%p326_p7, %s291_s24), 47 }
  0x13   : > { %s4206_s14 = smul.u32 48, %s5239_s16  ;;  %3642 = vmatpush3.bf16.msra.mxu1 %v4251_v4 }
  0x14   : > { %s301_s13 = sadd.s32 %s4205_s10, %s299_s7  ;;  %3802 = vmatpush3.bf16.msra.mxu0 %v4252_v5  ;;  %3643 = vmatprep.subr.bf16.mxu1 %v4253_v6  ;;  %v4273_v5 = vld [vmem:[%s5225_s2 + $0x10] sm:$0xff]  }
  0x15   : > { %s3225_s25 = sshll.u32 %s301_s13, 2  ;;  %s4479_s28 = sadd.s32 %s4206_s14, %s5241_s24  ;;  %3803 = vmatprep.subr.bf16.mxu0 %v4254_v7 }
  0x16   : > { %s4490_s9 = scalar_lea.vmem %s5223_s0, %s3225_s25  ;;  %s4505_s13 = smul.u32 24, %s309_s12 }
  0x17   : > { %3644 = vmatpush3.bf16.msra.mxu1 %v4253_v6  ;;  %v4497_v12 = vld [vmem:[%s4490_s9] sm:$0xff]   ;;  %v4500_v13 = vld [vmem:[%s4490_s9 + $0x8] sm:$0xff]   ;;  %v4503_v14 = vld [vmem:[%s4490_s9 + $0x10] sm:$0xff]  }
  0x18   : > { %3804 = vmatpush3.bf16.msra.mxu0 %v4254_v7  ;;  %3645 = vmatprep.subr.bf16.mxu1 %v4255_v8  ;;  %440 = vst [vmem:[#allocation2] sm:$0xff] %v4497_v12  ;;  %441 = vst [vmem:[#allocation2 + $0x8] sm:$0xff] %v4500_v13  ;;  %v554_v16 = vshrl.u32 %v4497_v12, 16  ;;  %v556_v17 = vshll.u32 %v4497_v12, 16  ;;  %v561_v18 = vshll.u32 %v4500_v13, 16  ;;  %v1599_v20 = vshrl.u32 %v4503_v14, 16 }
  0x19   : > { %3805 = vmatprep.subr.bf16.mxu0 %v4256_v9  ;;  %442 = vst [vmem:[#allocation2 + $0x10] sm:$0xff] %v4503_v14  ;;  %v1602_v21 = vshll.u32 %v4503_v14, 16  ;;  %v4522_v22 = vld [vmem:[%s4490_s9 + $0x18] sm:$0xff]   ;;  %v565_v26 = vshrl.u32 %v4500_v13, 16  ;;  %p314_p8 = scmp.lt.s32.totalorder %s4505_s13, 59  ;;  %v4542_v39 = vld [vmem:[%s4490_s9 + $0x20] sm:$0xff]  }
  0x1a   : > { %v558_v23 = vrot.slane %v556_v17, 1  ;;  %v563_v24 = vrot.slane %v561_v18, 1  ;;  %443 = vst [vmem:[#allocation2 + $0x18] sm:$0xff] %v4522_v22  ;;  %v1608_v27 = vshrl.u32 %v4522_v22, 16  ;;  %v1601_v30 = vrot.slane %v1599_v20, 4  ;;  %444 = vst [vmem:[#allocation2 + $0x20] sm:$0xff] %v4542_v39 }
  0x1b   : > { %3646 = vmatpush3.bf16.msra.mxu1 %v4255_v8  ;;  %v1611_v31 = vshll.u32 %v4522_v22, 16  ;;  %v1604_v32 = vrot.slane %v1602_v21, 5  ;;  %v571_v37 = vrot.slane %v1602_v21, 1  ;;  %v1617_v46 = vshrl.u32 %v4542_v39, 16  ;;  %v4551_v48 = vld [vmem:[%s4490_s9 + $0x28] sm:$0xff]   ;;  %v4564_v63 = vld [vmem:[%s4490_s9 + $0x30] sm:$0xff]  }
  0x1c   : > { %3806 = vmatpush3.bf16.msra.mxu0 %v4256_v9  ;;  %3647 = vmatprep.subr.bf16.mxu1 %v4257_v10  ;;  %v559_v29 = vor.u32 %v558_v23, %v554_v16  ;;  %v1610_v33 = vrot.slane %v1608_v27, 4  ;;  %v567_v42 = vor.u32 %v565_v26, %v563_v24  ;;  %v1620_v47 = vshll.u32 %v4542_v39, 16  ;;  %445 = vst [vmem:[#allocation2 + $0x28] sm:$0xff] %v4551_v48  ;;  %v4571_v3 = vld [vmem:[%s4490_s9 + $0x38] sm:$0xff]   ;;  %s5243_s13 = smov (!%p314_p8, %s4505_s13), 59  ;;  %v4595_v23 = vld [vmem:[%s4490_s9 + $0x40] sm:$0xff]  }
  0x1d   : > { %3807 = vmatprep.subr.bf16.mxu0 %v4258_v11  ;;  %v1613_v35 = vrot.slane %v1611_v31, 5  ;;  %v1605_v43 = vor.u32 %v1604_v32, %v1601_v30  ;;  %v575_v51 = vor.u32 %v1599_v20, %v571_v37  ;;  %v579_v52 = vrot.slane %v1611_v31, 1  ;;  %446 = vst [vmem:[#allocation2 + $0x30] sm:$0xff] %v4564_v63  ;;  %447 = vst [vmem:[#allocation2 + $0x38] sm:$0xff] %v4571_v3  ;;  %v4277_v26 = vld [vmem:[%s5225_s2 + $0x18] sm:$0xff]   ;;  %s4613_s27 = sadd.s32 %s4205_s10, %s5243_s13  ;;  %s3229_s13 = sshll.u32 %s4479_s28, 3 }
  0x1e   : > { %v564_v34 = vsel %vm552_vm0, %v559_v29, %v563_v24  ;;  %v1619_v53 = vrot.slane %v1617_v46, 4  ;;  %v1622_v54 = vrot.slane %v1620_v47, 5  ;;  %v1626_v55 = vshrl.u32 %v4551_v48, 16  ;;  %448 = vst [vmem:[#allocation2 + $0x40] sm:$0xff] %v4595_v23  ;;  %v4605_v29 = vld [vmem:[%s4490_s9 + $0x48] sm:$0xff]   ;;  %s3228_s30 = sshll.u32 %s4613_s27, 2  ;;  %s5089_s6 = scalar_lea.vmem %s5226_s3, %s3229_s13 }
  0x1f   : > { %3648 = vmatpush3.bf16.msra.mxu1 %v4257_v10  ;;  %3653 = vmatprep.mubr.bf16.mxu1 %v564_v34  ;;  %v1289_v36 = vld [vmem:[#allocation2 + $0x8] sm:$0xf0]  ;;  %v1614_v44 = vor.u32 %v1613_v35, %v1610_v33  ;;  %v572_v57 = vsel %vm552_vm0, %v567_v42, %v571_v37  ;;  %v1629_v59 = vshll.u32 %v4551_v48, 16  ;;  %v580_v4 = vsel %vm552_vm0, %v575_v51, %v579_v52  ;;  %v4282_v51 = vld [vmem:[%s5225_s2 + $0x160] sm:$0xff]   ;;  %s4646_s24 = scalar_lea.vmem %s5224_s1, %s3228_s30 }
  0x20   : > { %3808 = vmatpush3.bf16.msra.mxu0 %v4258_v11  ;;  %3649 = vmatprep.subr.bf16.mxu1 %v4259_v15  ;;  %v1591_v40 = vshrl.u32 %v1289_v36, 16  ;;  %v1594_v41 = vshll.u32 %v1289_v36, 16  ;;  %v1623_v61 = vor.u32 %v1622_v54, %v1619_v53  ;;  %v1628_v62 = vrot.slane %v1626_v55, 4  ;;  %449 = vst [vmem:[#allocation2 + $0x48] sm:$0xff] %v4605_v29 }
  0x21   : > { %3809 = vmatprep.subr.bf16.mxu0 %v4260_v19  ;;  %v1615_v60 = vsel %vm1589_vm1, %v1605_v43, %v1614_v44  ;;  %v1631_v2 = vrot.slane %v1629_v59, 5  ;;  %v1635_v6 = vshrl.u32 %v4564_v63, 16  ;;  %v1638_v7 = vshll.u32 %v4564_v63, 16 }
  0x22   : > { %v1593_v49 = vrot.slane %v1591_v40, 4  ;;  %v1596_v50 = vrot.slane %v1594_v41, 5  ;;  %v1624_v8 = vsel %vm1589_vm1, %v1614_v44, %v1623_v61  ;;  %v583_v9 = vor.u32 %v1608_v27, %v579_v52  ;;  %v4280_v40 = vld [vmem:[%s5225_s2 + $0x20] sm:$0xff]  }
  0x23   : > { %3650 = vmatpush3.bf16.msra.mxu1 %v4259_v15  ;;  %v587_v10 = vrot.slane %v1620_v47, 1  ;;  %v1632_v11 = vor.u32 %v1631_v2, %v1628_v62  ;;  %v4274_v15 = vld [vmem:[%s5225_s2 + $0x150] sm:$0xff]   ;;  %v1637_v16 = vrot.slane %v1635_v6, 4  ;;  %v1640_v17 = vrot.slane %v1638_v7, 5  ;;  %v4284_v62 = vld [vmem:[%s5225_s2 + $0x168] sm:$0xff]  }
  0x24   : > { %3810 = vmatpush3.bf16.msra.mxu0 %v4260_v19  ;;  %3651 = vmatprep.subr.bf16.mxu1 %v4261_v25  ;;  %v1597_v56 = vor.u32 %v1596_v50, %v1593_v49  ;;  %v1644_v18 = vshrl.u32 %v4571_v3, 16  ;;  %v1647_v19 = vshll.u32 %v4571_v3, 16  ;;  %v595_v21 = vrot.slane %v1629_v59, 1  ;;  %v4632_v47 = vld [vmem:[%s4490_s9 + $0x50] sm:$0xff]   ;;  %v4635_v49 = vld [vmem:[%s4490_s9 + $0x58] sm:$0xff]   ;;  %s5139_s9 = scalar_lea.vmem %s5227_s4, %s3229_s13 }
  0x25   : > { %3811 = vmatprep.subr.bf16.mxu0 %v4262_v28  ;;  %v591_v20 = vor.u32 %v1617_v46, %v587_v10  ;;  %v1641_v24 = vor.u32 %v1640_v17, %v1637_v16  ;;  %v1653_v27 = vshrl.u32 %v4595_v23, 16  ;;  %v1633_v30 = vsel %vm1589_vm1, %v1623_v61, %v1632_v11  ;;  %451 = vst [vmem:[#allocation2 + $0x58] sm:$0xff] %v4635_v49  ;;  %v4287_v16 = vld [vmem:[%s5225_s2 + $0x30] sm:$0xff]  }
  0x26   : > { %v1606_v0 = vsel %vm1589_vm1, %v1597_v56, %v1605_v43  ;;  %v1646_v31 = vrot.slane %v1644_v18, 4  ;;  %v1649_v32 = vrot.slane %v1647_v19, 5  ;;  %v603_v37 = vrot.slane %v1638_v7, 1  ;;  %v4283_v56 = vld [vmem:[%s5225_s2 + $0x28] sm:$0xff]  }
  0x27   : > { %3652 = vmatpush3.bf16.msra.mxu1 %v4261_v25  ;;  %3813 = vmatprep.mubr.bf16.mxu0 %v1606_v0  ;;  %v588_v25 = vsel %vm552_vm0, %v583_v9, %v587_v10  ;;  %v596_v33 = vsel %vm552_vm0, %v591_v20, %v595_v21  ;;  %v1655_v34 = vrot.slane %v1653_v27, 4  ;;  %v1642_v36 = vsel %vm1589_vm1, %v1632_v11, %v1641_v24  ;;  %v4677_v11 = vld [vmem:[%s4646_s24 + $0x8] sm:$0xff]  }
  0x28   : > { %3812 = vmatpush3.bf16.msra.mxu0 %v4262_v28  ;;  %3677 = vmatprep.subr.bf16.mxu1 %v4266_v38  ;;  %v1656_v28 = vshll.u32 %v4595_v23, 16  ;;  %v599_v41 = vor.u32 %v1626_v55, %v595_v21  ;;  %v611_v42 = vrot.slane %v1647_v19, 1  ;;  %v1650_v43 = vor.u32 %v1649_v32, %v1646_v31  ;;  %501 = vst [vmem:[#allocation2 + $0x68] sm:$0xff] %v4677_v11  ;;  %v4294_v32 = vld [vmem:[%s5225_s2 + $0x178] sm:$0xff]  }
  0x29   : > { %3837 = vmatprep.subr.bf16.mxu0 %v4268_v45  ;;  %v607_v44 = vor.u32 %v1635_v6, %v603_v37  ;;  %v1665_v46 = vshll.u32 %v4605_v29, 16  ;;  %v1671_v52 = vshrl.u32 %v4632_v47, 16  ;;  %v1674_v53 = vshll.u32 %v4632_v47, 16 }
  0x2a   : > { %3654 = vmatmul.mubr.bf16.vlgmr.msra.gmra.mrb[0].mxu1 %v572_v57  ;;  %v1658_v35 = vrot.slane %v1656_v28, 5  ;;  %v604_v54 = vsel %vm552_vm0, %v599_v41, %v603_v37  ;;  %v4649_v55 = vrot.slane %v1656_v28, 1  ;;  %v4655_v57 = vld [vmem:[%s4646_s24] sm:$0xff]   ;;  %v1680_v7 = vshrl.u32 %v4635_v49, 16 }
  0x2b   : > { %3814 = vmatmul.mubr.bf16.vlgmr.msra.gmra.mrb[0].mxu0 %v1615_v60  ;;  %3678 = vmatpush3.bf16.msra.mxu1 %v4266_v38  ;;  %v4278_v38 = vld [vmem:[%s5225_s2 + $0x158] sm:$0xff]   ;;  %v612_v59 = vsel %vm552_vm0, %v607_v44, %v611_v42  ;;  %v1667_v61 = vrot.slane %v1665_v46, 5  ;;  %v1673_v2 = vrot.slane %v1671_v52, 4  ;;  %500 = vst [vmem:[#allocation2 + $0x60] sm:$0xff] %v4655_v57  ;;  %v1689_v10 = vshrl.u32 %v4655_v57, 16 }
  0x2c   : > { %3838 = vmatpush3.bf16.msra.mxu0 %v4268_v45  ;;  %3679 = vmatprep.subr.bf16.mxu1 %v4269_v58  ;;  %v1662_v45 = vshrl.u32 %v4605_v29, 16  ;;  %v1659_v50 = vor.u32 %v1658_v35, %v1655_v34  ;;  %v623_v6 = vor.u32 %v1653_v27, %v4649_v55  ;;  %v1692_v17 = vshll.u32 %v4655_v57, 16 }
  0x2d   : > { %3839 = vmatprep.subr.bf16.mxu0 %v4270_v1  ;;  %3657 = vmatprep.mubr.bf16.mxu1 %v580_v4  ;;  %v1676_v4 = vrot.slane %v1674_v53, 5  ;;  %v635_v31 = vrot.slane %v1674_v53, 1 }
  0x2e   : > { %3817 = vmatprep.mubr.bf16.mxu0 %v1624_v8  ;;  %v1664_v60 = vrot.slane %v1662_v45, 4  ;;  %v1660_v0 = vsel %vm1589_vm1, %v1650_v43, %v1659_v50  ;;  %v1683_v8 = vshll.u32 %v4635_v49, 16  ;;  %v1694_v28 = vrot.slane %v1692_v17, 5 }
  0x2f   : > { %3680 = vmatpush3.bf16.msra.mxu1 %v4269_v58  ;;  %v1651_v58 = vsel %vm1589_vm1, %v1641_v24, %v1650_v43  ;;  %v1682_v24 = vrot.slane %v1680_v7, 4  ;;  %v4716_v41 = vld [vmem:[#allocation2 + $0x68] sm:$0x1f] }
  0x30   : > { %3840 = vmatpush3.bf16.msra.mxu0 %v4270_v1  ;;  %3681 = vmatprep.subr.bf16.mxu1 %v4273_v5  ;;  %v627_v1 = vrot.slane %v1665_v46, 1  ;;  %v1668_v9 = vor.u32 %v1667_v61, %v1664_v60  ;;  %v643_v37 = vrot.slane %v1683_v8, 1  ;;  %v1698_v43 = vshrl.u32 %v4716_v41, 16 }
  0x31   : > { %3841 = vmatprep.subr.bf16.mxu0 %v4274_v15  ;;  %v1701_v44 = vshll.u32 %v4716_v41, 16 }
  0x32   : > { %3658 = vmatmul.mubr.bf16.gmra.mrb[4].mxu1 %v588_v25  ;;  %v4690_v20 = vsel %vm552_vm0, %v623_v6, %v627_v1  ;;  %v1669_v21 = vsel %vm1589_vm1, %v1659_v50, %v1668_v9  ;;  %v1685_v25 = vrot.slane %v1683_v8, 5  ;;  %v4709_v34 = vld [vmem:[#allocation2 + $0x60] sm:$0x1]  ;;  %v4298_v8 = vld [vmem:[%s5225_s2 + $0x188] sm:$0xff]  }
  0x33   : > { %3818 = vmatmul.mubr.bf16.gmra.mrb[4].mxu0 %v1633_v30  ;;  %3682 = vmatpush3.bf16.msra.mxu1 %v4273_v5  ;;  %v615_v5 = vor.u32 %v1644_v18, %v611_v42  ;;  %v4288_v18 = vld [vmem:[%s5225_s2 + $0x170] sm:$0xff]   ;;  %v4293_v30 = vld [vmem:[%s5225_s2 + $0x38] sm:$0xff]   ;;  %v649_v42 = vshll.u32 %v4709_v34, 16  ;;  %v1703_v53 = vrot.slane %v1701_v44, 5 }
  0x34   : > { %3842 = vmatpush3.bf16.msra.mxu0 %v4274_v15  ;;  %3661 = vmatprep.mubr.bf16.mxu1 %v596_v33  ;;  %v1677_v15 = vor.u32 %v1676_v4, %v1673_v2  ;;  %v631_v33 = vor.u32 %v1662_v45, %v627_v1  ;;  %v1686_v35 = vor.u32 %v1685_v25, %v1682_v24  ;;  %v4296_v45 = vld [vmem:[%s5225_s2 + $0x180] sm:$0xff]   ;;  %v1943_v4 = vrot.slane %v4522_v22, 5  ;;  %v4302_v24 = vld [vmem:[%s5225_s2 + $0x198] sm:$0xff]  }
  0x35   : > { %3821 = vmatprep.mubr.bf16.mxu0 %v1642_v36  ;;  %3683 = vmatprep.subr.bf16.mxu1 %v4277_v26  ;;  %v620_v19 = vsel %vm552_vm0, %v615_v5, %v4649_v55  ;;  %v639_v36 = vor.u32 %v1671_v52, %v635_v31  ;;  %v1700_v52 = vrot.slane %v1698_v43, 4  ;;  %v1945_v5 = vrot.slane %v4542_v39, 5 }
  0x36   : > { %3843 = vmatprep.subr.bf16.mxu0 %v4278_v38  ;;  %v1678_v27 = vsel %vm1589_vm1, %v1668_v9, %v1677_v15  ;;  %v4725_v46 = vsel %vm552_vm0, %v631_v33, %v635_v31  ;;  %v1687_v50 = vsel %vm1589_vm1, %v1677_v15, %v1686_v35  ;;  %v1947_v9 = vrot.slane %v4551_v48, 5  ;;  %v4299_v15 = vld [vmem:[%s5225_s2 + $0x90] sm:$0xff]   ;;  %v4306_v33 = vld [vmem:[%s5225_s2 + $0x1a8] sm:$0xff]  }
  0x37   : > { %3684 = vmatpush3.bf16.msra.mxu1 %v4277_v26  ;;  %v1691_v26 = vrot.slane %v1689_v10, 4  ;;  %v1704_v60 = vor.u32 %v1703_v53, %v1700_v52  ;;  %v1951_v25 = vrot.slane %v4571_v3, 5  ;;  %v4825_v52 = vrot.slane %v4635_v49, 1  ;;  %v4827_v53 = vld [vmem:[#allocation2 + $0x38] sm:$0xff] }
  0x38   : > { %3844 = vmatpush3.bf16.msra.mxu0 %v4278_v38  ;;  %3685 = vmatprep.subr.bf16.mxu1 %v4280_v40  ;;  %v4295_v38 = vld [vmem:[%s5225_s2 + $0x80] sm:$0xff]  }
  0x39   : > { %3845 = vmatprep.subr.bf16.mxu0 %v4282_v51 }
  0x3a   : > { %3662 = vmatmul.mubr.bf16.gmra.mrb[8].mxu1 %v604_v54 }
  0x3b   : > { %3822 = vmatmul.mubr.bf16.gmra.mrb[8].mxu0 %v1651_v58  ;;  %3665 = vmatprep.mubr.bf16.mxu1 %v612_v59  ;;  %v4736_v58 = vor.u32 %v1680_v7, %v643_v37  ;;  %v651_v59 = vrot.slane %v649_v42, 1  ;;  %v4297_v7 = vld [vmem:[%s5225_s2 + $0x88] sm:$0xff]   ;;  %v4308_v42 = vld [vmem:[%s5225_s2 + $0x1b0] sm:$0xff]  }
  0x3c   : > { %3825 = vmatprep.mubr.bf16.mxu0 %v1660_v0  ;;  %3686 = vmatpush3.bf16.msra.mxu1 %v4280_v40  ;;  %v1695_v40 = vor.u32 %v1694_v28, %v1691_v26  ;;  %v4303_v26 = vld [vmem:[%s5225_s2 + $0xa0] sm:$0xff]  }
  0x3d   : > { %3846 = vmatpush3.bf16.msra.mxu0 %v4282_v51  ;;  %3687 = vmatprep.subr.bf16.mxu1 %v4283_v56  ;;  %v4729_v51 = vsel %vm552_vm0, %v639_v36, %v643_v37  ;;  %v652_v0 = vsel %vm552_vm0, %v4736_v58, %v651_v59  ;;  %v4304_v28 = vld [vmem:[%s5225_s2 + $0x1a0] sm:$0xff]   ;;  %v2512_v36 = vrot.slane %v1692_v17, 1  ;;  %v4335_v37 = vld [vmem:[%s4646_s24 + $0x18] sm:$0xff]   ;;  %v2789_v59 = vrot.slane %v4827_v53, 1 }
  0x3e   : > { %3847 = vmatprep.subr.bf16.mxu0 %v4284_v62  ;;  %v1696_v54 = vsel %vm1589_vm1, %v1686_v35, %v1695_v40  ;;  %v1705_v1 = vsel %vm1589_vm1, %v1695_v40, %v1704_v60  ;;  %v1955_v35 = vrot.slane %v4605_v29, 5  ;;  %v4307_v40 = vld [vmem:[%s5225_s2 + $0xb0] sm:$0xff]   ;;  %503 = vst [vmem:[#allocation2 + $0x78] sm:$0xff] %v4335_v37  ;;  %v1961_v60 = vrot.slane %v4655_v57, 5  ;;  %v4321_v37 = vld [vmem:[%s5225_s2 + $0xe8] sm:$0xff]  }
  0x3f   : > { %v4808_v43 = vor.u32 %v2512_v36, %v1689_v10  ;;  %v4813_v44 = vsel %vm552_vm0, %v4736_v58, %v2512_v36  ;;  %v4310_v10 = vld [vmem:[%s5225_s2 + $0x1b8] sm:$0xff]   ;;  %v4832_v58 = vrot.slane %v4595_v23, 1 }
  0x40   : > { %3688 = vmatpush3.bf16.msra.mxu1 %v4283_v56  ;;  %v1919_v56 = vld [vmem:[#allocation2 + $0x8] sm:$0xe0] }
  0x41   : > { %3848 = vmatpush3.bf16.msra.mxu0 %v4284_v62  ;;  %3689 = vmatprep.subr.bf16.mxu1 %v4287_v16  ;;  %v1940_v61 = vrot.slane %v1919_v56, 5  ;;  %v1941_v62 = vrot.slane %v4503_v14, 5  ;;  %v1959_v56 = vrot.slane %v4635_v49, 5 }
  0x42   : > { %3666 = vmatmul.mubr.bf16.gmra.mrb[12].mxu1 %v620_v19  ;;  %3849 = vmatprep.subr.bf16.mxu0 %v4288_v18  ;;  %v1948_v19 = vsel %vm1939_vm2, %v1945_v5, %v1947_v9 }
  0x43   : > { %3826 = vmatmul.mubr.bf16.gmra.mrb[12].mxu0 %v1669_v21  ;;  %3669 = vmatprep.mubr.bf16.mxu1 %v4690_v20  ;;  %v1942_v2 = vsel %vm1939_vm2, %v1940_v61, %v1941_v62  ;;  %v1944_v6 = vsel %vm1939_vm2, %v1941_v62, %v1943_v4  ;;  %v4301_v21 = vld [vmem:[%s5225_s2 + $0x98] sm:$0xff]   ;;  %v4311_v61 = vld [vmem:[%s5225_s2 + $0xc0] sm:$0xff]  }
  0x44   : > { %3829 = vmatprep.mubr.bf16.mxu0 %v1678_v27  ;;  %3690 = vmatpush3.bf16.msra.mxu1 %v4287_v16  ;;  %v4300_v16 = vld [vmem:[%s5225_s2 + $0x190] sm:$0xff]   ;;  %v1953_v27 = vrot.slane %v4595_v23, 5 }
  0x45   : > { %3850 = vmatpush3.bf16.msra.mxu0 %v4288_v18  ;;  %3691 = vmatprep.subr.bf16.mxu1 %v4293_v30  ;;  %v4765_v18 = vld [vmem:[%s4646_s24 + $0x10] sm:$0xff]  }
  0x46   : > { %3851 = vmatprep.subr.bf16.mxu0 %v4294_v32  ;;  %v1954_v31 = vsel %vm1939_vm2, %v1951_v25, %v1953_v27  ;;  %v1956_v17 = vsel %vm1939_vm2, %v1953_v27, %v1955_v35  ;;  %v1060_v27 = vrot.slane %v4551_v48, 1 }
  0x48   : > { %3692 = vmatpush3.bf16.msra.mxu1 %v4293_v30 }
  0x49   : > { %3852 = vmatpush3.bf16.msra.mxu0 %v4294_v32  ;;  %3717 = vmatprep.subr.bf16.mxu1 %v4295_v38  ;;  %v4305_v32 = vld [vmem:[%s5225_s2 + $0xa8] sm:$0xff]  }
  0x4a   : > { %3670 = vmatmul.mubr.bf16.gmra.mrb[16].mxu1 %v4725_v46  ;;  %3877 = vmatprep.subr.bf16.mxu0 %v4296_v45 }
  0x4b   : > { %3830 = vmatmul.mubr.bf16.gmra.mrb[16].mxu0 %v1687_v50  ;;  %3673 = vmatprep.mubr.bf16.mxu1 %v4729_v51  ;;  %v4309_v50 = vld [vmem:[%s5225_s2 + $0xb8] sm:$0xff]  }
  0x4c   : > { %3833 = vmatprep.mubr.bf16.mxu0 %v1696_v54  ;;  %v2799_v54 = vrot.slane %v4655_v57, 1 }
  0x4e   : > { %v4843_v62 = vsel %vm1050_vm3, %v4825_v52, %v2799_v54 }
  0x52   : > { %3674 = vmatmul.mubr.bf16.gmra.mrb[20].mxu1 %v652_v0  ;;  %v4312_v0 = vld [vmem:[%s5225_s2 + $0x1c0] sm:$0xff]  }
  0x53   : > { %3834 = vmatmul.mubr.bf16.gmra.mrb[20].mxu0 %v1705_v1  ;;  %3693 = vmatprep.mubr.bf16.mxu1 %v4497_v12  ;;  %v1946_v12 = vsel %vm1939_vm2, %v1943_v4, %v1945_v5  ;;  %v4852_v1 = vsel %vm1050_vm3, %v2789_v59, %v4832_v58  ;;  %v1962_v4 = vsel %vm1939_vm2, %v1959_v56, %v1961_v60  ;;  %v1019_v5 = vld [vmem:[#allocation2] sm:$0xfe] }
  0x54   : > { %3853 = vmatprep.mubr.bf16.mxu0 %v1942_v2 }
  0x5a   : > { %3694 = vmatmul.mubr.bf16.vlgmr.msra.gmra.mrb[0].mxu1 %v4500_v13  ;;  %v1949_v13 = vrot.slane %v4564_v63, 5 }
  0x5b   : > { %3854 = vmatmul.mubr.bf16.vlgmr.msra.gmra.mrb[0].mxu0 %v1944_v6  ;;  %3718 = vmatpush3.bf16.msra.mxu1 %v4295_v38  ;;  %v1957_v38 = vrot.slane %v4632_v47, 5  ;;  %v1963_v6 = vrot.slane %v4716_v41, 5 }
  0x5c   : > { %3878 = vmatpush3.bf16.msra.mxu0 %v4296_v45  ;;  %3719 = vmatprep.subr.bf16.mxu1 %v4297_v7  ;;  %v1952_v30 = vsel %vm1939_vm2, %v1949_v13, %v1951_v25  ;;  %v1058_v25 = vrot.slane %v4542_v39, 1 }
  0x5d   : > { %3879 = vmatprep.subr.bf16.mxu0 %v4298_v8  ;;  %3697 = vmatprep.mubr.bf16.mxu1 %v4503_v14  ;;  %v1950_v14 = vsel %vm1939_vm2, %v1947_v9, %v1949_v13  ;;  %v1958_v45 = vsel %vm1939_vm2, %v1955_v35, %v1957_v38  ;;  %v1960_v2 = vsel %vm1939_vm2, %v1957_v38, %v1959_v56  ;;  %v4320_v35 = vld [vmem:[%s5225_s2 + $0x1e0] sm:$0xff]   ;;  %v1068_v38 = vrot.slane %v4605_v29, 1 }
  0x5e   : > { %3857 = vmatprep.mubr.bf16.mxu0 %v1946_v12  ;;  %v1964_v9 = vsel %vm1939_vm2, %v1961_v60, %v1963_v6  ;;  %v4939_v60 = vld [vmem:[#allocation2 + $0x20] sm:$0xff]  ;;  %v4339_v6 = vld [vmem:[#allocation2 + $0x8] sm:$0xf0] }
  0x5f   : > { %3720 = vmatpush3.bf16.msra.mxu1 %v4297_v7  ;;  %v1051_v7 = vrot.slane %v1019_v5, 1  ;;  %v1074_v5 = vrot.slane %v4709_v34, 1 }
  0x60   : > { %3880 = vmatpush3.bf16.msra.mxu0 %v4298_v8  ;;  %3721 = vmatprep.subr.bf16.mxu1 %v4299_v15  ;;  %v4337_v8 = vld [vmem:[#allocation2 + $0x8] sm:$0xff] }
  0x61   : > { %3881 = vmatprep.subr.bf16.mxu0 %v4300_v16  ;;  %v1052_v12 = vrot.slane %v4337_v8, 1 }
  0x62   : > { %3698 = vmatmul.mubr.bf16.gmra.mrb[4].mxu1 %v4522_v22 }
  0x63   : > { %3858 = vmatmul.mubr.bf16.gmra.mrb[4].mxu0 %v1948_v19  ;;  %3722 = vmatpush3.bf16.msra.mxu1 %v4299_v15  ;;  %v1053_v15 = vsel %vm1050_vm3, %v1051_v7, %v1052_v12  ;;  %v1056_v19 = vrot.slane %v4522_v22, 1  ;;  %v1333_v7 = vrot.slane %v4339_v6, 4  ;;  %v4345_v6 = vld [vmem:[#allocation2 + $0x40] sm:$0xff] }
  0x64   : > { %3882 = vmatpush3.bf16.msra.mxu0 %v4300_v16  ;;  %3701 = vmatprep.mubr.bf16.mxu1 %v4542_v39  ;;  %v4862_v16 = vld [vmem:[#allocation2 + $0x10] sm:$0xff] }
  0x65   : > { %3861 = vmatprep.mubr.bf16.mxu0 %v1950_v14  ;;  %3723 = vmatprep.subr.bf16.mxu1 %v4301_v21  ;;  %v1054_v13 = vrot.slane %v4862_v16, 1  ;;  %v4314_v14 = vld [vmem:[%s5225_s2 + $0x1c8] sm:$0xff]   ;;  %v1334_v8 = vrot.slane %v4862_v16, 4  ;;  %v4340_v16 = vld [vmem:[#allocation2 + $0x18] sm:$0xff] }
  0x66   : > { %3883 = vmatprep.subr.bf16.mxu0 %v4302_v24 }
  0x67   : > { %3724 = vmatpush3.bf16.msra.mxu1 %v4301_v21  ;;  %v1055_v41 = vsel %vm1050_vm3, %v1052_v12, %v1054_v13  ;;  %v4313_v21 = vld [vmem:[%s5225_s2 + $0xc8] sm:$0xff]  }
  0x68   : > { %3884 = vmatpush3.bf16.msra.mxu0 %v4302_v24  ;;  %3725 = vmatprep.subr.bf16.mxu1 %v4303_v26  ;;  %v1057_v24 = vsel %vm1050_vm3, %v1054_v13, %v1056_v19  ;;  %v1075_v13 = vsel %vm1050_vm3, %v4825_v52, %v1074_v5 }
  0x69   : > { %3885 = vmatprep.subr.bf16.mxu0 %v4304_v28 }
  0x6a   : > { %3702 = vmatmul.mubr.bf16.gmra.mrb[8].mxu1 %v4551_v48 }
  0x6b   : > { %3862 = vmatmul.mubr.bf16.gmra.mrb[8].mxu0 %v1952_v30  ;;  %3705 = vmatprep.mubr.bf16.mxu1 %v4564_v63  ;;  %v4317_v30 = vld [vmem:[%s5225_s2 + $0xd8] sm:$0xff]  }
  0x6c   : > { %3865 = vmatprep.mubr.bf16.mxu0 %v1954_v31  ;;  %3726 = vmatpush3.bf16.msra.mxu1 %v4303_v26  ;;  %v4316_v26 = vld [vmem:[%s5225_s2 + $0x1d0] sm:$0xff]   ;;  %v4318_v31 = vld [vmem:[%s5225_s2 + $0x1d8] sm:$0xff]  }
  0x6d   : > { %3886 = vmatpush3.bf16.msra.mxu0 %v4304_v28  ;;  %3727 = vmatprep.subr.bf16.mxu1 %v4305_v32  ;;  %v1059_v28 = vsel %vm1050_vm3, %v1056_v19, %v1058_v25  ;;  %v1335_v19 = vsel %vm1332_vm4, %v1333_v7, %v1334_v8  ;;  %v1346_v7 = vrot.slane %v4345_v6, 4 }
  0x6e   : > { %3887 = vmatprep.subr.bf16.mxu0 %v4306_v33 }
  0x70   : > { %3728 = vmatpush3.bf16.msra.mxu1 %v4305_v32  ;;  %v1064_v32 = vrot.slane %v4571_v3, 1 }
  0x71   : > { %3888 = vmatpush3.bf16.msra.mxu0 %v4306_v33  ;;  %3729 = vmatprep.subr.bf16.mxu1 %v4307_v40  ;;  %v4319_v33 = vld [vmem:[%s5225_s2 + $0xe0] sm:$0xff]  }
  0x72   : > { %3706 = vmatmul.mubr.bf16.gmra.mrb[12].mxu1 %v4571_v3  ;;  %3889 = vmatprep.subr.bf16.mxu0 %v4308_v42 }
  0x73   : > { %3866 = vmatmul.mubr.bf16.gmra.mrb[12].mxu0 %v1956_v17  ;;  %3709 = vmatprep.mubr.bf16.mxu1 %v4595_v23  ;;  %v4924_v17 = vsel %vm1050_vm3, %v4832_v58, %v1068_v38 }
  0x74   : > { %3869 = vmatprep.mubr.bf16.mxu0 %v1958_v45  ;;  %3730 = vmatpush3.bf16.msra.mxu1 %v4307_v40  ;;  %v4323_v40 = vld [vmem:[%s5225_s2 + $0xf0] sm:$0xff]   ;;  %v4327_v45 = vld [vmem:[%s5225_s2 + $0x1f8] sm:$0xff]  }
  0x75   : > { %3890 = vmatpush3.bf16.msra.mxu0 %v4308_v42  ;;  %3731 = vmatprep.subr.bf16.mxu1 %v4309_v50  ;;  %v4324_v42 = vld [vmem:[%s5225_s2 + $0x1f0] sm:$0xff]  }
  0x76   : > { %3891 = vmatprep.subr.bf16.mxu0 %v4310_v10 }
  0x78   : > { %3732 = vmatpush3.bf16.msra.mxu1 %v4309_v50  ;;  %v2408_v50 = vld [vmem:[#allocation2 + $0x18] sm:$0xff] }
  0x79   : > { %3892 = vmatpush3.bf16.msra.mxu0 %v4310_v10  ;;  %3757 = vmatprep.subr.bf16.mxu1 %v4311_v61  ;;  %v1070_v10 = vrot.slane %v4632_v47, 1  ;;  %v2441_v56 = vshll.u32 %v2408_v50, 16 }
  0x7a   : > { %3710 = vmatmul.mubr.bf16.gmra.mrb[16].mxu1 %v4605_v29  ;;  %3917 = vmatprep.subr.bf16.mxu0 %v4312_v0 }
  0x7b   : > { %3870 = vmatmul.mubr.bf16.gmra.mrb[16].mxu0 %v1960_v2  ;;  %3713 = vmatprep.mubr.bf16.mxu1 %v4632_v47  ;;  %v2443_v2 = vrot.slane %v2441_v56, 1 }
  0x7c   : > { %3873 = vmatprep.mubr.bf16.mxu0 %v1962_v4  ;;  %v2446_v4 = vshll.u32 %v4939_v60, 16 }
  0x82   : > { %3714 = vmatmul.mubr.bf16.gmra.mrb[20].mxu1 %v4635_v49 }
  0x83   : > { %3874 = vmatmul.mubr.bf16.gmra.mrb[20].mxu0 %v1964_v9  ;;  %3733 = vmatprep.mubr.bf16.mxu1 %v1053_v15  ;;  %v2448_v9 = vrot.slane %v2446_v4, 1  ;;  %v4955_v15 = vld [vmem:[#allocation2 + $0x28] sm:$0xff]  ;;  %v4344_v4 = vld [vmem:[#allocation2 + $0x38] sm:$0xff] }
  0x84   : > { %3893 = vmatprep.mubr.bf16.mxu0 %v4522_v22  ;;  %v4315_v22 = vld [vmem:[%s5225_s2 + $0xd0] sm:$0xff]   ;;  %v2454_v34 = vshll.u32 %v4955_v15, 16  ;;  %v1344_v5 = vrot.slane %v4344_v4, 4 }
  0x8a   : > { %3734 = vmatmul.mubr.bf16.vlgmr.msra.gmra.mrb[0].mxu1 %v1055_v41  ;;  %v2450_v41 = vshrl.u32 %v4939_v60, 16 }
  0x8b   : > { %3894 = vmatmul.mubr.bf16.vlgmr.msra.gmra.mrb[0].mxu0 %v4542_v39  ;;  %3758 = vmatpush3.bf16.msra.mxu1 %v4311_v61  ;;  %v1061_v39 = vsel %vm1050_vm3, %v1058_v25, %v1060_v27  ;;  %v4942_v61 = vsel %vm1050_vm3, %v1068_v38, %v1070_v10  ;;  %v2458_v25 = vshrl.u32 %v4955_v15, 16 }
  0x8c   : > { %3918 = vmatpush3.bf16.msra.mxu0 %v4312_v0  ;;  %3759 = vmatprep.subr.bf16.mxu1 %v4313_v21  ;;  %v4946_v0 = vsel %vm1050_vm3, %v1070_v10, %v4825_v52 }
  0x8d   : > { %3919 = vmatprep.subr.bf16.mxu0 %v4314_v14  ;;  %3737 = vmatprep.mubr.bf16.mxu1 %v1057_v24  ;;  %v1336_v24 = vrot.slane %v4340_v16, 4  ;;  %v2518_v16 = vshll.u32 %v4677_v11, 16 }
  0x8e   : > { %3897 = vmatprep.mubr.bf16.mxu0 %v4551_v48  ;;  %v1062_v48 = vrot.slane %v4564_v63, 1 }
  0x8f   : > { %3760 = vmatpush3.bf16.msra.mxu1 %v4313_v21  ;;  %v4962_v21 = vld [vmem:[#allocation2 + $0x30] sm:$0xff] }
  0x90   : > { %3920 = vmatpush3.bf16.msra.mxu0 %v4314_v14  ;;  %3761 = vmatprep.subr.bf16.mxu1 %v4315_v22  ;;  %v1063_v36 = vsel %vm1050_vm3, %v1060_v27, %v1062_v48  ;;  %v2462_v52 = vshll.u32 %v4962_v21, 16  ;;  %v4341_v27 = vld [vmem:[#allocation2 + $0x20] sm:$0xff] }
  0x91   : > { %3921 = vmatprep.subr.bf16.mxu0 %v4316_v26 }
  0x92   : > { %3738 = vmatmul.mubr.bf16.gmra.mrb[4].mxu1 %v1059_v28  ;;  %v1338_v28 = vrot.slane %v4341_v27, 4 }
  0x93   : > { %3898 = vmatmul.mubr.bf16.gmra.mrb[4].mxu0 %v4564_v63  ;;  %3762 = vmatpush3.bf16.msra.mxu1 %v4315_v22  ;;  %v1065_v63 = vsel %vm1050_vm3, %v1062_v48, %v1064_v32  ;;  %v2452_v22 = vor.u32 %v2450_v41, %v2448_v9  ;;  %v1350_v41 = vrot.slane %v4632_v47, 4 }
  0x94   : > { %3922 = vmatpush3.bf16.msra.mxu0 %v4316_v26  ;;  %3741 = vmatprep.mubr.bf16.mxu1 %v1061_v39  ;;  %v2456_v26 = vrot.slane %v2454_v34, 1  ;;  %v1337_v39 = vsel %vm1332_vm4, %v1334_v8, %v1336_v24  ;;  %v4332_v8 = vld [vmem:[%s5225_s2 + $0x220] sm:$0xff]   ;;  %v4334_v34 = vld [vmem:[%s5225_s2 + $0x230] sm:$0xff]  }
  0x95   : > { %3901 = vmatprep.mubr.bf16.mxu0 %v4571_v3  ;;  %3763 = vmatprep.subr.bf16.mxu1 %v4317_v30  ;;  %v4322_v3 = vld [vmem:[%s5225_s2 + $0x1e8] sm:$0xff]  }
  0x96   : > { %3923 = vmatprep.subr.bf16.mxu0 %v4318_v31  ;;  %v2457_v48 = vsel %vm552_vm0, %v2452_v22, %v2456_v26  ;;  %v2520_v22 = vrot.slane %v2518_v16, 1 }
  0x97   : > { %3764 = vmatpush3.bf16.msra.mxu1 %v4317_v30  ;;  %v2460_v30 = vor.u32 %v2458_v25, %v2456_v26  ;;  %v4347_v25 = vld [vmem:[#allocation2 + $0x58] sm:$0xff]  ;;  %v1354_v26 = vrot.slane %v4655_v57, 4 }
  0x98   : > { %3924 = vmatpush3.bf16.msra.mxu0 %v4318_v31  ;;  %3765 = vmatprep.subr.bf16.mxu1 %v4319_v33  ;;  %v2464_v31 = vrot.slane %v2462_v52, 1  ;;  %v1352_v52 = vrot.slane %v4347_v25, 4 }
  0x99   : > { %3925 = vmatprep.subr.bf16.mxu0 %v4320_v35 }
  0x9a   : > { %3742 = vmatmul.mubr.bf16.gmra.mrb[8].mxu1 %v1063_v36  ;;  %v1339_v36 = vsel %vm1332_vm4, %v1336_v24, %v1338_v28  ;;  %v4336_v24 = vld [vmem:[%s5225_s2 + $0x238] sm:$0xff]  }
  0x9b   : > { %3902 = vmatmul.mubr.bf16.gmra.mrb[8].mxu0 %v4595_v23  ;;  %3745 = vmatprep.mubr.bf16.mxu1 %v1065_v63  ;;  %v1067_v23 = vsel %vm1050_vm3, %v1064_v32, %v4832_v58  ;;  %v4328_v58 = vld [vmem:[%s5225_s2 + $0x200] sm:$0xff]   ;;  %v4329_v32 = vld [vmem:[%s5225_s2 + $0x208] sm:$0xff]   ;;  %v2474_v63 = vshrl.u32 %v4827_v53, 16 }
  0x9c   : > { %3905 = vmatprep.mubr.bf16.mxu0 %v4605_v29  ;;  %3766 = vmatpush3.bf16.msra.mxu1 %v4319_v33  ;;  %v4326_v29 = vld [vmem:[%s5225_s2 + $0xf8] sm:$0xff]   ;;  %v2466_v33 = vshrl.u32 %v4962_v21, 16 }
  0x9d   : > { %3926 = vmatpush3.bf16.msra.mxu0 %v4320_v35  ;;  %3767 = vmatprep.subr.bf16.mxu1 %v4321_v37  ;;  %v2470_v35 = vshll.u32 %v4827_v53, 16 }
  0x9e   : > { %3927 = vmatprep.subr.bf16.mxu0 %v4322_v3 }
  0xa0   : > { %3768 = vmatpush3.bf16.msra.mxu1 %v4321_v37  ;;  %v2465_v37 = vsel %vm552_vm0, %v2460_v30, %v2464_v31  ;;  %v1353_v30 = vsel %vm1332_vm4, %v1350_v41, %v1352_v52 }
  0xa1   : > { %3928 = vmatpush3.bf16.msra.mxu0 %v4322_v3  ;;  %3769 = vmatprep.subr.bf16.mxu1 %v4323_v40  ;;  %v4342_v3 = vld [vmem:[#allocation2 + $0x28] sm:$0xff] }
  0xa2   : > { %3746 = vmatmul.mubr.bf16.gmra.mrb[12].mxu1 %v1067_v23  ;;  %3929 = vmatprep.subr.bf16.mxu0 %v4324_v42  ;;  %v1340_v38 = vrot.slane %v4342_v3, 4  ;;  %v4330_v23 = vld [vmem:[%s5225_s2 + $0x210] sm:$0xff]  }
  0xa3   : > { %3906 = vmatmul.mubr.bf16.gmra.mrb[12].mxu0 %v4632_v47  ;;  %3749 = vmatprep.mubr.bf16.mxu1 %v4924_v17  ;;  %v2526_v47 = vshll.u32 %v4765_v18, 16 }
  0xa4   : > { %3909 = vmatprep.mubr.bf16.mxu0 %v4635_v49  ;;  %3770 = vmatpush3.bf16.msra.mxu1 %v4323_v40  ;;  %v2439_v49 = vshrl.u32 %v2408_v50, 16  ;;  %v2468_v40 = vor.u32 %v2466_v33, %v2464_v31  ;;  %v1341_v10 = vsel %vm1332_vm4, %v1338_v28, %v1340_v38  ;;  %v1355_v31 = vsel %vm1332_vm4, %v1352_v52, %v1354_v26 }
  0xa5   : > { %3930 = vmatpush3.bf16.msra.mxu0 %v4324_v42  ;;  %3771 = vmatprep.subr.bf16.mxu1 %v4326_v29  ;;  %v2472_v42 = vrot.slane %v2470_v35, 1  ;;  %v2528_v28 = vrot.slane %v2526_v47, 1  ;;  %v2751_v35 = vld [vmem:[#allocation2 + $0x18] sm:$0xfe] }
  0xa6   : > { %3931 = vmatprep.subr.bf16.mxu0 %v4327_v45  ;;  %v2444_v12 = vor.u32 %v2443_v2, %v2439_v49  ;;  %v4331_v49 = vld [vmem:[%s5225_s2 + $0x218] sm:$0xff]   ;;  %v2782_v3 = vrot.slane %v2751_v35, 1 }
  0xa7   : > { %v2476_v50 = vor.u32 %v2474_v63, %v2472_v42  ;;  %v2473_v56 = vsel %vm552_vm0, %v2468_v40, %v2472_v42 }
  0xa8   : > { %3772 = vmatpush3.bf16.msra.mxu1 %v4326_v29  ;;  %v2449_v14 = vsel %vm552_vm0, %v2444_v12, %v2448_v9  ;;  %v4343_v29 = vld [vmem:[#allocation2 + $0x30] sm:$0xff]  ;;  %v4333_v9 = vld [vmem:[%s5225_s2 + $0x228] sm:$0xff]  }
  0xa9   : > { %3932 = vmatpush3.bf16.msra.mxu0 %v4327_v45  ;;  %3997 = vmatprep.subr.bf16.mxu1 %v4328_v58  ;;  %v1342_v45 = vrot.slane %v4343_v29, 4  ;;  %v2481_v2 = vsel %vm552_vm0, %v2476_v50, %v4649_v55  ;;  %v1347_v55 = vsel %vm1332_vm4, %v1344_v5, %v1346_v7  ;;  %v2787_v29 = vrot.slane %v4962_v21, 1 }
  0xaa   : > { %3750 = vmatmul.mubr.bf16.gmra.mrb[16].mxu1 %v4942_v61  ;;  %3957 = vmatprep.subr.bf16.mxu0 %v4328_v58 }
  0xab   : > { %3910 = vmatmul.mubr.bf16.gmra.mrb[16].mxu0 %v4655_v57  ;;  %3753 = vmatprep.mubr.bf16.mxu1 %v4946_v0  ;;  %v1345_v12 = vsel %vm1332_vm4, %v1342_v45, %v1344_v5 }
  0xac   : > { %3913 = vmatprep.mubr.bf16.mxu0 %v4677_v11 }
  0xb2   : > { %3754 = vmatmul.mubr.bf16.gmra.mrb[20].mxu1 %v1075_v13  ;;  %v4346_v13 = vld [vmem:[#allocation2 + $0x48] sm:$0xff] }
  0xb3   : > { %3914 = vmatmul.mubr.bf16.gmra.mrb[20].mxu0 %v4765_v18  ;;  %3773 = vmatprep.mubr.bf16.mxu1 %v1335_v19  ;;  %v1348_v19 = vrot.slane %v4346_v13, 4 }
  0xb4   : > { %3933 = vmatprep.mubr.bf16.mxu0 %v2449_v14 }
  0xb5   : > { %v1349_v14 = vsel %vm1332_vm4, %v1346_v7, %v1348_v19 }
  0xba   : > { %3774 = vmatmul.mubr.bf16.vlgmr.msra.gmra.mrb[0].mxu1 %v1337_v39  ;;  %v2420_v39 = vld [vmem:[#allocation2 + $0x78] sm:$0x1] }
  0xbb   : > { %3934 = vmatmul.mubr.bf16.vlgmr.msra.gmra.mrb[0].mxu0 %v2457_v48  ;;  %4005 = vmatpush3.bf16.msra.mxu1 %v4328_v58  ;;  %v1301_v48 = vld [vmem:[#allocation2 + $0x68] sm:$0xf] }
  0xbc   : > { %3958 = vmatpush3.bf16.msra.mxu0 %v4328_v58  ;;  %3998 = vmatprep.subr.bf16.mxu1 %v4329_v32  ;;  %v1343_v58 = vsel %vm1332_vm4, %v1340_v38, %v1342_v45 }
  0xbd   : > { %3959 = vmatprep.subr.bf16.mxu0 %v4329_v32  ;;  %3777 = vmatprep.mubr.bf16.mxu1 %v1339_v36  ;;  %v1356_v36 = vrot.slane %v1301_v48, 4 }
  0xbe   : > { %3937 = vmatprep.mubr.bf16.mxu0 %v2465_v37 }
  0xbf   : > { %4006 = vmatpush3.bf16.msra.mxu1 %v4329_v32  ;;  %v1357_v38 = vsel %vm1332_vm4, %v1354_v26, %v1356_v36 }
  0xc0   : > { %3960 = vmatpush3.bf16.msra.mxu0 %v4329_v32  ;;  %3999 = vmatprep.subr.bf16.mxu1 %v4330_v23  ;;  %v2530_v32 = vshrl.u32 %v4765_v18, 16 }
  0xc1   : > { %3961 = vmatprep.subr.bf16.mxu0 %v4330_v23 }
  0xc2   : > { %3778 = vmatmul.mubr.bf16.gmra.mrb[4].mxu1 %v1341_v10  ;;  %v2532_v63 = vor.u32 %v2530_v32, %v2528_v28  ;;  %v2803_v10 = vrot.slane %v4765_v18, 1 }
  0xc3   : > { %3938 = vmatmul.mubr.bf16.gmra.mrb[4].mxu0 %v2473_v56  ;;  %4007 = vmatpush3.bf16.msra.mxu1 %v4330_v23 }
  0xc4   : > { %3962 = vmatpush3.bf16.msra.mxu0 %v4330_v23  ;;  %3781 = vmatprep.mubr.bf16.mxu1 %v1343_v58  ;;  %v2785_v23 = vrot.slane %v4955_v15, 1  ;;  %v2790_v15 = vsel %vm1050_vm3, %v2787_v29, %v2789_v59 }
  0xc5   : > { %3941 = vmatprep.mubr.bf16.mxu0 %v2481_v2  ;;  %3963 = vmatprep.subr.bf16.mxu0 %v4331_v49 }
  0xc6   : > { %4000 = vmatprep.subr.bf16.mxu1 %v4331_v49  ;;  %v2788_v50 = vsel %vm1050_vm3, %v2785_v23, %v2787_v29  ;;  %v3035_v29 = vld [vmem:[%s5089_s6 + $0x78] sm:$0xff] }
  0xc7   : > { %4008 = vmatpush3.bf16.msra.mxu1 %v4331_v49 }
  0xc8   : > { %3964 = vmatpush3.bf16.msra.mxu0 %v4331_v49  ;;  %4001 = vmatprep.subr.bf16.mxu1 %v4332_v8 }
  0xc9   : > { %3965 = vmatprep.subr.bf16.mxu0 %v4332_v8 }
  0xca   : > { %3782 = vmatmul.mubr.bf16.gmra.mrb[8].mxu1 %v1345_v12 }
  0xcb   : > { %3942 = vmatmul.mubr.bf16.gmra.mrb[8].mxu0 %v4690_v20  ;;  %3785 = vmatprep.mubr.bf16.mxu1 %v1347_v55  ;;  %v1351_v20 = vsel %vm1332_vm4, %v1348_v19, %v1350_v41 }
  0xcc   : > { %3945 = vmatprep.mubr.bf16.mxu0 %v4725_v46  ;;  %3966 = vmatpush3.bf16.msra.mxu0 %v4332_v8  ;;  %v2522_v46 = vshrl.u32 %v4677_v11, 16 }
  0xcd   : > { %4009 = vmatpush3.bf16.msra.mxu1 %v4332_v8  ;;  %3967 = vmatprep.subr.bf16.mxu0 %v4333_v9 }
  0xce   : > { %4002 = vmatprep.subr.bf16.mxu1 %v4333_v9  ;;  %v2524_v27 = vor.u32 %v2522_v46, %v2520_v22 }
  0xd0   : > { %3968 = vmatpush3.bf16.msra.mxu0 %v4333_v9  ;;  %v2529_v33 = vsel %vm552_vm0, %v2524_v27, %v2528_v28 }
  0xd1   : > { %4010 = vmatpush3.bf16.msra.mxu1 %v4333_v9  ;;  %3969 = vmatprep.subr.bf16.mxu0 %v4334_v34 }
  0xd2   : > { %3786 = vmatmul.mubr.bf16.gmra.mrb[12].mxu1 %v1349_v14  ;;  %4003 = vmatprep.subr.bf16.mxu1 %v4334_v34 }
  0xd3   : > { %3946 = vmatmul.mubr.bf16.gmra.mrb[12].mxu0 %v4729_v51  ;;  %3789 = vmatprep.mubr.bf16.mxu1 %v1351_v20  ;;  %v2521_v51 = vsel %vm552_vm0, %v4808_v43, %v2520_v22  ;;  %v2783_v43 = vrot.slane %v4939_v60, 1  ;;  %v2801_v60 = vrot.slane %v4677_v11, 1 }
  0xd4   : > { %3949 = vmatprep.mubr.bf16.mxu0 %v4813_v44  ;;  %3970 = vmatpush3.bf16.msra.mxu0 %v4334_v34  ;;  %v2534_v44 = vshll.u32 %v2420_v39, 16 }
  0xd5   : > { %4011 = vmatpush3.bf16.msra.mxu1 %v4334_v34  ;;  %3971 = vmatprep.subr.bf16.mxu0 %v4336_v24  ;;  %v2784_v42 = vsel %vm1050_vm3, %v2782_v3, %v2783_v43  ;;  %v2786_v45 = vsel %vm1050_vm3, %v2783_v43, %v2785_v23  ;;  %v2804_v21 = vsel %vm1050_vm3, %v2801_v60, %v2803_v10  ;;  %v3022_v3 = vld [vmem:[%s5089_s6 + $0x10] sm:$0xff]  ;;  %v3023_v23 = vld [vmem:[%s5089_s6 + $0x18] sm:$0xff] }
  0xd6   : > { %4004 = vmatprep.subr.bf16.mxu1 %v4336_v24  ;;  %v2536_v37 = vrot.slane %v2534_v44, 1  ;;  %v3034_v43 = vld [vmem:[%s5089_s6 + $0x70] sm:$0xff] }
  0xd8   : > { %3972 = vmatpush3.bf16.msra.mxu0 %v4336_v24  ;;  %v2537_v40 = vsel %vm552_vm0, %v2532_v63, %v2536_v37 }
  0xd9   : > { %4012 = vmatpush3.bf16.msra.mxu1 %v4336_v24 }
  0xda   : > { %3790 = vmatmul.mubr.bf16.gmra.mrb[16].mxu1 %v1353_v30 }
  0xdb   : > { %3950 = vmatmul.mubr.bf16.gmra.mrb[16].mxu0 %v2521_v51  ;;  %3793 = vmatprep.mubr.bf16.mxu1 %v1355_v31 }
  0xdc   : > { %3953 = vmatprep.mubr.bf16.mxu0 %v2529_v33 }
  0xe2   : > { %3794 = vmatmul.mubr.bf16.gmra.mrb[20].mxu1 %v1357_v38  ;;  %v3032_v38 = vld [vmem:[%s5089_s6 + $0x60] sm:$0xff] }
  0xe3   : > { %3954 = vmatmul.mubr.bf16.gmra.mrb[20].mxu0 %v2537_v40  ;;  %3985 = vmatprep.mubr.bf16.mxu1 %v4942_v61  ;;  %v2802_v61 = vsel %vm1050_vm3, %v2799_v54, %v2801_v60  ;;  %v3026_v60 = vld [vmem:[%s5089_s6 + $0x30] sm:$0xff] }
  0xe4   : > { %3973 = vmatprep.mubr.bf16.mxu0 %v2784_v42  ;;  %v3020_v42 = vld [vmem:[%s5089_s6] sm:$0xff] }
  0xea   : > { %3986 = vmatmul.mubr.bf16.vlgmr.msra.gmra.mrb[24].mxu1 %v4946_v0  ;;  %v2805_v0 = vrot.slane %v2420_v39, 1 }
  0xeb   : > { %3974 = vmatmul.mubr.bf16.vlgmr.msra.gmra.mrb[0].mxu0 %v2786_v45  ;;  %3989 = vmatprep.mubr.bf16.mxu1 %v4843_v62  ;;  %v3021_v45 = vld [vmem:[%s5089_s6 + $0x8] sm:$0xff] }
  0xec   : > { %3977 = vmatprep.mubr.bf16.mxu0 %v2788_v50  ;;  %v2806_v11 = vsel %vm1050_vm3, %v2803_v10, %v2805_v0  ;;  %v3033_v50 = vld [vmem:[%s5089_s6 + $0x68] sm:$0xff]  ;;  %v3038_v10 = vld [vmem:[%s5089_s6 + $0x90] sm:$0xff]  ;;  %v3039_v0 = vld [vmem:[%s5089_s6 + $0x98] sm:$0xff] }
  0xf2   : > { %3990 = vmatmul.mubr.bf16.gmra.mrb[28].mxu1 %v2802_v61  ;;  %v5106_v61 = vld [vmem:[%s5089_s6 + $0x20] sm:$0xff] }
  0xf3   : > { %3978 = vmatmul.mubr.bf16.gmra.mrb[4].mxu0 %v2790_v15  ;;  %3993 = vmatprep.mubr.bf16.mxu1 %v2804_v21  ;;  %v3036_v15 = vld [vmem:[%s5089_s6 + $0x80] sm:$0xff]  ;;  %v5110_v21 = vld [vmem:[%s5089_s6 + $0x38] sm:$0xff] }
  0xf4   : > { %3981 = vmatprep.mubr.bf16.mxu0 %v4852_v1 }
  0xfa   : > { %3994 = vmatmul.mubr.bf16.gmra.mrb[32].mxu1 %v2806_v11  ;;  %v5114_v11 = vld [vmem:[%s5089_s6 + $0x28] sm:$0xff] }
  0xfb   : > { %3982 = vmatmul.mubr.bf16.gmra.mrb[8].mxu0 %v4924_v17 }
 0x18d   : > { %v5043_v57 = vpop.f32.mrb[0].mxu1 }
 0x18e   : > { %v5045_v18 = vpop.f32.mrb[1].mxu1 }
 0x18f   : > { %v5047_v53 = vpop.f32.mrb[2].mxu1 }
 0x190   : > { %v5049_v54 = vpop.f32.mrb[3].mxu1 }
 0x195   : > { %v5051_v59 = vpop.f32.mrb[4].mxu1 }
 0x196   : > { %v5053_v62 = vpop.f32.mrb[5].mxu1 }
 0x197   : > { %v5055_v56 = vpop.f32.mrb[6].mxu1 }
 0x198   : > { %v5057_v1 = vpop.f32.mrb[7].mxu1 }
 0x19d   : > { %v5059_v58 = vpop.f32.mrb[8].mxu1 }
 0x19e   : > { %v5061_v49 = vpop.f32.mrb[9].mxu1 }
 0x19f   : > { %v5063_v17 = vpop.f32.mrb[10].mxu1 }
 0x1a0   : > { %v5065_v2 = vpop.f32.mrb[11].mxu1 }
 0x1a5   : > { %v3787_v4 = vpop.f32.mrb[12].mxu1 }
 0x1a6   : > { %v3947_v5 = vpop.f32.mrb[12].mxu0  ;;  %v1500_v6 = vpop.f32.mrb[13].mxu1 }
 0x1a7   : > { %v4025_v7 = vadd.f32 %v3947_v5, %v3787_v4  ;;  %v2680_v8 = vpop.f32.mrb[13].mxu0  ;;  %v3788_v12 = vpop.f32.mrb[14].mxu1  ;;  %v5117_v4 = vld [vmem:[%s5089_s6 + $0x88] sm:$0xff]  ;;  %v5120_v5 = vld [vmem:[%s5089_s6 + $0x50] sm:$0xff] }
 0x1a8   : > { %v4027_v55 = vadd.f32 %v2680_v8, %v1500_v6  ;;  %v3948_v9 = vpop.f32.mrb[14].mxu0  ;;  %v1503_v13 = vpop.f32.mrb[15].mxu1  ;;  %v5123_v6 = vld [vmem:[%s5089_s6 + $0xb0] sm:$0xff] }
 0x1a9   : > { %v5067_v19 = vadd.f32 %v3948_v9, %v3788_v12  ;;  %v2683_v41 = vpop.f32.mrb[15].mxu0 }
 0x1aa   : > { %v5069_v34 = vadd.f32 %v2683_v41, %v1503_v13  ;;  %v5126_v13 = vld [vmem:[%s5089_s6 + $0x40] sm:$0xff] }
 0x1ab   : > { %v5129_v41 = vld [vmem:[%s5089_s6 + $0xa0] sm:$0xff] }
 0x1ad   : > { %v3791_v14 = vpop.f32.mrb[16].mxu1 }
 0x1ae   : > { %v3951_v16 = vpop.f32.mrb[16].mxu0  ;;  %v1516_v20 = vpop.f32.mrb[17].mxu1 }
 0x1af   : > { %v5071_v46 = vadd.f32 %v3951_v16, %v3791_v14  ;;  %v2696_v47 = vpop.f32.mrb[17].mxu0  ;;  %v3792_v24 = vpop.f32.mrb[18].mxu1  ;;  %v5132_v14 = vld [vmem:[%s5089_s6 + $0x58] sm:$0xff] }
 0x1b0   : > { %v5073_v25 = vadd.f32 %v2696_v47, %v1516_v20  ;;  %v3952_v52 = vpop.f32.mrb[18].mxu0  ;;  %v1519_v22 = vpop.f32.mrb[19].mxu1 }
 0x1b1   : > { %v5075_v26 = vadd.f32 %v3952_v52, %v3792_v24  ;;  %v2699_v27 = vpop.f32.mrb[19].mxu0  ;;  %v5143_v52 = vld [vmem:[%s5089_s6 + $0xb8] sm:$0xff] }
 0x1b2   : > { %v5077_v28 = vadd.f32 %v2699_v27, %v1519_v22  ;;  %v5149_v22 = vld [vmem:[%s5089_s6 + $0xa8] sm:$0xff] }
 0x1b5   : > { %v3795_v39 = vpop.f32.mrb[20].mxu1 }
 0x1b6   : > { %v3955_v30 = vpop.f32.mrb[20].mxu0  ;;  %v1532_v51 = vpop.f32.mrb[21].mxu1 }
 0x1b7   : > { %v5080_v31 = vadd.f32 %v3955_v30, %v3795_v39  ;;  %v2712_v48 = vpop.f32.mrb[21].mxu0  ;;  %v3796_v32 = vpop.f32.mrb[22].mxu1 }
 0x1b8   : > { %v5082_v44 = vadd.f32 %v2712_v48, %v1532_v51  ;;  %v3956_v33 = vpop.f32.mrb[22].mxu0  ;;  %v1535_v35 = vpop.f32.mrb[23].mxu1 }
 0x1b9   : > { %v5091_v36 = vadd.f32 %v3956_v33, %v3796_v32  ;;  %v2715_v63 = vpop.f32.mrb[23].mxu0 }
 0x1ba   : > { %v5093_v37 = vadd.f32 %v2715_v63, %v1535_v35 }
 0x1bd   : > { %v3987_v40 = vpop.f32.mrb[24].mxu1 }
 0x1be   : > { %v3975_v8 = vpop.f32.mrb[0].mxu0  ;;  %v4026_v12 = vadd.f32 %v4025_v7, %v3987_v40  ;;  %v2949_v9 = vpop.f32.mrb[25].mxu1  ;;  %v5146_v7 = vld [vmem:[%s5089_s6 + $0x48] sm:$0xff] }
 0x1bf   : > { %v4013_v16 = vadd.f32 %v3975_v8, %v5043_v57  ;;  %v2901_v20 = vpop.f32.mrb[1].mxu0  ;;  %v4028_v47 = vadd.f32 %v4027_v55, %v2949_v9  ;;  %v3988_v24 = vpop.f32.mrb[26].mxu1 }
 0x1c0   : > { %v3058_v27 = vadd.f32 %v4026_v12, %v3034_v43  ;;  %v4014_v39 = vadd.f32 %v2901_v20, %v5045_v18  ;;  %v3976_v30 = vpop.f32.mrb[2].mxu0  ;;  %v4030_v51 = vadd.f32 %v5067_v19, %v3988_v24  ;;  %v2952_v57 = vpop.f32.mrb[27].mxu1 }
 0x1c1   : > { %v3046_v55 = vadd.f32 %v4013_v16, %v3022_v3  ;;  %v3056_v48 = vadd.f32 %v4028_v47, %v3032_v38  ;;  %v4015_v32 = vadd.f32 %v3976_v30, %v5047_v53  ;;  %v2904_v33 = vpop.f32.mrb[3].mxu0  ;;  %v4032_v35 = vadd.f32 %v5069_v34, %v2952_v57 }
 0x1c2   : > { %v3044_v63 = vadd.f32 %v4014_v39, %v3020_v42  ;;  %v3059_v43 = vadd.f32 %v4030_v51, %v3035_v29  ;;  %v4016_v18 = vadd.f32 %v2904_v33, %v5049_v54  ;;  %3082 = vst [vmem:[%s5139_s9 + $0x70] sm:$0xff] %v3058_v27 }
 0x1c3   : > { %v3047_v40 = vadd.f32 %v4015_v32, %v3023_v23  ;;  %v3057_v19 = vadd.f32 %v4032_v35, %v3033_v50  ;;  %3070 = vst [vmem:[%s5139_s9 + $0x10] sm:$0xff] %v3046_v55  ;;  %3080 = vst [vmem:[%s5139_s9 + $0x60] sm:$0xff] %v3056_v48 }
 0x1c4   : > { %v3045_v8 = vadd.f32 %v4016_v18, %v3021_v45  ;;  %3068 = vst [vmem:[%s5139_s9] sm:$0xff] %v3044_v63  ;;  %3083 = vst [vmem:[%s5139_s9 + $0x78] sm:$0xff] %v3059_v43 }
 0x1c5   : > { %v3991_v3 = vpop.f32.mrb[28].mxu1  ;;  %3071 = vst [vmem:[%s5139_s9 + $0x18] sm:$0xff] %v3047_v40  ;;  %3081 = vst [vmem:[%s5139_s9 + $0x68] sm:$0xff] %v3057_v19 }
 0x1c6   : > { %v3979_v53 = vpop.f32.mrb[4].mxu0  ;;  %v4034_v38 = vadd.f32 %v5071_v46, %v3991_v3  ;;  %v2965_v34 = vpop.f32.mrb[29].mxu1  ;;  %3069 = vst [vmem:[%s5139_s9 + $0x8] sm:$0xff] %v3045_v8 }
 0x1c7   : > { %v4017_v42 = vadd.f32 %v3979_v53, %v5051_v59  ;;  %v2917_v29 = vpop.f32.mrb[5].mxu0  ;;  %v4036_v54 = vadd.f32 %v5073_v25, %v2965_v34  ;;  %v3992_v23 = vpop.f32.mrb[30].mxu1 }
 0x1c8   : > { %v3062_v50 = vadd.f32 %v4034_v38, %v3038_v10  ;;  %v4018_v45 = vadd.f32 %v2917_v29, %v5053_v62  ;;  %v3980_v12 = vpop.f32.mrb[6].mxu0  ;;  %v4038_v9 = vadd.f32 %v5075_v26, %v3992_v23  ;;  %v2968_v16 = vpop.f32.mrb[31].mxu1 }
 0x1c9   : > { %v3050_v46 = vadd.f32 %v4017_v42, %v3026_v60  ;;  %v3060_v20 = vadd.f32 %v4036_v54, %v3036_v15  ;;  %v4019_v59 = vadd.f32 %v3980_v12, %v5055_v56  ;;  %v2920_v47 = vpop.f32.mrb[7].mxu0  ;;  %v4040_v25 = vadd.f32 %v5077_v28, %v2968_v16 }
 0x1ca   : > { %v3048_v10 = vadd.f32 %v4018_v45, %v5106_v61  ;;  %v3063_v24 = vadd.f32 %v4038_v9, %v3039_v0  ;;  %v4020_v62 = vadd.f32 %v2920_v47, %v5057_v1  ;;  %3086 = vst [vmem:[%s5139_s9 + $0x90] sm:$0xff] %v3062_v50 }
 0x1cb   : > { %v3051_v26 = vadd.f32 %v4019_v59, %v5110_v21  ;;  %v3061_v27 = vadd.f32 %v4040_v25, %v5117_v4  ;;  %3074 = vst [vmem:[%s5139_s9 + $0x30] sm:$0xff] %v3050_v46  ;;  %3084 = vst [vmem:[%s5139_s9 + $0x80] sm:$0xff] %v3060_v20 }
 0x1cc   : > { %v3049_v60 = vadd.f32 %v4020_v62, %v5114_v11  ;;  %3072 = vst [vmem:[%s5139_s9 + $0x20] sm:$0xff] %v3048_v10  ;;  %3087 = vst [vmem:[%s5139_s9 + $0x98] sm:$0xff] %v3063_v24 }
 0x1cd   : > { %v3995_v56 = vpop.f32.mrb[32].mxu1  ;;  %3075 = vst [vmem:[%s5139_s9 + $0x38] sm:$0xff] %v3051_v26  ;;  %3085 = vst [vmem:[%s5139_s9 + $0x88] sm:$0xff] %v3061_v27 }
 0x1ce   : > { %v3983_v28 = vpop.f32.mrb[8].mxu0  ;;  %v4042_v61 = vadd.f32 %v5080_v31, %v3995_v56  ;;  %v2981_v15 = vpop.f32.mrb[33].mxu1  ;;  %3073 = vst [vmem:[%s5139_s9 + $0x28] sm:$0xff] %v3049_v60 }
 0x1cf   : > { %v4021_v1 = vadd.f32 %v3983_v28, %v5059_v58  ;;  %v2933_v0 = vpop.f32.mrb[9].mxu0  ;;  %v4044_v21 = vadd.f32 %v5082_v44, %v2981_v15  ;;  %v3996_v4 = vpop.f32.mrb[34].mxu1 }
 0x1d0   : > { %v3066_v39 = vadd.f32 %v4042_v61, %v5123_v6  ;;  %v4022_v11 = vadd.f32 %v2933_v0, %v5061_v49  ;;  %v3984_v30 = vpop.f32.mrb[10].mxu0  ;;  %v4046_v51 = vadd.f32 %v5091_v36, %v3996_v4  ;;  %v2984_v31 = vpop.f32.mrb[35].mxu1 }
 0x1d1   : > { %v3054_v57 = vadd.f32 %v4021_v1, %v5120_v5  ;;  %v3064_v58 = vadd.f32 %v4044_v21, %v5129_v41  ;;  %v4023_v44 = vadd.f32 %v3984_v30, %v5063_v17  ;;  %v2936_v6 = vpop.f32.mrb[11].mxu0  ;;  %v4048_v55 = vadd.f32 %v5093_v37, %v2984_v31 }
 0x1d2   : > { %v3052_v49 = vadd.f32 %v4022_v11, %v5126_v13  ;;  %v3067_v48 = vadd.f32 %v4046_v51, %v5143_v52  ;;  %v4024_v36 = vadd.f32 %v2936_v6, %v5065_v2  ;;  %3090 = vst [vmem:[%s5139_s9 + $0xb0] sm:$0xff] %v3066_v39 }
 0x1d3   : > { %v3055_v32 = vadd.f32 %v4023_v44, %v5132_v14  ;;  %v3065_v5 = vadd.f32 %v4048_v55, %v5149_v22  ;;  %3078 = vst [vmem:[%s5139_s9 + $0x50] sm:$0xff] %v3054_v57  ;;  %3088 = vst [vmem:[%s5139_s9 + $0xa0] sm:$0xff] %v3064_v58 }
 0x1d4   : > { %v3053_v41 = vadd.f32 %v4024_v36, %v5146_v7  ;;  %3076 = vst [vmem:[%s5139_s9 + $0x40] sm:$0xff] %v3052_v49  ;;  %3091 = vst [vmem:[%s5139_s9 + $0xb8] sm:$0xff] %v3067_v48 }
 0x1d5   : > { %3079 = vst [vmem:[%s5139_s9 + $0x58] sm:$0xff] %v3055_v32  ;;  %3089 = vst [vmem:[%s5139_s9 + $0xa8] sm:$0xff] %v3065_v5 }
 0x1d6   : > { %3077 = vst [vmem:[%s5139_s9 + $0x48] sm:$0xff] %v3053_v41 }
 0x1d7 PF: > { %s14_s19 = sadd.s32 1, %s4386_s19   ;;  %s5228_s15 = smov %s4378_s17 }
 0x1d8   : > { %p11_p9 = scmp.ge.s32.totalorder %s14_s19, 6   ;;  %s5229_s16 = smov %s4382_s18 }
 0x1d9   : > { %s5230_s17 = smov %s5233_s20  ;;  %s5231_s18 = smov %s5237_s21 }
 0x1da   :  { %13 = sbr.rel (!%p11_p9) target bundleno = 3 (0x3), region = 80 }

// kernel: res_block_forward.2
= control target key start
LH: loop header
LB: loop body
LE: loop exit
PB: predicated region body
PF: predicated region fallthrough
CT: control target
= control target key end

     0   :  { %s5016_s15 = smov 0   ;;  %s5018_s16 = smov 0   ;;  %s6584_s0 = inlined_call_operand.vmem [shape: bf16[2,480,128], index: 0, kind: input, shape index: {}, may-alias: {0,1}]   ;;  %s6585_s1 = inlined_call_operand.vmem [shape: bf16[2,480,128], index: 1, kind: input, shape index: {}, may-alias: {0,1}]   ;;  %s6586_s2 = inlined_call_operand.vmem [shape: bf16[9,128,128], index: 2, kind: input, shape index: {}]   ;;  %s6587_s3 = inlined_call_operand.vmem [shape: f32[2,384,128], index: 3, kind: output, shape index: {0}]   ;;  %s6588_s4 = inlined_call_operand.vmem [shape: f32[2,2,2,128], index: 4, kind: output, shape index: {1}]  }
   0x1   :  { %s5020_s17 = smov 0   ;;  %s5022_s18 = smov 0  }
   0x2   :  { %s5024_s19 = smov 0  }
   0x3 LB: > { %s24_s20 = sadd.s32 1, %s4981_s17  ;;  %s27_s21 = sadd.s32 1, %s4985_s18  ;;  %s4989_s19 = sphi %s5024_s19, %s15_s19   ;;  %s4985_s18 = sphi %s5022_s18, %s6741_s18   ;;  %s4981_s17 = sphi %s5020_s17, %s6740_s17   ;;  %s4977_s16 = sphi %s5018_s16, %s6739_s16   ;;  %s4973_s15 = sphi %s5016_s15, %s6738_s15  }
   0x4   : > { %p25_p0 = scmp.ge.s32.totalorder %s24_s20, 2  ;;  %p3780_p1 = scmp.ge.s32.totalorder %s4989_s19, 1 }
   0x5   : > { %p221_p2 = scmp.lt.s32.totalorder %s4989_s19, 5 }
   0x6   : > { %s6743_s20 = smov (%p25_p0, %s24_s20), 0  ;;  %s6745_s21 = smov (!%p25_p0, %s27_s21), %s4985_s18 }
   0x7   : > { %p222_p3 = pnand %p3780_p1, %p221_p2  ;;  %p29_p4 = scmp.ge.s32.totalorder %s6745_s21, 2 }
   0x9   : > { %s6747_s21 = smov (%p29_p4, %s6745_s21), 0  ;;  %225 = sbr.rel (%p222_p3) target bundleno = 526 (0x20e), region = 32 }
  0x10   : > { %v4852_v0 = vld [vmem:[%s6586_s2 + $0x40] sm:$0xff]   ;;  %s5052_s24 = smul.u32 24, %s4973_s15  ;;  %p283_p5 = scmp.lt.s32.totalorder %s4977_s16, 1  ;;  %v4854_v2 = vld [vmem:[%s6586_s2 + $0x48] sm:$0xff]   ;;  %v4856_v4 = vld [vmem:[%s6586_s2 + $0x50] sm:$0xff]   ;;  %vm1035_vm2 = vcmask 1046528  }
  0x11   : > { %v4853_v1 = vld [vmem:[%s6586_s2 + $0x100] sm:$0xff]   ;;  %4194 = vmatprep.subr.bf16.mxu1 %v4852_v0  ;;  %v4855_v3 = vld [vmem:[%s6586_s2 + $0x108] sm:$0xff]   ;;  %v4857_v5 = vld [vmem:[%s6586_s2 + $0x110] sm:$0xff]   ;;  %s296_s25 = sadd.s32 1, %s4973_s15  ;;  %vm537_vm0 = vsmask.f32 7424 }
  0x12   : > { %p285_p6 = scmp.lt.s32.totalorder %s5052_s24, 59  ;;  %4354 = vmatprep.subr.bf16.mxu0 %v4853_v1  ;;  %4195 = vmatpush3.bf16.msra.mxu1 %v4852_v0  ;;  %s6749_s16 = smov (!%p283_p5, %s4977_s16), 1  ;;  %v4858_v6 = vld [vmem:[%s6586_s2 + $0x58] sm:$0xff]   ;;  %v4860_v8 = vld [vmem:[%s6586_s2 + $0x60] sm:$0xff]   ;;  %v4862_v10 = vld [vmem:[%s6586_s2 + $0x68] sm:$0xff]   ;;  %vm1924_vm3 = vcmask 1042432  }
  0x13   : > { %4355 = vmatpush3.bf16.msra.mxu0 %v4853_v1  ;;  %4196 = vmatprep.subr.bf16.mxu1 %v4854_v2  ;;  %s4762_s10 = smul.u32 60, %s6749_s16  ;;  %v4859_v7 = vld [vmem:[%s6586_s2 + $0x118] sm:$0xff]   ;;  %v4861_v9 = vld [vmem:[%s6586_s2 + $0x120] sm:$0xff]   ;;  %v4863_v11 = vld [vmem:[%s6586_s2 + $0x128] sm:$0xff]   ;;  %vm1574_vm1 = vsmask.f32 3328 }
  0x14   : > { %s286_s7 = scalar_select %p285_p6, %s5052_s24, 59  ;;  %4356 = vmatprep.subr.bf16.mxu0 %v4855_v3  ;;  %v4864_v15 = vld [vmem:[%s6586_s2 + $0x70] sm:$0xff]   ;;  %v4866_v27 = vld [vmem:[%s6586_s2 + $0x78] sm:$0xff]   ;;  %v4872_v49 = vld [vmem:[%s6586_s2 + $0x140] sm:$0xff]   ;;  %vm1317_vm4 = vcmask 1043456  }
  0x15   : > { %s5097_s9 = smul.u32 24, %s296_s25  ;;  %v4865_v16 = vld [vmem:[%s6586_s2 + $0x130] sm:$0xff]   ;;  %v4867_v31 = vld [vmem:[%s6586_s2 + $0x138] sm:$0xff]   ;;  %v4878_v58 = vld [vmem:[%s6586_s2] sm:$0xff]   ;;  %p313_p8 = scmp.lt.s32.totalorder %s5052_s24, 47 }
  0x16   : > { %4197 = vmatpush3.bf16.msra.mxu1 %v4854_v2  ;;  %s288_s13 = sadd.s32 %s4762_s10, %s286_s7  ;;  %v4873_v61 = vld [vmem:[%s6586_s2 + $0x148] sm:$0xff]   ;;  %s4763_s25 = smul.u32 48, %s6749_s16 }
  0x17   : > { %4357 = vmatpush3.bf16.msra.mxu0 %v4855_v3  ;;  %4198 = vmatprep.subr.bf16.mxu1 %v4856_v4  ;;  %s3781_s23 = sshll.u32 %s288_s13, 2  ;;  %p301_p7 = scmp.lt.s32.totalorder %s5097_s9, 59 }
  0x18   : > { %4358 = vmatprep.subr.bf16.mxu0 %v4857_v5  ;;  %s5095_s8 = scalar_lea.vmem %s6584_s0, %s3781_s23  ;;  %s6753_s24 = smov (!%p313_p8, %s5052_s24), 47 }
  0x19   : > { %v5103_v12 = vld [vmem:[%s5095_s8] sm:$0xff]   ;;  %v5106_v13 = vld [vmem:[%s5095_s8 + $0x8] sm:$0xff]   ;;  %v5109_v14 = vld [vmem:[%s5095_s8 + $0x10] sm:$0xff]   ;;  %s6751_s9 = smov (!%p301_p7, %s5097_s9), 59  ;;  %s6063_s26 = sadd.s32 %s4763_s25, %s6753_s24 }
  0x1a   : > { %4199 = vmatpush3.bf16.msra.mxu1 %v4856_v4  ;;  %425 = vst [vmem:[#allocation2] sm:$0xff] %v5103_v12  ;;  %426 = vst [vmem:[#allocation2 + $0x8] sm:$0xff] %v5106_v13  ;;  %v539_v17 = vshrl.u32 %v5103_v12, 16  ;;  %v541_v18 = vshll.u32 %v5103_v12, 16  ;;  %v546_v19 = vshll.u32 %v5106_v13, 16  ;;  %v5124_v20 = vld [vmem:[%s5095_s8 + $0x18] sm:$0xff]   ;;  %s5207_s14 = sadd.s32 %s4762_s10, %s6751_s9 }
  0x1b   : > { %4359 = vmatpush3.bf16.msra.mxu0 %v4857_v5  ;;  %4200 = vmatprep.subr.bf16.mxu1 %v4858_v6  ;;  %v1584_v21 = vshrl.u32 %v5109_v14, 16  ;;  %v1587_v22 = vshll.u32 %v5109_v14, 16  ;;  %428 = vst [vmem:[#allocation2 + $0x18] sm:$0xff] %v5124_v20  ;;  %v1593_v25 = vshrl.u32 %v5124_v20, 16  ;;  %v1596_v26 = vshll.u32 %v5124_v20, 16  ;;  %v5141_v36 = vld [vmem:[%s5095_s8 + $0x20] sm:$0xff]  }
  0x1c   : > { %4360 = vmatprep.subr.bf16.mxu0 %v4859_v7  ;;  %v543_v23 = vrot.slane %v541_v18, 1  ;;  %v548_v24 = vrot.slane %v546_v19, 1  ;;  %v550_v30 = vshrl.u32 %v5106_v13, 16  ;;  %429 = vst [vmem:[#allocation2 + $0x20] sm:$0xff] %v5141_v36  ;;  %v1602_v41 = vshrl.u32 %v5141_v36, 16  ;;  %v5150_v43 = vld [vmem:[%s5095_s8 + $0x28] sm:$0xff]  }
  0x1d   : > { %v1586_v28 = vrot.slane %v1584_v21, 4  ;;  %v1589_v29 = vrot.slane %v1587_v22, 5  ;;  %v556_v33 = vrot.slane %v1587_v22, 1  ;;  %v1595_v34 = vrot.slane %v1593_v25, 4  ;;  %430 = vst [vmem:[#allocation2 + $0x28] sm:$0xff] %v5150_v43  ;;  %v5161_v56 = vld [vmem:[%s5095_s8 + $0x30] sm:$0xff]  }
  0x1e   : > { %4201 = vmatpush3.bf16.msra.mxu1 %v4858_v6  ;;  %v544_v32 = vor.u32 %v543_v23, %v539_v17  ;;  %v1598_v35 = vrot.slane %v1596_v26, 5  ;;  %v552_v39 = vor.u32 %v550_v30, %v548_v24  ;;  %v564_v40 = vrot.slane %v1596_v26, 1  ;;  %431 = vst [vmem:[#allocation2 + $0x30] sm:$0xff] %v5161_v56  ;;  %v5180_v0 = vld [vmem:[%s5095_s8 + $0x38] sm:$0xff]   ;;  %v5202_v22 = vld [vmem:[%s5095_s8 + $0x48] sm:$0xff]   ;;  %v4876_v23 = vld [vmem:[%s6586_s2 + $0x150] sm:$0xff]  }
  0x1f   : > { %4361 = vmatpush3.bf16.msra.mxu0 %v4859_v7  ;;  %4202 = vmatprep.subr.bf16.mxu1 %v4860_v8  ;;  %v1605_v42 = vshll.u32 %v5141_v36, 16  ;;  %v1590_v46 = vor.u32 %v1589_v29, %v1586_v28  ;;  %v560_v47 = vor.u32 %v1584_v21, %v556_v33  ;;  %v1604_v50 = vrot.slane %v1602_v41, 4  ;;  %432 = vst [vmem:[#allocation2 + $0x38] sm:$0xff] %v5180_v0  ;;  %s3784_s27 = sshll.u32 %s5207_s14, 2  ;;  %s3785_s24 = sshll.u32 %s6063_s26, 3 }
  0x20   : > { %4362 = vmatprep.subr.bf16.mxu0 %v4861_v9  ;;  %v549_v37 = vsel %vm537_vm0, %v544_v32, %v548_v24  ;;  %v1599_v48 = vor.u32 %v1598_v35, %v1595_v34  ;;  %v1611_v52 = vshrl.u32 %v5150_v43, 16  ;;  %v1614_v55 = vshll.u32 %v5150_v43, 16  ;;  %434 = vst [vmem:[#allocation2 + $0x48] sm:$0xff] %v5202_v22  ;;  %v4880_v32 = vld [vmem:[%s6586_s2 + $0x158] sm:$0xff]   ;;  %s5261_s13 = scalar_lea.vmem %s6585_s1, %s3784_s27  ;;  %s6169_s9 = scalar_lea.vmem %s6587_s3, %s3785_s24 }
  0x21   : > { %4210 = vmatprep.mubr.bf16.mxu1 %v549_v37  ;;  %v5144_v38 = vld [vmem:[#allocation2 + $0x8] sm:$0xf0]  ;;  %v1607_v51 = vrot.slane %v1605_v42, 5  ;;  %v557_v60 = vsel %vm537_vm0, %v552_v39, %v556_v33  ;;  %v1620_v63 = vshrl.u32 %v5161_v56, 16  ;;  %v565_v2 = vsel %vm537_vm0, %v560_v47, %v564_v40  ;;  %v4886_v39 = vld [vmem:[%s6586_s2 + $0x18] sm:$0xff]   ;;  %p322_p9 = scmp.lt.s32.totalorder %s4973_s15, 1 }
  0x22   : > { %4203 = vmatpush3.bf16.msra.mxu1 %v4860_v8  ;;  %v1576_v44 = vshrl.u32 %v5144_v38, 16  ;;  %v1579_v45 = vshll.u32 %v5144_v38, 16  ;;  %v1613_v62 = vrot.slane %v1611_v52, 4  ;;  %v1600_v1 = vsel %vm1574_vm1, %v1590_v46, %v1599_v48  ;;  %s3786_s27 = sshll.u32 %s6749_s16, 1 }
  0x23   : > { %4363 = vmatpush3.bf16.msra.mxu0 %v4861_v9  ;;  %4204 = vmatprep.subr.bf16.mxu1 %v4862_v10  ;;  %v1608_v57 = vor.u32 %v1607_v51, %v1604_v50  ;;  %v1616_v3 = vrot.slane %v1614_v55, 5  ;;  %v1623_v4 = vshll.u32 %v5161_v56, 16  ;;  %v572_v7 = vrot.slane %v1605_v42, 1  ;;  %v5234_v42 = vld [vmem:[%s5095_s8 + $0x50] sm:$0xff]   ;;  %s6755_s15 = smov (!%p322_p9, %s4973_s15), 1 }
  0x24   : > { %4364 = vmatprep.subr.bf16.mxu0 %v4863_v11  ;;  %v1578_v53 = vrot.slane %v1576_v44, 4  ;;  %v1581_v54 = vrot.slane %v1579_v45, 5  ;;  %v1622_v8 = vrot.slane %v1620_v63, 4  ;;  %v580_v17 = vrot.slane %v1614_v55, 1  ;;  %435 = vst [vmem:[#allocation2 + $0x50] sm:$0xff] %v5234_v42  ;;  %v4889_v55 = vld [vmem:[%s6586_s2 + $0x20] sm:$0xff]   ;;  %s325_s28 = sadd.s32 %s3786_s27, %s6755_s15 }
  0x25   : > { %v1609_v6 = vsel %vm1574_vm1, %v1599_v48, %v1608_v57  ;;  %v1625_v9 = vrot.slane %v1623_v4, 5  ;;  %v1629_v18 = vshrl.u32 %v5180_v0, 16  ;;  %v1617_v19 = vor.u32 %v1616_v3, %v1613_v62  ;;  %s3787_s29 = sshll.u32 %s325_s28, 1 }
  0x26   : > { %4205 = vmatpush3.bf16.msra.mxu1 %v4862_v10  ;;  %v1582_v59 = vor.u32 %v1581_v54, %v1578_v53  ;;  %v4881_v10 = vld [vmem:[%s6586_s2 + $0x8] sm:$0xff]   ;;  %v1632_v21 = vshll.u32 %v5180_v0, 16  ;;  %v588_v30 = vrot.slane %v1623_v4, 1  ;;  %v584_v44 = vor.u32 %v1611_v52, %v580_v17  ;;  %v5249_v53 = vld [vmem:[%s5095_s8 + $0x58] sm:$0xff]   ;;  %s327_s6 = scalar_lea.vmem %s6588_s4, %s3787_s29 }
  0x27   : > { %4365 = vmatpush3.bf16.msra.mxu0 %v4863_v11  ;;  %4206 = vmatprep.subr.bf16.mxu1 %v4864_v15  ;;  %v5194_v11 = vld [vmem:[%s5095_s8 + $0x40] sm:$0xff]   ;;  %v1626_v24 = vor.u32 %v1625_v9, %v1622_v8  ;;  %v1618_v33 = vsel %vm1574_vm1, %v1608_v57, %v1617_v19  ;;  %v1647_v45 = vshrl.u32 %v5202_v22, 16  ;;  %v1656_v50 = vshrl.u32 %v5234_v42, 16  ;;  %436 = vst [vmem:[#allocation2 + $0x58] sm:$0xff] %v5249_v53  ;;  %v4891_v4 = vld [vmem:[%s6586_s2 + $0x28] sm:$0xff]   ;;  %v4892_v8 = vld [vmem:[%s6586_s2 + $0x170] sm:$0xff]  }
  0x28   : > { %4366 = vmatprep.subr.bf16.mxu0 %v4865_v16  ;;  %v1591_v5 = vsel %vm1574_vm1, %v1582_v59, %v1590_v46  ;;  %433 = vst [vmem:[#allocation2 + $0x40] sm:$0xff] %v5194_v11  ;;  %v1641_v26 = vshll.u32 %v5194_v11, 16  ;;  %v1634_v34 = vrot.slane %v1632_v21, 5  ;;  %v1650_v46 = vshll.u32 %v5202_v22, 16 }
  0x29   : > { %4370 = vmatprep.mubr.bf16.mxu0 %v1591_v5  ;;  %v592_v48 = vor.u32 %v1620_v63, %v588_v30  ;;  %v1659_v52 = vshll.u32 %v5234_v42, 16  ;;  %v589_v57 = vsel %vm537_vm0, %v584_v44, %v588_v30 }
  0x2a   : > { %4207 = vmatpush3.bf16.msra.mxu1 %v4864_v15  ;;  %v568_v15 = vor.u32 %v1593_v25, %v564_v40  ;;  %v1638_v25 = vshrl.u32 %v5194_v11, 16  ;;  %v1643_v37 = vrot.slane %v1641_v26, 5  ;;  %v1627_v40 = vsel %vm1574_vm1, %v1617_v19, %v1626_v24 }
  0x2b   : > { %4367 = vmatpush3.bf16.msra.mxu0 %v4865_v16  ;;  %4208 = vmatprep.subr.bf16.mxu1 %v4866_v27  ;;  %v576_v16 = vor.u32 %v1602_v41, %v572_v7  ;;  %v596_v41 = vrot.slane %v1632_v21, 1  ;;  %v5251_v54 = vrot.slane %v1641_v26, 1  ;;  %v1652_v59 = vrot.slane %v1650_v46, 5  ;;  %v4896_v21 = vld [vmem:[%s6586_s2 + $0x30] sm:$0xff]  }
  0x2c   : > { %4368 = vmatprep.subr.bf16.mxu0 %v4867_v31  ;;  %v573_v28 = vsel %vm537_vm0, %v568_v15, %v572_v7  ;;  %v1640_v35 = vrot.slane %v1638_v25, 4  ;;  %v1661_v3 = vrot.slane %v1659_v52, 5  ;;  %v612_v5 = vrot.slane %v1650_v46, 1 }
  0x2d   : > { %v581_v29 = vsel %vm537_vm0, %v576_v16, %v580_v17  ;;  %v597_v63 = vsel %vm537_vm0, %v592_v48, %v596_v41  ;;  %v1665_v7 = vshrl.u32 %v5249_v53, 16  ;;  %v1668_v15 = vshll.u32 %v5249_v53, 16  ;;  %v5293_v16 = vld [vmem:[%s5261_s13 + $0x8] sm:$0xff]   ;;  %v4903_v48 = vld [vmem:[%s6586_s2 + $0x80] sm:$0xff]  }
  0x2e   : > { %4209 = vmatpush3.bf16.msra.mxu1 %v4866_v27  ;;  %v4883_v27 = vld [vmem:[%s6586_s2 + $0x10] sm:$0xff]   ;;  %v1644_v51 = vor.u32 %v1643_v37, %v1640_v35  ;;  %486 = vst [vmem:[#allocation2 + $0x68] sm:$0xff] %v5293_v16 }
  0x2f   : > { %4369 = vmatpush3.bf16.msra.mxu0 %v4867_v31  ;;  %4234 = vmatprep.subr.bf16.mxu1 %v4878_v58  ;;  %v1631_v31 = vrot.slane %v1629_v18, 4  ;;  %v1667_v26 = vrot.slane %v1665_v7, 4 }
  0x30   : > { %4394 = vmatprep.subr.bf16.mxu0 %v4872_v49 }
  0x31   : > { %4211 = vmatmul.mubr.bf16.vlgmr.msra.gmra.mrb[0].mxu1 %v557_v60  ;;  %v1635_v47 = vor.u32 %v1634_v34, %v1631_v31  ;;  %v4887_v60 = vld [vmem:[%s6586_s2 + $0x168] sm:$0xff]   ;;  %v4898_v31 = vld [vmem:[%s6586_s2 + $0x178] sm:$0xff]   ;;  %v616_v34 = vor.u32 %v1647_v45, %v612_v5 }
  0x32   : > { %4371 = vmatmul.mubr.bf16.vlgmr.msra.gmra.mrb[0].mxu0 %v1600_v1  ;;  %4214 = vmatprep.mubr.bf16.mxu1 %v565_v2  ;;  %v1658_v2 = vrot.slane %v1656_v50, 4 }
  0x33   : > { %4395 = vmatpush3.bf16.msra.mxu0 %v4872_v49  ;;  %4374 = vmatprep.mubr.bf16.mxu0 %v1609_v6  ;;  %v4885_v49 = vld [vmem:[%s6586_s2 + $0x160] sm:$0xff]   ;;  %v1636_v62 = vsel %vm1574_vm1, %v1626_v24, %v1635_v47  ;;  %v1645_v1 = vsel %vm1574_vm1, %v1635_v47, %v1644_v51  ;;  %v600_v6 = vor.u32 %v1629_v18, %v596_v41 }
  0x34   : > { %4396 = vmatprep.subr.bf16.mxu0 %v4873_v61  ;;  %4235 = vmatpush3.bf16.msra.mxu1 %v4878_v58  ;;  %v1649_v58 = vrot.slane %v1647_v45, 4  ;;  %v1662_v17 = vor.u32 %v1661_v3, %v1658_v2  ;;  %v4900_v41 = vld [vmem:[%s6586_s2 + $0x180] sm:$0xff]   ;;  %v1037_v3 = vrot.slane %v5106_v13, 1 }
  0x35   : > { %4236 = vmatprep.subr.bf16.mxu1 %v4881_v10  ;;  %v5330_v46 = vld [vmem:[#allocation2 + $0x68] sm:$0x1f] }
  0x36   : > { %v1653_v9 = vor.u32 %v1652_v59, %v1649_v58  ;;  %v1683_v45 = vshrl.u32 %v5330_v46, 16  ;;  %v1686_v47 = vshll.u32 %v5330_v46, 16  ;;  %v1904_v59 = vld [vmem:[#allocation2 + $0x8] sm:$0xe0] }
  0x37   : > { %4397 = vmatpush3.bf16.msra.mxu0 %v4873_v61  ;;  %v5271_v61 = vld [vmem:[%s5261_s13] sm:$0xff]   ;;  %v1925_v2 = vrot.slane %v1904_v59, 5  ;;  %v4913_v59 = vld [vmem:[%s6586_s2 + $0xb0] sm:$0xff]  }
  0x38   : > { %4398 = vmatprep.subr.bf16.mxu0 %v4876_v23  ;;  %4237 = vmatpush3.bf16.msra.mxu1 %v4881_v10  ;;  %485 = vst [vmem:[#allocation2 + $0x60] sm:$0xff] %v5271_v61  ;;  %v608_v10 = vor.u32 %v1638_v25, %v5251_v54  ;;  %v1674_v18 = vshrl.u32 %v5271_v61, 16  ;;  %v1677_v19 = vshll.u32 %v5271_v61, 16  ;;  %v1654_v24 = vsel %vm1574_vm1, %v1644_v51, %v1653_v9 }
  0x39   : > { %4215 = vmatmul.mubr.bf16.gmra.mrb[4].mxu1 %v573_v28  ;;  %4238 = vmatprep.subr.bf16.mxu1 %v4883_v27  ;;  %v1663_v28 = vsel %vm1574_vm1, %v1653_v9, %v1662_v17  ;;  %v1928_v9 = vrot.slane %v5124_v20, 5 }
  0x3a   : > { %4375 = vmatmul.mubr.bf16.gmra.mrb[4].mxu0 %v1618_v33  ;;  %4218 = vmatprep.mubr.bf16.mxu1 %v581_v29  ;;  %v5305_v25 = vsel %vm537_vm0, %v608_v10, %v612_v5  ;;  %v1676_v29 = vrot.slane %v1674_v18, 4  ;;  %v1679_v30 = vrot.slane %v1677_v19, 5  ;;  %v4899_v33 = vld [vmem:[%s6586_s2 + $0x38] sm:$0xff]   ;;  %v1930_v10 = vrot.slane %v5141_v36, 5 }
  0x3b   : > { %4399 = vmatpush3.bf16.msra.mxu0 %v4876_v23  ;;  %4378 = vmatprep.mubr.bf16.mxu0 %v1627_v40  ;;  %v605_v23 = vsel %vm537_vm0, %v600_v6, %v5251_v54  ;;  %v628_v40 = vrot.slane %v1668_v15, 1 }
  0x3c   : > { %4400 = vmatprep.subr.bf16.mxu0 %v4880_v32  ;;  %4239 = vmatpush3.bf16.msra.mxu1 %v4883_v27  ;;  %v1670_v27 = vrot.slane %v1668_v15, 5  ;;  %v1680_v44 = vor.u32 %v1679_v30, %v1676_v29  ;;  %v4906_v29 = vld [vmem:[%s6586_s2 + $0x90] sm:$0xff]  }
  0x3d   : > { %4240 = vmatprep.subr.bf16.mxu1 %v4886_v39  ;;  %v5395_v30 = vld [vmem:[%s5261_s13 + $0x10] sm:$0xff]  }
  0x3e   : > { %v1671_v37 = vor.u32 %v1670_v27, %v1667_v26  ;;  %v1319_v26 = vrot.slane %v5109_v14, 4  ;;  %v4902_v27 = vld [vmem:[%s6586_s2 + $0x190] sm:$0xff]  }
  0x3f   : > { %4401 = vmatpush3.bf16.msra.mxu0 %v4880_v32  ;;  %v620_v32 = vrot.slane %v1659_v52, 1  ;;  %v5323_v35 = vld [vmem:[#allocation2 + $0x60] sm:$0x1] }
  0x40   : > { %4402 = vmatprep.subr.bf16.mxu0 %v4885_v49  ;;  %4241 = vmatpush3.bf16.msra.mxu1 %v4886_v39  ;;  %v1672_v51 = vsel %vm1574_vm1, %v1662_v17, %v1671_v37  ;;  %v1681_v58 = vsel %vm1574_vm1, %v1671_v37, %v1680_v44  ;;  %v4901_v17 = vld [vmem:[%s6586_s2 + $0x188] sm:$0xff]   ;;  %v1936_v37 = vrot.slane %v5180_v0, 5 }
  0x41   : > { %4219 = vmatmul.mubr.bf16.gmra.mrb[8].mxu1 %v589_v57  ;;  %4242 = vmatprep.subr.bf16.mxu1 %v4889_v55  ;;  %v624_v39 = vor.u32 %v1656_v50, %v620_v32  ;;  %v634_v50 = vshll.u32 %v5323_v35, 16  ;;  %v1688_v57 = vrot.slane %v1686_v47, 5  ;;  %v4909_v47 = vld [vmem:[%s6586_s2 + $0x1a8] sm:$0xff]  }
  0x42   : > { %4379 = vmatmul.mubr.bf16.gmra.mrb[8].mxu0 %v1636_v62  ;;  %4222 = vmatprep.mubr.bf16.mxu1 %v597_v63 }
  0x43   : > { %4382 = vmatprep.mubr.bf16.mxu0 %v1645_v1  ;;  %4403 = vmatpush3.bf16.msra.mxu0 %v4885_v49  ;;  %v5338_v49 = vsel %vm537_vm0, %v616_v34, %v620_v32  ;;  %v5343_v52 = vsel %vm537_vm0, %v624_v39, %v628_v40  ;;  %v636_v62 = vrot.slane %v634_v50, 1  ;;  %v1926_v1 = vrot.slane %v5109_v14, 5  ;;  %v4908_v34 = vld [vmem:[%s6586_s2 + $0x98] sm:$0xff]  }
  0x44   : > { %4404 = vmatprep.subr.bf16.mxu0 %v4887_v60  ;;  %4243 = vmatpush3.bf16.msra.mxu1 %v4889_v55  ;;  %v1685_v55 = vrot.slane %v1683_v45, 4  ;;  %v1938_v39 = vrot.slane %v5194_v11, 5  ;;  %v1940_v50 = vrot.slane %v5202_v22, 5 }
  0x45   : > { %4244 = vmatprep.subr.bf16.mxu1 %v4891_v4  ;;  %v1929_v15 = vsel %vm1924_vm3, %v1926_v1, %v1928_v9 }
  0x46   : > { %v1689_v63 = vor.u32 %v1688_v57, %v1685_v55  ;;  %v1939_v45 = vsel %vm1924_vm3, %v1936_v37, %v1938_v39  ;;  %v4912_v55 = vld [vmem:[%s6586_s2 + $0x1b0] sm:$0xff]   ;;  %v2497_v57 = vrot.slane %v1677_v19, 1 }
  0x47   : > { %4405 = vmatpush3.bf16.msra.mxu0 %v4887_v60  ;;  %v5350_v60 = vor.u32 %v1665_v7, %v628_v40  ;;  %v4907_v40 = vld [vmem:[%s6586_s2 + $0x1a0] sm:$0xff]  }
  0x48   : > { %4406 = vmatprep.subr.bf16.mxu0 %v4892_v8  ;;  %4245 = vmatpush3.bf16.msra.mxu1 %v4891_v4  ;;  %v1039_v4 = vrot.slane %v5109_v14, 1  ;;  %v1690_v6 = vsel %vm1574_vm1, %v1680_v44, %v1689_v63  ;;  %v5442_v63 = vor.u32 %v2497_v57, %v1674_v18  ;;  %v4915_v18 = vld [vmem:[%s6586_s2 + $0xb8] sm:$0xff]  }
  0x49   : > { %4223 = vmatmul.mubr.bf16.gmra.mrb[12].mxu1 %v605_v23  ;;  %4246 = vmatprep.subr.bf16.mxu1 %v4896_v21  ;;  %v637_v5 = vsel %vm537_vm0, %v5350_v60, %v636_v62  ;;  %v4905_v23 = vld [vmem:[%s6586_s2 + $0x88] sm:$0xff]   ;;  %v5438_v62 = vsel %vm537_vm0, %v5350_v60, %v2497_v57  ;;  %v5455_v60 = vrot.slane %v5249_v53, 1  ;;  %v4929_v57 = vld [vmem:[%s6586_s2 + $0xf0] sm:$0xff]  }
  0x4a   : > { %4383 = vmatmul.mubr.bf16.gmra.mrb[12].mxu0 %v1654_v24  ;;  %4226 = vmatprep.mubr.bf16.mxu1 %v5305_v25  ;;  %v5363_v7 = vsel %vm1035_vm2, %v1037_v3, %v1039_v4  ;;  %v1932_v24 = vrot.slane %v5150_v43, 5 }
  0x4b   : > { %4386 = vmatprep.mubr.bf16.mxu0 %v1663_v28  ;;  %4407 = vmatpush3.bf16.msra.mxu0 %v4892_v8  ;;  %v1927_v8 = vsel %vm1924_vm3, %v1925_v2, %v1926_v1  ;;  %v1934_v28 = vrot.slane %v5161_v56, 5  ;;  %v1941_v1 = vsel %vm1924_vm3, %v1938_v39, %v1940_v50  ;;  %v4914_v2 = vld [vmem:[%s6586_s2 + $0x1b8] sm:$0xff]  }
  0x4c   : > { %4247 = vmatpush3.bf16.msra.mxu1 %v4896_v21  ;;  %4408 = vmatprep.subr.bf16.mxu0 %v4898_v31  ;;  %v1931_v21 = vsel %vm1924_vm3, %v1928_v9, %v1930_v10  ;;  %v5462_v9 = vrot.slane %v5194_v11, 1 }
  0x4d   : > { %4248 = vmatprep.subr.bf16.mxu1 %v4899_v33  ;;  %v1935_v32 = vsel %vm1924_vm3, %v1932_v24, %v1934_v28  ;;  %v1937_v44 = vsel %vm1924_vm3, %v1934_v28, %v1936_v37  ;;  %v1004_v28 = vld [vmem:[#allocation2] sm:$0xfe] }
  0x4f   : > { %4409 = vmatpush3.bf16.msra.mxu0 %v4898_v31  ;;  %v1933_v31 = vsel %vm1924_vm3, %v1930_v10, %v1932_v24 }
  0x50   : > { %4249 = vmatpush3.bf16.msra.mxu1 %v4899_v33  ;;  %4434 = vmatprep.subr.bf16.mxu0 %v4900_v41  ;;  %v4904_v33 = vld [vmem:[%s6586_s2 + $0x198] sm:$0xff]  }
  0x51   : > { %4227 = vmatmul.mubr.bf16.gmra.mrb[16].mxu1 %v5338_v49  ;;  %4274 = vmatprep.subr.bf16.mxu1 %v4903_v48 }
  0x52   : > { %4387 = vmatmul.mubr.bf16.gmra.mrb[16].mxu0 %v1672_v51  ;;  %4230 = vmatprep.mubr.bf16.mxu1 %v5343_v52  ;;  %v1942_v51 = vrot.slane %v5234_v42, 5 }
  0x53   : > { %4390 = vmatprep.mubr.bf16.mxu0 %v1681_v58  ;;  %v4940_v58 = vld [vmem:[%s5261_s13 + $0x18] sm:$0xff]  }
  0x54   : > { %488 = vst [vmem:[#allocation2 + $0x78] sm:$0xff] %v4940_v58  ;;  %v1943_v19 = vsel %vm1924_vm3, %v1940_v50, %v1942_v51  ;;  %v4927_v50 = vld [vmem:[%s6586_s2 + $0xe8] sm:$0xff]  }
  0x59   : > { %4231 = vmatmul.mubr.bf16.gmra.mrb[20].mxu1 %v637_v5  ;;  %v5457_v5 = vld [vmem:[#allocation2 + $0x38] sm:$0xff] }
  0x5a   : > { %4391 = vmatmul.mubr.bf16.gmra.mrb[20].mxu0 %v1690_v6  ;;  %4250 = vmatprep.mubr.bf16.mxu1 %v5103_v12  ;;  %v1318_v12 = vrot.slane %v5144_v38, 4  ;;  %v2784_v6 = vrot.slane %v5271_v61, 1  ;;  %v2774_v10 = vrot.slane %v5457_v5, 1 }
  0x5b   : > { %4410 = vmatprep.mubr.bf16.mxu0 %v1927_v8  ;;  %v1944_v8 = vrot.slane %v5249_v53, 5 }
  0x5c   : > { %v5392_v38 = vsel %vm1317_vm4, %v1318_v12, %v1319_v26  ;;  %v5482_v12 = vsel %vm1035_vm2, %v2774_v10, %v5462_v9 }
  0x5d   : > { %v1945_v24 = vsel %vm1924_vm3, %v1942_v51, %v1944_v8  ;;  %v1053_v51 = vrot.slane %v5202_v22, 1 }
  0x5f   : > { %v5555_v58 = vsel %vm1035_vm2, %v5462_v9, %v1053_v51 }
  0x61   : > { %4251 = vmatmul.mubr.bf16.vlgmr.msra.gmra.mrb[0].mxu1 %v5106_v13  ;;  %v4921_v13 = vld [vmem:[%s6586_s2 + $0xc8] sm:$0xff]  }
  0x62   : > { %4411 = vmatmul.mubr.bf16.vlgmr.msra.gmra.mrb[0].mxu0 %v1929_v15  ;;  %4254 = vmatprep.mubr.bf16.mxu1 %v5109_v14  ;;  %v1946_v15 = vrot.slane %v5271_v61, 5  ;;  %v4944_v14 = vld [vmem:[#allocation2 + $0x28] sm:$0xff] }
  0x63   : > { %4435 = vmatpush3.bf16.msra.mxu0 %v4900_v41  ;;  %4414 = vmatprep.mubr.bf16.mxu0 %v1931_v21  ;;  %v4910_v41 = vld [vmem:[%s6586_s2 + $0xa0] sm:$0xff]   ;;  %v5473_v21 = vsel %vm1035_vm2, %v5455_v60, %v2784_v6 }
  0x64   : > { %4436 = vmatprep.subr.bf16.mxu0 %v4901_v17  ;;  %4275 = vmatpush3.bf16.msra.mxu1 %v4903_v48  ;;  %v4911_v48 = vld [vmem:[%s6586_s2 + $0xa8] sm:$0xff]  }
  0x65   : > { %4276 = vmatprep.subr.bf16.mxu1 %v4905_v23 }
  0x67   : > { %4437 = vmatpush3.bf16.msra.mxu0 %v4901_v17  ;;  %v4916_v17 = vld [vmem:[%s6586_s2 + $0x1c0] sm:$0xff]  }
  0x68   : > { %4438 = vmatprep.subr.bf16.mxu0 %v4902_v27  ;;  %4277 = vmatpush3.bf16.msra.mxu1 %v4905_v23  ;;  %v4919_v23 = vld [vmem:[%s6586_s2 + $0xc0] sm:$0xff]  }
  0x69   : > { %4255 = vmatmul.mubr.bf16.gmra.mrb[4].mxu1 %v5124_v20  ;;  %4278 = vmatprep.subr.bf16.mxu1 %v4906_v29 }
  0x6a   : > { %4415 = vmatmul.mubr.bf16.gmra.mrb[4].mxu0 %v1933_v31  ;;  %4258 = vmatprep.mubr.bf16.mxu1 %v5141_v36  ;;  %v1036_v31 = vrot.slane %v1004_v28, 1 }
  0x6b   : > { %4439 = vmatpush3.bf16.msra.mxu0 %v4902_v27  ;;  %4418 = vmatprep.mubr.bf16.mxu0 %v1935_v32  ;;  %v1947_v27 = vsel %vm1924_vm3, %v1944_v8, %v1946_v15  ;;  %v5570_v8 = vld [vmem:[#allocation2 + $0x20] sm:$0xff] }
  0x6c   : > { %4440 = vmatprep.subr.bf16.mxu0 %v4904_v33  ;;  %4279 = vmatpush3.bf16.msra.mxu1 %v4906_v29  ;;  %v1948_v29 = vrot.slane %v5330_v46, 5  ;;  %v4917_v46 = vld [vmem:[%s6586_s2 + $0x1c8] sm:$0xff]  }
  0x6d   : > { %4280 = vmatprep.subr.bf16.mxu1 %v4908_v34 }
  0x6e   : > { %v1949_v32 = vsel %vm1924_vm3, %v1946_v15, %v1948_v29  ;;  %v5587_v29 = vld [vmem:[#allocation2 + $0x30] sm:$0xff] }
  0x6f   : > { %4441 = vmatpush3.bf16.msra.mxu0 %v4904_v33  ;;  %v1038_v33 = vsel %vm1035_vm2, %v1036_v31, %v1037_v3  ;;  %v1043_v3 = vrot.slane %v5141_v36, 1 }
  0x70   : > { %4442 = vmatprep.subr.bf16.mxu0 %v4907_v40  ;;  %4281 = vmatpush3.bf16.msra.mxu1 %v4908_v34  ;;  %v1041_v34 = vrot.slane %v5124_v20, 1 }
  0x71   : > { %4259 = vmatmul.mubr.bf16.gmra.mrb[8].mxu1 %v5150_v43  ;;  %4282 = vmatprep.subr.bf16.mxu1 %v4910_v41 }
  0x72   : > { %4419 = vmatmul.mubr.bf16.gmra.mrb[8].mxu0 %v1937_v44  ;;  %4262 = vmatprep.mubr.bf16.mxu1 %v5161_v56  ;;  %v1042_v37 = vsel %vm1035_vm2, %v1039_v4, %v1041_v34  ;;  %v4918_v4 = vld [vmem:[%s6586_s2 + $0x1d0] sm:$0xff]   ;;  %v1044_v39 = vsel %vm1035_vm2, %v1041_v34, %v1043_v3  ;;  %v1049_v44 = vrot.slane %v5180_v0, 1 }
  0x73   : > { %4422 = vmatprep.mubr.bf16.mxu0 %v1939_v45  ;;  %4443 = vmatpush3.bf16.msra.mxu0 %v4907_v40  ;;  %v4924_v40 = vld [vmem:[%s6586_s2 + $0xd8] sm:$0xff]   ;;  %v4923_v45 = vld [vmem:[%s6586_s2 + $0x1e0] sm:$0xff]  }
  0x74   : > { %4444 = vmatprep.subr.bf16.mxu0 %v4909_v47  ;;  %4283 = vmatpush3.bf16.msra.mxu1 %v4910_v41  ;;  %v1047_v41 = vrot.slane %v5161_v56, 1 }
  0x75   : > { %4284 = vmatprep.subr.bf16.mxu1 %v4911_v48 }
  0x77   : > { %4445 = vmatpush3.bf16.msra.mxu0 %v4909_v47  ;;  %v4926_v47 = vld [vmem:[%s6586_s2 + $0xe0] sm:$0xff]  }
  0x78   : > { %4446 = vmatprep.subr.bf16.mxu0 %v4912_v55  ;;  %4285 = vmatpush3.bf16.msra.mxu1 %v4911_v48 }
  0x79   : > { %4263 = vmatmul.mubr.bf16.gmra.mrb[12].mxu1 %v5180_v0  ;;  %4286 = vmatprep.subr.bf16.mxu1 %v4913_v59 }
  0x7a   : > { %4423 = vmatmul.mubr.bf16.gmra.mrb[12].mxu0 %v1941_v1  ;;  %4266 = vmatprep.mubr.bf16.mxu1 %v5194_v11  ;;  %v2393_v1 = vld [vmem:[#allocation2 + $0x18] sm:$0xff] }
  0x7b   : > { %4426 = vmatprep.mubr.bf16.mxu0 %v1943_v19  ;;  %4447 = vmatpush3.bf16.msra.mxu0 %v4912_v55  ;;  %v4928_v55 = vld [vmem:[%s6586_s2 + $0x1f0] sm:$0xff]   ;;  %v1055_v19 = vrot.slane %v5234_v42, 1 }
  0x7c   : > { %4287 = vmatpush3.bf16.msra.mxu1 %v4913_v59  ;;  %4448 = vmatprep.subr.bf16.mxu0 %v4914_v2  ;;  %v4932_v59 = vld [vmem:[%s6586_s2 + $0xf8] sm:$0xff]  }
  0x7d   : > { %4288 = vmatprep.subr.bf16.mxu1 %v4915_v18  ;;  %v5577_v15 = vsel %vm1035_vm2, %v1055_v19, %v5455_v60 }
  0x7f   : > { %4449 = vmatpush3.bf16.msra.mxu0 %v4914_v2  ;;  %v2426_v2 = vshll.u32 %v2393_v1, 16 }
  0x80   : > { %4289 = vmatpush3.bf16.msra.mxu1 %v4915_v18  ;;  %4474 = vmatprep.subr.bf16.mxu0 %v4916_v17  ;;  %v4933_v18 = vld [vmem:[%s6586_s2 + $0x200] sm:$0xff]  }
  0x81   : > { %4267 = vmatmul.mubr.bf16.gmra.mrb[16].mxu1 %v5202_v22  ;;  %4314 = vmatprep.subr.bf16.mxu1 %v4919_v23 }
  0x82   : > { %4427 = vmatmul.mubr.bf16.gmra.mrb[16].mxu0 %v1945_v24  ;;  %4270 = vmatprep.mubr.bf16.mxu1 %v5234_v42  ;;  %v5585_v24 = vld [vmem:[#allocation2 + $0x28] sm:$0xff] }
  0x83   : > { %4430 = vmatprep.mubr.bf16.mxu0 %v1947_v27 }
  0x89   : > { %4271 = vmatmul.mubr.bf16.gmra.mrb[20].mxu1 %v5249_v53 }
  0x8a   : > { %4431 = vmatmul.mubr.bf16.gmra.mrb[20].mxu0 %v1949_v32  ;;  %4290 = vmatprep.mubr.bf16.mxu1 %v1038_v33  ;;  %v2439_v32 = vshll.u32 %v5585_v24, 16  ;;  %v2435_v33 = vshrl.u32 %v5570_v8, 16 }
  0x8b   : > { %4450 = vmatprep.mubr.bf16.mxu0 %v5124_v20  ;;  %v1045_v20 = vrot.slane %v5150_v43, 1 }
  0x8d   : > { %v1048_v48 = vsel %vm1035_vm2, %v1045_v20, %v1047_v41 }
  0x91   : > { %4291 = vmatmul.mubr.bf16.vlgmr.msra.gmra.mrb[0].mxu1 %v5363_v7  ;;  %v4922_v7 = vld [vmem:[%s6586_s2 + $0xd0] sm:$0xff]  }
  0x92   : > { %4451 = vmatmul.mubr.bf16.vlgmr.msra.gmra.mrb[0].mxu0 %v5141_v36  ;;  %4294 = vmatprep.mubr.bf16.mxu1 %v1042_v37  ;;  %v1046_v36 = vsel %vm1035_vm2, %v1043_v3, %v1045_v20  ;;  %v2443_v37 = vshrl.u32 %v5585_v24, 16  ;;  %v2441_v3 = vrot.slane %v2439_v32, 1 }
  0x93   : > { %4475 = vmatpush3.bf16.msra.mxu0 %v4916_v17  ;;  %4454 = vmatprep.mubr.bf16.mxu0 %v5150_v43  ;;  %v4920_v43 = vld [vmem:[%s6586_s2 + $0x1d8] sm:$0xff]   ;;  %v2431_v17 = vshll.u32 %v5570_v8, 16 }
  0x94   : > { %4476 = vmatprep.subr.bf16.mxu0 %v4917_v46  ;;  %4315 = vmatpush3.bf16.msra.mxu1 %v4919_v23  ;;  %v1059_v23 = vrot.slane %v5323_v35, 1  ;;  %v2447_v35 = vshll.u32 %v5587_v29, 16 }
  0x95   : > { %4316 = vmatprep.subr.bf16.mxu1 %v4921_v13  ;;  %v2433_v28 = vrot.slane %v2431_v17, 1 }
  0x96   : > { %v1060_v31 = vsel %vm1035_vm2, %v5455_v60, %v1059_v23  ;;  %v4943_v60 = vld [vmem:[#allocation2 + $0x20] sm:$0xff]  ;;  %v4938_v23 = vld [vmem:[%s6586_s2 + $0x228] sm:$0xff]  }
  0x97   : > { %4477 = vmatpush3.bf16.msra.mxu0 %v4917_v46  ;;  %v4942_v46 = vld [vmem:[#allocation2 + $0x18] sm:$0xff]  ;;  %v2437_v20 = vor.u32 %v2435_v33, %v2433_v28  ;;  %v4939_v33 = vld [vmem:[%s6586_s2 + $0x230] sm:$0xff]  }
  0x98   : > { %4478 = vmatprep.subr.bf16.mxu0 %v4918_v4  ;;  %4317 = vmatpush3.bf16.msra.mxu1 %v4921_v13  ;;  %v1321_v13 = vrot.slane %v4942_v46, 4  ;;  %v4941_v46 = vld [vmem:[%s6586_s2 + $0x238] sm:$0xff]  }
  0x99   : > { %4295 = vmatmul.mubr.bf16.gmra.mrb[4].mxu1 %v1044_v39  ;;  %4318 = vmatprep.subr.bf16.mxu1 %v4922_v7  ;;  %v2449_v39 = vrot.slane %v2447_v35, 1  ;;  %v2511_v35 = vshll.u32 %v5395_v30, 16 }
  0x9a   : > { %4455 = vmatmul.mubr.bf16.gmra.mrb[4].mxu0 %v5161_v56  ;;  %4298 = vmatprep.mubr.bf16.mxu1 %v1046_v36  ;;  %v1050_v56 = vsel %vm1035_vm2, %v1047_v41, %v1049_v44  ;;  %v1322_v36 = vsel %vm1317_vm4, %v1319_v26, %v1321_v13  ;;  %v1325_v26 = vrot.slane %v4944_v14, 4 }
  0x9b   : > { %4479 = vmatpush3.bf16.msra.mxu0 %v4918_v4  ;;  %4458 = vmatprep.mubr.bf16.mxu0 %v5180_v0  ;;  %v4925_v0 = vld [vmem:[%s6586_s2 + $0x1e8] sm:$0xff]   ;;  %v1323_v4 = vrot.slane %v4943_v60, 4  ;;  %v1339_v60 = vrot.slane %v5271_v61, 4 }
  0x9c   : > { %4480 = vmatprep.subr.bf16.mxu0 %v4920_v43  ;;  %4319 = vmatpush3.bf16.msra.mxu1 %v4922_v7  ;;  %v2445_v7 = vor.u32 %v2443_v37, %v2441_v3  ;;  %v2503_v37 = vshll.u32 %v5293_v16, 16 }
  0x9d   : > { %4320 = vmatprep.subr.bf16.mxu1 %v4924_v40  ;;  %v1324_v41 = vsel %vm1317_vm4, %v1321_v13, %v1323_v4  ;;  %v4950_v13 = vld [vmem:[#allocation2 + $0x58] sm:$0xff] }
  0x9f   : > { %4481 = vmatpush3.bf16.msra.mxu0 %v4920_v43  ;;  %v2455_v43 = vshll.u32 %v5457_v5, 16 }
  0xa0   : > { %4482 = vmatprep.subr.bf16.mxu0 %v4923_v45  ;;  %4321 = vmatpush3.bf16.msra.mxu1 %v4924_v40  ;;  %v2442_v40 = vsel %vm537_vm0, %v2437_v20, %v2441_v3  ;;  %v1337_v3 = vrot.slane %v4950_v13, 4  ;;  %v2505_v20 = vrot.slane %v2503_v37, 1 }
  0xa1   : > { %4299 = vmatmul.mubr.bf16.gmra.mrb[8].mxu1 %v1048_v48  ;;  %4322 = vmatprep.subr.bf16.mxu1 %v4926_v47  ;;  %v2457_v48 = vrot.slane %v2455_v43, 1 }
  0xa2   : > { %4459 = vmatmul.mubr.bf16.gmra.mrb[8].mxu0 %v5194_v11  ;;  %4302 = vmatprep.mubr.bf16.mxu1 %v1050_v56  ;;  %v1052_v11 = vsel %vm1035_vm2, %v1049_v44, %v5462_v9  ;;  %v5573_v9 = vsel %vm1035_vm2, %v1053_v51, %v1055_v19  ;;  %v4934_v44 = vld [vmem:[%s6586_s2 + $0x208] sm:$0xff]   ;;  %v4935_v51 = vld [vmem:[%s6586_s2 + $0x210] sm:$0xff]   ;;  %v4946_v19 = vld [vmem:[#allocation2 + $0x38] sm:$0xff]  ;;  %v1340_v43 = vsel %vm1317_vm4, %v1337_v3, %v1339_v60 }
  0xa3   : > { %4462 = vmatprep.mubr.bf16.mxu0 %v5202_v22  ;;  %4483 = vmatpush3.bf16.msra.mxu0 %v4923_v45  ;;  %v4931_v22 = vld [vmem:[%s6586_s2 + $0x1f8] sm:$0xff]   ;;  %v2450_v45 = vsel %vm537_vm0, %v2445_v7, %v2449_v39  ;;  %v2513_v7 = vrot.slane %v2511_v35, 1 }
  0xa4   : > { %4484 = vmatprep.subr.bf16.mxu0 %v4925_v0  ;;  %4323 = vmatpush3.bf16.msra.mxu1 %v4926_v47  ;;  %v2459_v47 = vshrl.u32 %v5457_v5, 16 }
  0xa5   : > { %4324 = vmatprep.subr.bf16.mxu1 %v4927_v50 }
  0xa7   : > { %4485 = vmatpush3.bf16.msra.mxu0 %v4925_v0  ;;  %v4945_v0 = vld [vmem:[#allocation2 + $0x30] sm:$0xff] }
  0xa8   : > { %4486 = vmatprep.subr.bf16.mxu0 %v4928_v55  ;;  %4325 = vmatpush3.bf16.msra.mxu1 %v4927_v50  ;;  %v1327_v50 = vrot.slane %v4945_v0, 4 }
  0xa9   : > { %4303 = vmatmul.mubr.bf16.gmra.mrb[12].mxu1 %v1052_v11  ;;  %4326 = vmatprep.subr.bf16.mxu1 %v4929_v57 }
  0xaa   : > { %4463 = vmatmul.mubr.bf16.gmra.mrb[12].mxu0 %v5234_v42  ;;  %4306 = vmatprep.mubr.bf16.mxu1 %v5555_v58  ;;  %v2424_v42 = vshrl.u32 %v2393_v1, 16  ;;  %v4936_v1 = vld [vmem:[%s6586_s2 + $0x218] sm:$0xff]  }
  0xab   : > { %4466 = vmatprep.mubr.bf16.mxu0 %v5249_v53  ;;  %4487 = vmatpush3.bf16.msra.mxu0 %v4928_v55  ;;  %v2428_v53 = vrot.slane %v2426_v2, 1  ;;  %v2461_v55 = vor.u32 %v2459_v47, %v2457_v48  ;;  %v1329_v2 = vrot.slane %v4946_v19, 4 }
  0xac   : > { %4327 = vmatpush3.bf16.msra.mxu1 %v4929_v57  ;;  %4488 = vmatprep.subr.bf16.mxu0 %v4931_v22  ;;  %v1326_v57 = vsel %vm1317_vm4, %v1323_v4, %v1325_v26 }
  0xad   : > { %4328 = vmatprep.subr.bf16.mxu1 %v4932_v59  ;;  %v2429_v27 = vor.u32 %v2428_v53, %v2424_v42  ;;  %v1330_v53 = vsel %vm1317_vm4, %v1327_v50, %v1329_v2 }
  0xaf   : > { %4489 = vmatpush3.bf16.msra.mxu0 %v4931_v22  ;;  %v2434_v34 = vsel %vm537_vm0, %v2429_v27, %v2433_v28  ;;  %v1328_v22 = vsel %vm1317_vm4, %v1325_v26, %v1327_v50  ;;  %v4948_v27 = vld [vmem:[#allocation2 + $0x48] sm:$0xff]  ;;  %v2770_v50 = vrot.slane %v5585_v24, 1 }
  0xb0   : > { %4329 = vmatpush3.bf16.msra.mxu1 %v4932_v59  ;;  %4514 = vmatprep.subr.bf16.mxu0 %v4933_v18  ;;  %v2466_v59 = vsel %vm537_vm0, %v2461_v55, %v5251_v54  ;;  %v4937_v54 = vld [vmem:[%s6586_s2 + $0x220] sm:$0xff]   ;;  %v1333_v28 = vrot.slane %v4948_v27, 4 }
  0xb1   : > { %4307 = vmatmul.mubr.bf16.gmra.mrb[16].mxu1 %v5573_v9  ;;  %4554 = vmatprep.subr.bf16.mxu1 %v4933_v18 }
  0xb2   : > { %4467 = vmatmul.mubr.bf16.gmra.mrb[16].mxu0 %v5271_v61  ;;  %4310 = vmatprep.mubr.bf16.mxu1 %v5577_v15  ;;  %v3029_v61 = vlaneseq }
  0xb3   : > { %4470 = vmatprep.mubr.bf16.mxu0 %v5293_v16 }
  0xb9   : > { %4311 = vmatmul.mubr.bf16.gmra.mrb[20].mxu1 %v1060_v31  ;;  %v4949_v31 = vld [vmem:[#allocation2 + $0x50] sm:$0xff] }
  0xba   : > { %4471 = vmatmul.mubr.bf16.gmra.mrb[20].mxu0 %v5395_v30  ;;  %4330 = vmatprep.mubr.bf16.mxu1 %v5392_v38  ;;  %v2451_v38 = vshrl.u32 %v5587_v29, 16  ;;  %v1335_v32 = vrot.slane %v4949_v31, 4 }
  0xbb   : > { %4490 = vmatprep.mubr.bf16.mxu0 %v2434_v34 }
  0xbc   : > { %v2453_v56 = vor.u32 %v2451_v38, %v2449_v39  ;;  %v2405_v39 = vld [vmem:[#allocation2 + $0x78] sm:$0x1] }
  0xbe   : > { %v2458_v11 = vsel %vm537_vm0, %v2453_v56, %v2457_v48 }
  0xc1   : > { %4331 = vmatmul.mubr.bf16.vlgmr.msra.gmra.mrb[0].mxu1 %v1322_v36  ;;  %v1338_v36 = vsel %vm1317_vm4, %v1335_v32, %v1337_v3 }
  0xc2   : > { %4491 = vmatmul.mubr.bf16.vlgmr.msra.gmra.mrb[0].mxu0 %v2442_v40  ;;  %4334 = vmatprep.mubr.bf16.mxu1 %v1324_v41  ;;  %v1286_v40 = vld [vmem:[#allocation2 + $0x68] sm:$0xf]  ;;  %v2515_v41 = vshrl.u32 %v5395_v30, 16 }
  0xc3   : > { %4515 = vmatpush3.bf16.msra.mxu0 %v4933_v18  ;;  %4494 = vmatprep.mubr.bf16.mxu0 %v2450_v45  ;;  %v1341_v45 = vrot.slane %v1286_v40, 4 }
  0xc4   : > { %4516 = vmatprep.subr.bf16.mxu0 %v4934_v44  ;;  %4562 = vmatpush3.bf16.msra.mxu1 %v4933_v18  ;;  %v4947_v18 = vld [vmem:[#allocation2 + $0x40] sm:$0xff]  ;;  %v2517_v47 = vor.u32 %v2515_v41, %v2513_v7 }
  0xc5   : > { %4555 = vmatprep.subr.bf16.mxu1 %v4934_v44  ;;  %v1331_v42 = vrot.slane %v4947_v18, 4  ;;  %v1342_v48 = vsel %vm1317_vm4, %v1339_v60, %v1341_v45 }
  0xc7   : > { %4517 = vmatpush3.bf16.msra.mxu0 %v4934_v44  ;;  %v1332_v17 = vsel %vm1317_vm4, %v1329_v2, %v1331_v42  ;;  %v1334_v34 = vsel %vm1317_vm4, %v1331_v42, %v1333_v28 }
  0xc8   : > { %4518 = vmatprep.subr.bf16.mxu0 %v4935_v51  ;;  %4563 = vmatpush3.bf16.msra.mxu1 %v4934_v44  ;;  %v2736_v44 = vld [vmem:[#allocation2 + $0x18] sm:$0xfe] }
  0xc9   : > { %4335 = vmatmul.mubr.bf16.gmra.mrb[4].mxu1 %v1326_v57  ;;  %4556 = vmatprep.subr.bf16.mxu1 %v4935_v51  ;;  %v2767_v26 = vrot.slane %v2736_v44, 1 }
  0xca   : > { %4495 = vmatmul.mubr.bf16.gmra.mrb[4].mxu0 %v2458_v11  ;;  %4338 = vmatprep.mubr.bf16.mxu1 %v1328_v22  ;;  %v2788_v11 = vrot.slane %v5395_v30, 1  ;;  %v5674_v30 = vshrl.u32 %v3029_v61, 7 }
  0xcb   : > { %4519 = vmatpush3.bf16.msra.mxu0 %v4935_v51  ;;  %4498 = vmatprep.mubr.bf16.mxu0 %v2466_v59 }
  0xcc   : > { %4520 = vmatprep.subr.bf16.mxu0 %v4936_v1  ;;  %4564 = vmatpush3.bf16.msra.mxu1 %v4935_v51  ;;  %v2772_v51 = vrot.slane %v5587_v29, 1  ;;  %v3032_v5 = vadd.s32 16, %v5674_v30  ;;  %v3033_v59 = vadd.s32 24, %v5674_v30  ;;  %v3045_v2 = vadd.s32 120, %v5674_v30 }
  0xcd   : > { %4557 = vmatprep.subr.bf16.mxu1 %v4936_v1  ;;  %v5717_v3 = vadd.s32 104, %v5674_v30 }
  0xce   : > { %v2773_v57 = vsel %vm1035_vm2, %v2770_v50, %v2772_v51  ;;  %v2775_v24 = vsel %vm1035_vm2, %v2772_v51, %v2774_v10  ;;  %v3042_v10 = vadd.s32 96, %v5674_v30 }
  0xcf   : > { %4521 = vmatpush3.bf16.msra.mxu0 %v4936_v1  ;;  %v5738_v44 = vmul.u32.u64.low 2863311531, %v5717_v3  ;;  %v5739_v45 = vmul.u32.u64.high 2863311531, %v5717_v3, %v5738_v44 }
  0xd0   : > { %4522 = vmatprep.subr.bf16.mxu0 %v4937_v54  ;;  %4565 = vmatpush3.bf16.msra.mxu1 %v4936_v1  ;;  %v5691_v18 = vmul.u32.u64.low 2863311531, %v3042_v10  ;;  %v5692_v42 = vmul.u32.u64.high 2863311531, %v3042_v10, %v5691_v18  ;;  %v5893_v44 = vadd.s32 152, %v5674_v30 }
  0xd1   : > { %4339 = vmatmul.mubr.bf16.gmra.mrb[8].mxu1 %v1330_v53  ;;  %4558 = vmatprep.subr.bf16.mxu1 %v4937_v54 }
  0xd2   : > { %4499 = vmatmul.mubr.bf16.gmra.mrb[8].mxu0 %v5305_v25  ;;  %4342 = vmatprep.mubr.bf16.mxu1 %v1332_v17  ;;  %v1336_v25 = vsel %vm1317_vm4, %v1333_v28, %v1335_v32 }
  0xd3   : > { %4502 = vmatprep.mubr.bf16.mxu0 %v5338_v49  ;;  %4523 = vmatpush3.bf16.msra.mxu0 %v4937_v54  ;;  %v2507_v49 = vshrl.u32 %v5293_v16, 16 }
  0xd4   : > { %4524 = vmatprep.subr.bf16.mxu0 %v4938_v23  ;;  %4566 = vmatpush3.bf16.msra.mxu1 %v4937_v54  ;;  %v5694_v54 = vmul.u32.u64.low 2863311531, %v3033_v59  ;;  %v5695_v53 = vmul.u32.u64.high 2863311531, %v3033_v59, %v5694_v54 }
  0xd5   : > { %4559 = vmatprep.subr.bf16.mxu1 %v4938_v23  ;;  %v2509_v4 = vor.u32 %v2507_v49, %v2505_v20 }
  0xd6   : > { %v3093_v35 = vshrl.u32 %v5695_v53, 4 }
  0xd7   : > { %4525 = vmatpush3.bf16.msra.mxu0 %v4938_v23  ;;  %v2514_v38 = vsel %vm537_vm0, %v2509_v4, %v2513_v7 }
  0xd8   : > { %4526 = vmatprep.subr.bf16.mxu0 %v4939_v33  ;;  %4567 = vmatpush3.bf16.msra.mxu1 %v4938_v23  ;;  %v5697_v17 = vmul.u32.u64.low 2863311531, %v3045_v2  ;;  %v5698_v23 = vmul.u32.u64.high 2863311531, %v3045_v2, %v5697_v17 }
  0xd9   : > { %4343 = vmatmul.mubr.bf16.gmra.mrb[12].mxu1 %v1334_v34  ;;  %4560 = vmatprep.subr.bf16.mxu1 %v4939_v33 }
  0xda   : > { %4503 = vmatmul.mubr.bf16.gmra.mrb[12].mxu0 %v5343_v52  ;;  %4346 = vmatprep.mubr.bf16.mxu1 %v1336_v25  ;;  %v2506_v52 = vsel %vm537_vm0, %v5442_v63, %v2505_v20  ;;  %v2768_v63 = vrot.slane %v5570_v8, 1  ;;  %v2786_v8 = vrot.slane %v5293_v16, 1  ;;  %v3192_v25 = vshrl.u32 %v5692_v42, 4 }
  0xdb   : > { %4506 = vmatprep.mubr.bf16.mxu0 %v5438_v62  ;;  %4527 = vmatpush3.bf16.msra.mxu0 %v4939_v33  ;;  %v2519_v62 = vshll.u32 %v2405_v39, 16  ;;  %v3225_v60 = vshrl.u32 %v5698_v23, 4 }
  0xdc   : > { %4568 = vmatpush3.bf16.msra.mxu1 %v4939_v33  ;;  %4528 = vmatprep.subr.bf16.mxu0 %v4941_v46  ;;  %v2769_v0 = vsel %vm1035_vm2, %v2767_v26, %v2768_v63  ;;  %v2771_v55 = vsel %vm1035_vm2, %v2768_v63, %v2770_v50  ;;  %v2789_v29 = vsel %vm1035_vm2, %v2786_v8, %v2788_v11  ;;  %v3193_v7 = vmul.u32 24, %v3192_v25 }
  0xdd   : > { %4561 = vmatprep.subr.bf16.mxu1 %v4941_v46  ;;  %v2521_v14 = vrot.slane %v2519_v62, 1  ;;  %v3226_v26 = vmul.u32 24, %v3225_v60  ;;  %v5757_v50 = vadd.s32 144, %v5674_v30  ;;  %v6624_v25 = vmov 0 }
  0xde   : > { %v5746_v63 = vsub.s32 %v3042_v10, %v3193_v7  ;;  %v3203_v10 = vshrl.u32 %v5739_v45, 4 }
  0xdf   : > { %4529 = vmatpush3.bf16.msra.mxu0 %v4941_v46  ;;  %v2522_v56 = vsel %vm537_vm0, %v2517_v47, %v2521_v14 }
  0xe0   : > { %4569 = vmatpush3.bf16.msra.mxu1 %v4941_v46  ;;  %v5714_v46 = vadd.s32 8, %v5674_v30  ;;  %6603 = vst [vmem:[#allocation4_spill] sm:$0xff] %v5746_v63  ;;  %vm3330_vm11 = vcmp.ne.s32.totalorder %v5746_v63, 0  ;;  %vm3354_vm12 = vcmp.lt.s32.totalorder %v5746_v63, 0 }
  0xe1   : > { %4347 = vmatmul.mubr.bf16.gmra.mrb[16].mxu1 %v1338_v36  ;;  %vm5838_vm4 = vmand %vm3354_vm12, %vm3330_vm11 }
  0xe2   : > { %4507 = vmatmul.mubr.bf16.gmra.mrb[16].mxu0 %v2506_v52  ;;  %4350 = vmatprep.mubr.bf16.mxu1 %v1340_v43  ;;  %v3094_v43 = vmul.u32 24, %v3093_v35  ;;  %v5730_v40 = vmul.u32.u64.low 2863311531, %v5714_v46  ;;  %v5731_v41 = vmul.u32.u64.high 2863311531, %v5714_v46, %v5730_v40  ;;  %v5913_v35 = vadd.s32 136, %v5674_v30 }
  0xe3   : > { %4510 = vmatprep.mubr.bf16.mxu0 %v2514_v38 }
  0xe4   : > { %v3071_v61 = vshrl.u32 %v5731_v41, 4 }
  0xe9   : > { %4351 = vmatmul.mubr.bf16.gmra.mrb[20].mxu1 %v1342_v48 }
  0xea   : > { %4511 = vmatmul.mubr.bf16.gmra.mrb[20].mxu0 %v2522_v56  ;;  %4542 = vmatprep.mubr.bf16.mxu1 %v5573_v9  ;;  %v2787_v9 = vsel %vm1035_vm2, %v2784_v6, %v2786_v8  ;;  %v3044_v6 = vadd.s32 112, %v5674_v30  ;;  %v5772_v8 = vadd.s32 32, %v5674_v30 }
  0xeb   : > { %4530 = vmatprep.mubr.bf16.mxu0 %v2769_v0  ;;  %v5754_v0 = vsub.s32 %v3033_v59, %v3094_v43  ;;  %v5816_v59 = vadd.s32 56, %v5674_v30 }
  0xed   : > { %vm3321_vm14 = vcmp.ne.s32.totalorder %v5754_v0, 0  ;;  %vm3345_vm15 = vcmp.lt.s32.totalorder %v5754_v0, 0  ;;  %v5843_v18 = vadd.s32 24, %v5754_v0 }
  0xf1   : > { %4543 = vmatmul.mubr.bf16.vlgmr.msra.gmra.mrb[24].mxu1 %v5577_v15  ;;  %v2790_v15 = vrot.slane %v2405_v39, 1  ;;  %v5723_v39 = vadd.s32 48, %v5674_v30 }
  0xf2   : > { %4531 = vmatmul.mubr.bf16.vlgmr.msra.gmra.mrb[0].mxu0 %v2771_v55  ;;  %4546 = vmatprep.mubr.bf16.mxu1 %v5473_v21  ;;  %v5679_v21 = vmul.u32.u64.low 2863311531, %v3032_v5  ;;  %v5680_v22 = vmul.u32.u64.high 2863311531, %v3032_v5, %v5679_v21 }
  0xf3   : > { %4534 = vmatprep.mubr.bf16.mxu0 %v2773_v57  ;;  %v2791_v16 = vsel %vm1035_vm2, %v2788_v11, %v2790_v15  ;;  %v5749_v48 = vmul.u32.u64.low 2863311531, %v5723_v39  ;;  %v5750_v56 = vmul.u32.u64.high 2863311531, %v5723_v39, %v5749_v48  ;;  %v5769_v57 = vsub.s32 %v3045_v2, %v3226_v26 }
  0xf4   : > { %v3082_v31 = vshrl.u32 %v5680_v22, 4  ;;  %v5812_v21 = vmul.u32.u64.low 2863311531, %v5757_v50  ;;  %v5813_v22 = vmul.u32.u64.high 2863311531, %v5757_v50, %v5812_v21  ;;  %v6618_v2 = vmov 0 }
  0xf5   : > { %6605 = vst [vmem:[#allocation6_spill] sm:$0xff] %v5769_v57  ;;  %vm3333_vm2 = vcmp.ne.s32.totalorder %v5769_v57, 0  ;;  %vm3357_vm3 = vcmp.lt.s32.totalorder %v5769_v57, 0  ;;  %v6619_v2 = vsel %vm5838_vm4, 4294967295, %v6618_v2  ;;  %v3126_v42 = vshrl.u32 %v5750_v56, 4 }
  0xf6   : > { %v3083_v49 = vmul.u32 24, %v3082_v31  ;;  %6620 = vst [vmem:[#allocation13_spill] sm:$0xff] %v6619_v2  ;;  %v5859_v23 = vadd.s32 24, %v5769_v57  ;;  %v3072_v31 = vmul.u32 24, %v3071_v61 }
  0xf7   : > { %v3127_v41 = vmul.u32 24, %v3126_v42 }
  0xf8   : > { %v5727_v52 = vsub.s32 %v3032_v5, %v3083_v49  ;;  %6623 = vst [vmem:[#allocation14_spill] sm:$0xff] %v5859_v23  ;;  %v3204_v49 = vmul.u32 24, %v3203_v10  ;;  %v5900_v56 = vsub.s32 %v5714_v46, %v3072_v31 }
  0xf9   : > { %4547 = vmatmul.mubr.bf16.gmra.mrb[28].mxu1 %v2787_v9 }
  0xfa   : > { %4535 = vmatmul.mubr.bf16.gmra.mrb[4].mxu0 %v2775_v24  ;;  %4550 = vmatprep.mubr.bf16.mxu1 %v2789_v29  ;;  %vm3320_vm5 = vcmp.ne.s32.totalorder %v5727_v52, 0  ;;  %vm3344_vm6 = vcmp.lt.s32.totalorder %v5727_v52, 0  ;;  %v5760_v51 = vadd.s32 24, %v5727_v52  ;;  %v5782_v24 = vadd.s32 128, %v5674_v30 }
  0xfb   : > { %4538 = vmatprep.mubr.bf16.mxu0 %v5482_v12  ;;  %v5683_v12 = vmul.u32.u64.low 2863311531, %v3044_v6  ;;  %v5684_v1 = vmul.u32.u64.high 2863311531, %v3044_v6, %v5683_v12  ;;  %vm5790_vm13 = vmand %vm3344_vm6, %vm3320_vm5 }
  0xfc   : > { %v5847_v54 = vmul.u32.u64.low 2863311531, %v5782_v24  ;;  %v5848_v53 = vmul.u32.u64.high 2863311531, %v5782_v24, %v5847_v54  ;;  %vm5854_vm5 = vmand %vm3345_vm15, %vm3321_vm14 }
  0xfd   : > { %v3214_v33 = vshrl.u32 %v5684_v1, 4  ;;  %vm5868_vm6 = vmand %vm3357_vm3, %vm3333_vm2  ;;  %v5909_v54 = vsub.s32 %v5717_v3, %v3204_v49 }
  0xfe   : > { %v6625_v25 = vsel %vm5868_vm6, 4294967295, %v6624_v25  ;;  %v3236_v49 = vshrl.u32 %v5848_v53, 4  ;;  %v5945_v53 = vadd.s32 88, %v5674_v30 }
  0xff   : > { %v3215_v13 = vmul.u32 24, %v3214_v33  ;;  %v5862_v33 = vadd.s32 40, %v5674_v30  ;;  %6626 = vst [vmem:[#allocation15_spill] sm:$0xff] %v6625_v25  ;;  %6627 = vst [vmem:[#allocation16_spill] sm:$0xff] %v5909_v54 }
 0x100   : > { %v3237_v40 = vmul.u32 24, %v3236_v49 }
 0x101   : > { %4551 = vmatmul.mubr.bf16.gmra.mrb[32].mxu1 %v2791_v16  ;;  %v5735_v38 = vsub.s32 %v3044_v6, %v3215_v13  ;;  %v5795_v16 = vadd.s32 24, %v5746_v63  ;;  %v6612_v6 = vmov 0  ;;  %v6012_v63 = vadd.s32 72, %v5674_v30 }
 0x102   : > { %4539 = vmatmul.mubr.bf16.gmra.mrb[8].mxu0 %v5555_v58  ;;  %v5687_v19 = vmul.u32.u64.low 2863311531, %v5674_v30  ;;  %v5688_v58 = vmul.u32.u64.high 2863311531, %v5674_v30, %v5687_v19  ;;  %v5903_v61 = vmul.u32.u64.low 2863311531, %v5862_v33  ;;  %v5904_v10 = vmul.u32.u64.high 2863311531, %v5862_v33, %v5903_v61 }
 0x103   : > { %6602 = vst [vmem:[#allocation3_spill] sm:$0xff] %v5735_v38  ;;  %vm3332_vm7 = vcmp.ne.s32.totalorder %v5735_v38, 0  ;;  %vm3356_vm8 = vcmp.lt.s32.totalorder %v5735_v38, 0  ;;  %v5765_v55 = vadd.s32 24, %v5735_v38  ;;  %6610 = vst [vmem:[#allocation9_spill] sm:$0xff] %v5795_v16  ;;  %v5919_v61 = vadd.s32 80, %v5674_v30 }
 0x104   : > { %v3060_v37 = vshrl.u32 %v5688_v58, 4  ;;  %vm5806_vm0 = vmand %vm3356_vm8, %vm3332_vm7  ;;  %v5831_v19 = vmul.u32.u64.low 2863311531, %v5772_v8  ;;  %v5832_v58 = vmul.u32.u64.high 2863311531, %v5772_v8, %v5831_v19  ;;  %vm3319_vm7 = vcmp.ne.s32.totalorder %v5900_v56, 0 }
 0x105   : > { %6604 = vst [vmem:[#allocation5_spill] sm:$0xff] %v5765_v55  ;;  %v6613_v6 = vsel %vm5806_vm0, 4294967295, %v6612_v6  ;;  %vm3343_vm8 = vcmp.lt.s32.totalorder %v5900_v56, 0  ;;  %v3115_v23 = vshrl.u32 %v5904_v10, 4 }
 0x106   : > { %v3061_v20 = vmul.u32 24, %v3060_v37  ;;  %6614 = vst [vmem:[#allocation11_spill] sm:$0xff] %v6613_v6  ;;  %v3104_v43 = vshrl.u32 %v5832_v58, 4  ;;  %v5938_v58 = vadd.s32 160, %v5674_v30  ;;  %vm5970_vm14 = vmand %vm3343_vm8, %vm3319_vm7  ;;  %v6632_v6 = vmov 0 }
 0x107   : > { %v5954_v37 = vmul.u32.u64.low 2863311531, %v5919_v61  ;;  %v5955_v13 = vmul.u32.u64.high 2863311531, %v5919_v61, %v5954_v37 }
 0x108   : > { %v5744_v14 = vsub.s32 %v5674_v30, %v3061_v20  ;;  %v5881_v20 = vmul.u32.u64.low 2863311531, %v5816_v59  ;;  %v5882_v60 = vmul.u32.u64.high 2863311531, %v5816_v59, %v5881_v20 }
 0x109   : > { %v3258_v20 = vshrl.u32 %v5813_v22, 4  ;;  %v5927_v22 = vsub.s32 %v5723_v39, %v3127_v41  ;;  %v5949_v41 = vadd.s32 24, %v5909_v54 }
 0x10a   : > { %vm3318_vm9 = vcmp.ne.s32.totalorder %v5744_v14, 0  ;;  %vm3342_vm10 = vcmp.lt.s32.totalorder %v5744_v14, 0  ;;  %v5777_v9 = vadd.s32 24, %v5744_v14 }
 0x10b   : > { %vm5824_vm1 = vmand %vm3342_vm10, %vm3318_vm9  ;;  %vm3331_vm9 = vcmp.ne.s32.totalorder %v5909_v54, 0  ;;  %v3259_v39 = vmul.u32 24, %v3258_v20  ;;  %vm3355_vm10 = vcmp.lt.s32.totalorder %v5909_v54, 0  ;;  %6629 = vst [vmem:[#allocation18_spill] sm:$0xff] %v5949_v41  ;;  %vm3324_vm11 = vcmp.ne.s32.totalorder %v5927_v22, 0 }
 0x10c   : > { %vm3348_vm12 = vcmp.lt.s32.totalorder %v5927_v22, 0  ;;  %vm5987_vm15 = vmand %vm3355_vm10, %vm3331_vm9 }
 0x10d   : > { %v5975_v10 = vsub.s32 %v5757_v50, %v3259_v39  ;;  %v6633_v6 = vsel %vm5987_vm15, 4294967295, %v6632_v6  ;;  %v5992_v50 = vadd.s32 24, %v5927_v22  ;;  %vm6003_vm2 = vmand %vm3348_vm12, %vm3324_vm11 }
 0x10e   : > { %6634 = vst [vmem:[#allocation19_spill] sm:$0xff] %v6633_v6 }
 0x10f   : > { %vm3336_vm3 = vcmp.ne.s32.totalorder %v5975_v10, 0  ;;  %vm3360_vm7 = vcmp.lt.s32.totalorder %v5975_v10, 0  ;;  %v6666_v2 = vsel %vm6003_vm2, %v5992_v50, %v5927_v22 }
 0x110   : > { %vm6069_vm11 = vmand %vm3360_vm7, %vm3336_vm3 }
 0x194   : > { %v5700_v27 = vpop.f32.mrb[0].mxu1 }
 0x195   : > { %v5702_v28 = vpop.f32.mrb[1].mxu1 }
 0x196   : > { %v5705_v32 = vpop.f32.mrb[2].mxu1 }
 0x197   : > { %v5708_v34 = vpop.f32.mrb[3].mxu1 }
 0x19c   : > { %v5720_v4 = vpop.f32.mrb[4].mxu1 }
 0x19d   : > { %v5725_v36 = vpop.f32.mrb[5].mxu1 }
 0x19e   : > { %v5733_v62 = vpop.f32.mrb[6].mxu1 }
 0x19f   : > { %v5741_v47 = vpop.f32.mrb[7].mxu1 }
 0x1a4   : > { %v5774_v11 = vpop.f32.mrb[8].mxu1 }
 0x1a5   : > { %6606 = vst [vmem:[#allocation7_spill] sm:$0xff] %v5774_v11  ;;  %v5784_v29 = vpop.f32.mrb[9].mxu1 }
 0x1a6   : > { %6607 = vst [vmem:[#allocation8_spill] sm:$0xff] %v5784_v29  ;;  %v5800_v5 = vpop.f32.mrb[10].mxu1  ;;  %v6008_v29 = vmul.u32.u64.low 2863311531, %v5913_v35  ;;  %v6009_v11 = vmul.u32.u64.high 2863311531, %v5913_v35, %v6008_v29 }
 0x1a7   : > { %6611 = vst [vmem:[#allocation10_spill] sm:$0xff] %v5800_v5  ;;  %v5818_v12 = vpop.f32.mrb[11].mxu1 }
 0x1a8   : > { %6615 = vst [vmem:[#allocation12_spill] sm:$0xff] %v5818_v12 }
 0x1ac   : > { %v4344_v7 = vpop.f32.mrb[12].mxu1 }
 0x1ad   : > { %v4504_v45 = vpop.f32.mrb[12].mxu0  ;;  %v1485_v26 = vpop.f32.mrb[13].mxu1 }
 0x1ae   : > { %v5906_v21 = vadd.f32 %v4504_v45, %v4344_v7  ;;  %v2665_v19 = vpop.f32.mrb[13].mxu0  ;;  %v4345_v42 = vpop.f32.mrb[14].mxu1  ;;  %v5922_v7 = vadd.s32 176, %v5674_v30 }
 0x1af   : > { %v5915_v48 = vadd.f32 %v2665_v19, %v1485_v26  ;;  %v4505_v46 = vpop.f32.mrb[14].mxu0  ;;  %v1488_v31 = vpop.f32.mrb[15].mxu1  ;;  %v5931_v26 = vadd.s32 64, %v5674_v30 }
 0x1b0   : > { %6628 = vst [vmem:[#allocation17_spill] sm:$0xff] %v5922_v7  ;;  %v5924_v45 = vadd.f32 %v4505_v46, %v4345_v42  ;;  %v2668_v3 = vpop.f32.mrb[15].mxu0  ;;  %v5941_v42 = vadd.s32 24, %v5900_v56  ;;  %v3105_v46 = vmul.u32 24, %v3104_v43 }
 0x1b1   : > { %v5933_v19 = vadd.f32 %v2668_v3, %v1488_v31  ;;  %v3137_v31 = vshrl.u32 %v5882_v60, 4  ;;  %v5960_v25 = vmul.u32.u64.low 2863311531, %v5931_v26  ;;  %v5961_v12 = vmul.u32.u64.high 2863311531, %v5931_v26, %v5960_v25 }
 0x1b2   : > { %v5978_v49 = vmul.u32.u64.low 2863311531, %v5893_v44  ;;  %v5979_v25 = vmul.u32.u64.high 2863311531, %v5893_v44, %v5978_v49  ;;  %v5995_v39 = vsub.s32 %v5772_v8, %v3105_v46  ;;  %v6022_v46 = vsub.s32 %v5782_v24, %v3237_v40 }
 0x1b4   : > { %v4348_v3 = vpop.f32.mrb[16].mxu1  ;;  %vm3322_vm8 = vcmp.ne.s32.totalorder %v5995_v39, 0  ;;  %vm3346_vm9 = vcmp.lt.s32.totalorder %v5995_v39, 0  ;;  %v3394_v24 = vadd.s32 24, %v5995_v39  ;;  %vm3334_vm10 = vcmp.ne.s32.totalorder %v6022_v46, 0 }
 0x1b5   : > { %v4508_v20 = vpop.f32.mrb[16].mxu0  ;;  %v1501_v57 = vpop.f32.mrb[17].mxu1  ;;  %vm3358_vm12 = vcmp.lt.s32.totalorder %v6022_v46, 0  ;;  %vm6093_vm3 = vmand %vm3346_vm9, %vm3322_vm8  ;;  %v3269_v1 = vshrl.u32 %v5979_v25, 4 }
 0x1b6   : > { %v5963_v43 = vadd.f32 %v4508_v20, %v4348_v3  ;;  %v2681_v60 = vpop.f32.mrb[17].mxu0  ;;  %v4349_v38 = vpop.f32.mrb[18].mxu1  ;;  %v3418_v15 = vsel %vm6093_vm3, %v3394_v24, %v5995_v39  ;;  %v6162_v17 = vmul.u32.u64.low 2863311531, %v5922_v7  ;;  %v6163_v24 = vmul.u32.u64.high 2863311531, %v5922_v7, %v6162_v17 }
 0x1b7   : > { %v5981_v3 = vadd.f32 %v2681_v60, %v1501_v57  ;;  %v4509_v20 = vpop.f32.mrb[18].mxu0  ;;  %v1504_v55 = vpop.f32.mrb[19].mxu1  ;;  %v3138_v57 = vmul.u32 24, %v3137_v31  ;;  %v3116_v31 = vmul.u32 24, %v3115_v23  ;;  %v6041_v23 = vadd.s32 24, %v5975_v10 }
 0x1b8   : > { %v5997_v60 = vadd.f32 %v4509_v20, %v4349_v38  ;;  %v2684_v49 = vpop.f32.mrb[19].mxu0  ;;  %v3415_v38 = vsel %vm5970_vm14, %v5941_v42, %v5900_v56  ;;  %v3170_v42 = vshrl.u32 %v5955_v13, 4  ;;  %v3270_v39 = vmul.u32 24, %v3269_v1 }
 0x1b9   : > { %v6014_v8 = vadd.f32 %v2684_v49, %v1504_v55  ;;  %v6034_v55 = vadd.s32 184, %v5674_v30  ;;  %v6045_v40 = vsub.s32 %v5816_v59, %v3138_v57  ;;  %v6056_v54 = vsub.s32 %v5862_v33, %v3116_v31 }
 0x1ba   : > { %v6050_v37 = vmul.u32.u64.low 2863311531, %v6012_v63  ;;  %v6051_v20 = vmul.u32.u64.high 2863311531, %v6012_v63, %v6050_v37  ;;  %v3148_v59 = vshrl.u32 %v5961_v12, 4  ;;  %vm6118_vm9 = vcmp.lt.s32.totalorder %v3415_v38, 16 }
 0x1bb   : > { %v6075_v12 = vmul.u32.u64.low 2863311531, %v5945_v53  ;;  %v6076_v33 = vmul.u32.u64.high 2863311531, %v5945_v53, %v6075_v12  ;;  %v3397_v25 = vadd.s32 24, %v6045_v40  ;;  %v6141_v38 = vadd.s32 168, %v5674_v30 }
 0x1bc   : > { %v4352_v56 = vpop.f32.mrb[20].mxu1  ;;  %v3171_v12 = vmul.u32 24, %v3170_v42  ;;  %v6653_v42 = vsel %vm5854_vm5, %v5843_v18, %v5754_v0  ;;  %v3395_v30 = vadd.s32 24, %v6056_v54  ;;  %vm6660_vm5 = vcmp.ne.s32.totalorder %v6056_v54, 0 }
 0x1bd   : > { %v4512_v49 = vpop.f32.mrb[20].mxu0  ;;  %v1517_v29 = vpop.f32.mrb[21].mxu1  ;;  %vm6661_vm3 = vcmp.lt.s32.totalorder %v6056_v54, 0  ;;  %v3159_v1 = vshrl.u32 %v6051_v20, 4  ;;  %v6265_v5 = vmul.u32.u64.low 2863311531, %v6141_v38  ;;  %v6266_v22 = vmul.u32.u64.high 2863311531, %v6141_v38, %v6265_v5 }
 0x1be   : > { %v6059_v57 = vadd.f32 %v4512_v49, %v4352_v56  ;;  %v2697_v41 = vpop.f32.mrb[21].mxu0  ;;  %v4353_v6 = vpop.f32.mrb[22].mxu1  ;;  %v6641_v49 = vsel %vm5824_vm1, %v5777_v9, %v5744_v14  ;;  %vm6126_vm1 = vmand %vm3358_vm12, %vm3334_vm10  ;;  %vm6148_vm10 = vcmp.lt.s32.totalorder %v6653_v42, 16  ;;  %vm6656_vm12 = vcmp.ne.s32.totalorder %v6045_v40, 0 }
 0x1bf   : > { %v6078_v31 = vadd.f32 %v2697_v41, %v1517_v29  ;;  %v4513_v56 = vpop.f32.mrb[22].mxu0  ;;  %v1520_v37 = vpop.f32.mrb[23].mxu1  ;;  %vm6085_vm14 = vcmp.lt.s32.totalorder %v6641_v49, 16  ;;  %v6098_v41 = vadd.s32 24, %v6022_v46  ;;  %v3247_v29 = vshrl.u32 %v6009_v11, 4 }
 0x1c0   : > { %6637 = vst [vmem:[#allocation20_spill] sm:$0xff] %v6059_v57  ;;  %v6102_v14 = vadd.f32 %v4513_v56, %v4353_v6  ;;  %v2700_v9 = vpop.f32.mrb[23].mxu0 }
 0x1c1   : > { %6640 = vst [vmem:[#allocation21_spill] sm:$0xff] %v6078_v31  ;;  %v6106_v49 = vadd.f32 %v2700_v9, %v1520_v37  ;;  %v6646_v31 = vsel %vm5790_vm13, %v5760_v51, %v5727_v52  ;;  %v3149_v52 = vmul.u32 24, %v3148_v59  ;;  %vm6657_vm13 = vcmp.lt.s32.totalorder %v6045_v40, 0 }
 0x1c2   : > { %vm6114_vm8 = vcmp.lt.s32.totalorder %v6646_v31, 16  ;;  %vm6156_vm7 = vmand %vm6657_vm13, %vm6656_vm12  ;;  %v3248_v56 = vmul.u32 24, %v3247_v29  ;;  %v6184_v37 = vsub.s32 %v5919_v61, %v3171_v12  ;;  %vm6202_vm12 = vcmp.lt.s32.totalorder %v3418_v15, 16 }
 0x1c3   : > { %vm6179_vm13 = vmand %vm6661_vm3, %vm6660_vm5  ;;  %v6191_v18 = vsub.s32 %v5931_v26, %v3149_v52  ;;  %v6194_v51 = vmul.u32.u64.low 2863311531, %v5938_v58  ;;  %v6195_v7 = vmul.u32.u64.high 2863311531, %v5938_v58, %v6194_v51  ;;  %v3421_v26 = vsel %vm6156_vm7, %v3397_v25, %v6045_v40 }
 0x1c4   : > { %v4544_v0 = vpop.f32.mrb[24].mxu1  ;;  %v3181_v52 = vshrl.u32 %v6076_v33, 4  ;;  %v3419_v40 = vsel %vm6179_vm13, %v3395_v30, %v6056_v54  ;;  %vm6249_vm13 = vcmp.lt.s32.totalorder %v6666_v2, 16  ;;  %vm6274_vm2 = vcmp.lt.s32.totalorder %v3421_v26, 16  ;;  %v6690_v30 = vld [vmem:[#allocation7_spill] sm:$0xff] }
 0x1c5   : > { %v4532_v9 = vpop.f32.mrb[0].mxu0  ;;  %v6188_v42 = vadd.f32 %v5906_v21, %v4544_v0  ;;  %v2934_v17 = vpop.f32.mrb[25].mxu1  ;;  %v6217_v0 = vsub.s32 %v5893_v44, %v3270_v39  ;;  %vm3326_vm3 = vcmp.ne.s32.totalorder %v6191_v18, 0  ;;  %vm6253_vm5 = vcmp.lt.s32.totalorder %v3419_v40, 16  ;;  %v6686_v39 = vld [vmem:[#allocation4_spill] sm:$0xff] }
 0x1c6   : > { %v4570_v61 = vadd.f32 %v4532_v9, %v5700_v27  ;;  %v2886_v29 = vpop.f32.mrb[1].mxu0  ;;  %v6200_v20 = vadd.f32 %v5915_v48, %v2934_v17  ;;  %v4545_v12 = vpop.f32.mrb[26].mxu1  ;;  %v6236_v44 = vmul.u32.u64.low 2863311531, %v6034_v55  ;;  %v6237_v54 = vmul.u32.u64.high 2863311531, %v6034_v55, %v6236_v44 }
 0x1c7   : > { %3019 = vst [vmem:[%s6169_s9 + $0x70] sm:$0xff] %v6188_v42  ;;  %v4571_v27 = vadd.f32 %v2886_v29, %v5702_v28  ;;  %v4533_v51 = vpop.f32.mrb[2].mxu0  ;;  %v6214_v48 = vadd.f32 %v5924_v45, %v4545_v12  ;;  %v2937_v15 = vpop.f32.mrb[27].mxu1  ;;  %v6227_v28 = vsub.s32 %v5913_v35, %v3248_v56  ;;  %v3160_v45 = vmul.u32 24, %v3159_v1 }
 0x1c8   : > { %3007 = vst [vmem:[%s6169_s9 + $0x10] sm:$0xff] %v4570_v61  ;;  %3017 = vst [vmem:[%s6169_s9 + $0x60] sm:$0xff] %v6200_v20  ;;  %v4572_v33 = vadd.f32 %v4533_v51, %v5705_v32  ;;  %v2889_v25 = vpop.f32.mrb[3].mxu0  ;;  %vm3350_vm7 = vcmp.lt.s32.totalorder %v6191_v18, 0  ;;  %v3182_v16 = vmul.u32 24, %v3181_v52  ;;  %v6259_v31 = vadd.f32 %v5933_v19, %v2937_v15 }
 0x1c9   : > { %3005 = vst [vmem:[%s6169_s9] sm:$0xff] %v4571_v27  ;;  %3020 = vst [vmem:[%s6169_s9 + $0x78] sm:$0xff] %v6214_v48  ;;  %v3510_v32 = vsel %vm6085_vm14, %v4571_v27, 0.0  ;;  %v4573_v35 = vadd.f32 %v2889_v25, %v5708_v34  ;;  %v6262_v34 = vadd.s32 24, %v6184_v37  ;;  %v3512_v50 = vsel %vm6114_vm8, %v4570_v61, 0.0 }
 0x1ca   : > { %3008 = vst [vmem:[%s6169_s9 + $0x18] sm:$0xff] %v4572_v33  ;;  %v3398_v19 = vadd.s32 24, %v6191_v18  ;;  %v6280_v17 = vsub.s32 %v6012_v63, %v3160_v45  ;;  %v3563_v29 = vmul.f32 %v3510_v32, %v3510_v32  ;;  %3018 = vst [vmem:[%s6169_s9 + $0x68] sm:$0xff] %v6259_v31  ;;  %v3513_v26 = vsel %vm6148_vm10, %v4572_v33, 0.0 }
 0x1cb   : > { %3006 = vst [vmem:[%s6169_s9 + $0x8] sm:$0xff] %v4573_v35  ;;  %v3511_v56 = vsel %vm6118_vm9, %v4573_v35, 0.0  ;;  %vm6291_vm14 = vmand %vm3350_vm7, %vm3326_vm3  ;;  %v6302_v40 = vsub.s32 %v5945_v53, %v3182_v16  ;;  %v3565_v25 = vmul.f32 %v3512_v50, %v3512_v50  ;;  %v3566_v35 = vmul.f32 %v3513_v26, %v3513_v26 }
 0x1cc   : > { %v4548_v1 = vpop.f32.mrb[28].mxu1  ;;  %v3534_v12 = vadd.f32 %v3511_v56, %v3510_v32  ;;  %v3564_v52 = vmul.f32 %v3511_v56, %v3511_v56  ;;  %v3422_v53 = vsel %vm6291_vm14, %v3398_v19, %v6191_v18  ;;  %vm3327_vm8 = vcmp.ne.s32.totalorder %v6280_v17, 0  ;;  %v6696_v19 = vld [vmem:[#allocation18_spill] sm:$0xff] }
 0x1cd   : > { %v4536_v57 = vpop.f32.mrb[4].mxu0  ;;  %v6285_v6 = vadd.f32 %v5963_v43, %v4548_v1  ;;  %v2950_v61 = vpop.f32.mrb[29].mxu1  ;;  %vm3351_vm9 = vcmp.lt.s32.totalorder %v6280_v17, 0  ;;  %vm6675_vm10 = vcmp.ne.s32.totalorder %v6184_v37, 0  ;;  %vm6676_vm7 = vcmp.lt.s32.totalorder %v6184_v37, 0 }
 0x1ce   : > { %v4574_v27 = vadd.f32 %v4536_v57, %v5720_v4  ;;  %v2902_v51 = vpop.f32.mrb[5].mxu0  ;;  %v6299_v43 = vadd.f32 %v5981_v3, %v2950_v61  ;;  %v4549_v15 = vpop.f32.mrb[30].mxu1  ;;  %v3535_v45 = vadd.f32 %v3534_v12, %v3512_v50  ;;  %v3587_v44 = vadd.f32 %v3564_v52, %v3563_v29  ;;  %vm6323_vm3 = vmand %vm6676_vm7, %vm6675_vm10 }
 0x1cf   : > { %3023 = vst [vmem:[%s6169_s9 + $0x90] sm:$0xff] %v6285_v6  ;;  %v4575_v32 = vadd.f32 %v2902_v51, %v5725_v36  ;;  %v4537_v59 = vpop.f32.mrb[6].mxu0  ;;  %v2953_v33 = vpop.f32.mrb[31].mxu1  ;;  %v6329_v5 = vadd.f32 %v5997_v60, %v4549_v15  ;;  %vm3329_vm14 = vcmp.ne.s32.totalorder %v6302_v40, 0  ;;  %v3399_v50 = vadd.s32 24, %v6280_v17  ;;  %vm6339_vm10 = vmand %vm3351_vm9, %vm3327_vm8  ;;  %v6685_v15 = vld [vmem:[#allocation9_spill] sm:$0xff] }
 0x1d0   : > { %3011 = vst [vmem:[%s6169_s9 + $0x30] sm:$0xff] %v4574_v27  ;;  %3021 = vst [vmem:[%s6169_s9 + $0x80] sm:$0xff] %v6299_v43  ;;  %v4576_v4 = vadd.f32 %v4537_v59, %v5733_v62  ;;  %v2905_v3 = vpop.f32.mrb[7].mxu0  ;;  %v3588_v36 = vadd.f32 %v3587_v44, %v3565_v25  ;;  %v3536_v16 = vadd.f32 %v3535_v45, %v3513_v26  ;;  %vm6352_vm7 = vcmp.lt.s32.totalorder %v3422_v53, 16 }
 0x1d1   : > { %3009 = vst [vmem:[%s6169_s9 + $0x20] sm:$0xff] %v4575_v32  ;;  %v3514_v2 = vsel %vm6202_vm12, %v4575_v32, 0.0  ;;  %v4577_v1 = vadd.f32 %v2905_v3, %v5741_v47  ;;  %vm3353_vm12 = vcmp.lt.s32.totalorder %v6302_v40, 0  ;;  %3024 = vst [vmem:[%s6169_s9 + $0x98] sm:$0xff] %v6329_v5  ;;  %v6346_v60 = vadd.f32 %v6014_v8, %v2953_v33 }
 0x1d2   : > { %v3567_v18 = vmul.f32 %v3514_v2, %v3514_v2  ;;  %3012 = vst [vmem:[%s6169_s9 + $0x38] sm:$0xff] %v4576_v4  ;;  %v3537_v21 = vadd.f32 %v3536_v16, %v3514_v2  ;;  %v3589_v56 = vadd.f32 %v3588_v36, %v3566_v35  ;;  %v3424_v47 = vsel %vm6323_vm3, %v6262_v34, %v6184_v37  ;;  %v6683_v34 = vld [vmem:[#allocation20_spill] sm:$0xff]  ;;  %v6694_v16 = vld [vmem:[#allocation21_spill] sm:$0xff] }
 0x1d3   : > { %v3401_v52 = vadd.s32 24, %v6302_v40  ;;  %v3516_v57 = vsel %vm6249_vm13, %v4574_v27, 0.0  ;;  %vm3337_vm8 = vcmp.ne.s32.totalorder %v6217_v0, 0  ;;  %vm3361_vm9 = vcmp.lt.s32.totalorder %v6217_v0, 0  ;;  %3010 = vst [vmem:[%s6169_s9 + $0x28] sm:$0xff] %v4577_v1  ;;  %3022 = vst [vmem:[%s6169_s9 + $0x88] sm:$0xff] %v6346_v60 }
 0x1d4   : > { %v4552_v29 = vpop.f32.mrb[32].mxu1  ;;  %v3590_v61 = vadd.f32 %v3589_v56, %v3567_v18  ;;  %v3515_v8 = vsel %vm6253_vm5, %v4577_v1, 0.0  ;;  %v6687_v27 = vsel %vm5838_vm4, %v6685_v15, %v6686_v39  ;;  %vm6383_vm5 = vmand %vm3353_vm12, %vm3329_vm14  ;;  %v3423_v53 = vsel %vm6339_vm10, %v3399_v50, %v6280_v17  ;;  %v6693_v36 = vld [vmem:[#allocation8_spill] sm:$0xff]  ;;  %v6707_v15 = vld [vmem:[#allocation5_spill] sm:$0xff] }
 0x1d5   : > { %v4540_v37 = vpop.f32.mrb[8].mxu0  ;;  %v6365_v63 = vadd.f32 %v6683_v34, %v4552_v29  ;;  %v2966_v26 = vpop.f32.mrb[33].mxu1  ;;  %vm6372_vm13 = vcmp.lt.s32.totalorder %v6687_v27, 16  ;;  %v3538_v45 = vadd.f32 %v3537_v21, %v3515_v8  ;;  %v3568_v44 = vmul.f32 %v3515_v8, %v3515_v8  ;;  %v6697_v29 = vld [vmem:[#allocation16_spill] sm:$0xff]  ;;  %v6708_v39 = vld [vmem:[#allocation3_spill] sm:$0xff]  ;;  %vm6464_vm10 = vmand %vm3361_vm9, %vm3337_vm8 }
 0x1d6   : > { %v4578_v32 = vadd.f32 %v4540_v37, %v6690_v30  ;;  %v2918_v59 = vpop.f32.mrb[9].mxu0  ;;  %v4553_v3 = vpop.f32.mrb[34].mxu1  ;;  %v3517_v35 = vsel %vm6274_vm2, %v4576_v4, 0.0  ;;  %v6396_v62 = vadd.f32 %v6694_v16, %v2966_v26  ;;  %v3280_v18 = vshrl.u32 %v6195_v7, 4  ;;  %v6703_v26 = vld [vmem:[#allocation10_spill] sm:$0xff] }
 0x1d7   : > { %3027 = vst [vmem:[%s6169_s9 + $0xb0] sm:$0xff] %v6365_v63  ;;  %v4579_v2 = vadd.f32 %v2918_v59, %v6693_v36  ;;  %v4541_v21 = vpop.f32.mrb[10].mxu0  ;;  %v2969_v56 = vpop.f32.mrb[35].mxu1  ;;  %v6698_v17 = vsel %vm5987_vm15, %v6696_v19, %v6697_v29  ;;  %v3569_v4 = vmul.f32 %v3516_v57, %v3516_v57  ;;  %v3539_v50 = vadd.f32 %v3538_v45, %v3516_v57 }
 0x1d8   : > { %vm6404_vm4 = vcmp.lt.s32.totalorder %v6698_v17, 16  ;;  %v3591_v8 = vadd.f32 %v3590_v61, %v3568_v44  ;;  %3015 = vst [vmem:[%s6169_s9 + $0x50] sm:$0xff] %v4578_v32  ;;  %vm6409_vm2 = vcmp.lt.s32.totalorder %v3424_v47, 16  ;;  %v2921_v7 = vpop.f32.mrb[11].mxu0  ;;  %3025 = vst [vmem:[%s6169_s9 + $0xa0] sm:$0xff] %v6396_v62  ;;  %v4580_v51 = vadd.f32 %v4541_v21, %v6703_v26 }
 0x1d9   : > { %3013 = vst [vmem:[%s6169_s9 + $0x40] sm:$0xff] %v4579_v2  ;;  %v3518_v34 = vsel %vm6352_vm7, %v4579_v2, 0.0  ;;  %v3425_v57 = vsel %vm6383_vm5, %v3401_v52, %v6302_v40  ;;  %vm6422_vm15 = vcmp.lt.s32.totalorder %v3423_v53, 16  ;;  %v6709_v27 = vsel %vm5806_vm0, %v6707_v15, %v6708_v39  ;;  %v6712_v52 = vld [vmem:[#allocation12_spill] sm:$0xff] }
 0x1da   : > { %vm6431_vm3 = vcmp.lt.s32.totalorder %v6709_v27, 16  ;;  %v3570_v45 = vmul.f32 %v3517_v35, %v3517_v35  ;;  %v3592_v44 = vadd.f32 %v3591_v8, %v3569_v4  ;;  %v3540_v30 = vadd.f32 %v3539_v50, %v3517_v35  ;;  %3016 = vst [vmem:[%s6169_s9 + $0x58] sm:$0xff] %v4580_v51  ;;  %v6729_v27 = vld [vmem:[#allocation17_spill] sm:$0xff] }
 0x1db   : > { %v3571_v59 = vmul.f32 %v3518_v34, %v3518_v34  ;;  %v6437_v40 = vadd.f32 %v6102_v14, %v4553_v3  ;;  %v4581_v33 = vadd.f32 %v2921_v7, %v6712_v52  ;;  %v6441_v53 = vadd.f32 %v6106_v49, %v2969_v56  ;;  %v6717_v7 = vld [vmem:[#allocation6_spill] sm:$0xff] }
 0x1dc   : > { %v3291_v36 = vshrl.u32 %v6266_v22, 4  ;;  %v3302_v2 = vshrl.u32 %v6163_v24, 4  ;;  %v3541_v16 = vadd.f32 %v3540_v30, %v3518_v34  ;;  %v3593_v21 = vadd.f32 %v3592_v44, %v3570_v45 }
 0x1dd   : > { %vm3449_vm0 = vcmp.lt.s32.totalorder %v3425_v57, 16  ;;  %v6446_v35 = vadd.s32 24, %v6217_v0  ;;  %v3520_v1 = vsel %vm6409_vm2, %v4578_v32, 0.0  ;;  %v3281_v14 = vmul.u32 24, %v3280_v18  ;;  %3028 = vst [vmem:[%s6169_s9 + $0xb8] sm:$0xff] %v6437_v40  ;;  %3014 = vst [vmem:[%s6169_s9 + $0x48] sm:$0xff] %v4581_v33 }
 0x1de   : > { %v3519_v49 = vsel %vm6422_vm15, %v4581_v33, 0.0  ;;  %3026 = vst [vmem:[%s6169_s9 + $0xa8] sm:$0xff] %v6441_v53  ;;  %vm3335_vm14 = vcmp.ne.s32.totalorder %v6227_v28, 0  ;;  %v3594_v24 = vadd.f32 %v3593_v21, %v3571_v59  ;;  %vm3359_vm12 = vcmp.lt.s32.totalorder %v6227_v28, 0 }
 0x1df   : > { %v3542_v22 = vadd.f32 %v3541_v16, %v3519_v49  ;;  %v3572_v3 = vmul.f32 %v3519_v49, %v3519_v49  ;;  %v3521_v56 = vsel %vm3449_vm0, %v4580_v51, 0.0  ;;  %v3313_v19 = vshrl.u32 %v6237_v54, 4  ;;  %v6716_v54 = vld [vmem:[#allocation14_spill] sm:$0xff]  ;;  %vm6504_vm9 = vmand %vm3359_vm12, %vm3335_vm14 }
 0x1e0   : > { %v3292_v32 = vmul.u32 24, %v3291_v36  ;;  %v3573_v29 = vmul.f32 %v3520_v1, %v3520_v1  ;;  %v3303_v17 = vmul.u32 24, %v3302_v2  ;;  %v3522_v8 = vsel %vm6372_vm13, %v6200_v20, 0.0 }
 0x1e1   : > { %v3543_v4 = vadd.f32 %v3542_v22, %v3520_v1  ;;  %v3595_v50 = vadd.f32 %v3594_v24, %v3572_v3  ;;  %v6718_v34 = vsel %vm5868_vm6, %v6716_v54, %v6717_v7  ;;  %v3407_v51 = vadd.s32 24, %v6227_v28 }
 0x1e2   : > { %vm6476_vm7 = vcmp.lt.s32.totalorder %v6718_v34, 16  ;;  %v3282_v57 = vsub.s32 %v5938_v58, %v3281_v14  ;;  %v6721_v61 = vsel %vm6069_vm11, %v6041_v23, %v5975_v10  ;;  %v6724_v25 = vsel %vm6126_vm1, %v6098_v41, %v6022_v46 }
 0x1e3   : > { %vm6487_vm8 = vcmp.lt.s32.totalorder %v6721_v61, 16  ;;  %vm6496_vm6 = vcmp.lt.s32.totalorder %v6724_v25, 16  ;;  %v3574_v10 = vmul.f32 %v3521_v56, %v3521_v56  ;;  %v3544_v23 = vadd.f32 %v3543_v4, %v3521_v56 }
 0x1e4   : > { %v3596_v13 = vadd.f32 %v3595_v50, %v3573_v29  ;;  %v3523_v11 = vsel %vm6404_vm4, %v6259_v31, 0.0  ;;  %v3433_v46 = vsel %vm6464_vm10, %v6446_v35, %v6217_v0  ;;  %v3314_v41 = vmul.u32 24, %v3313_v19 }
 0x1e5   : > { %v3293_v15 = vsub.s32 %v6141_v38, %v3292_v32  ;;  %v3575_v39 = vmul.f32 %v3522_v8, %v3522_v8  ;;  %v3304_v45 = vsub.s32 %v6729_v27, %v3303_v17  ;;  %v3545_v44 = vadd.f32 %v3544_v23, %v3522_v8 }
 0x1e6   : > { %v3597_v30 = vadd.f32 %v3596_v13, %v3574_v10  ;;  %v3524_v59 = vsel %vm6431_vm3, %v6188_v42, 0.0  ;;  %v3431_v31 = vsel %vm6504_vm9, %v3407_v51, %v6227_v28  ;;  %vm3338_vm11 = vcmp.ne.s32.totalorder %v3282_v57, 0 }
 0x1e7   : > { %vm3362_vm1 = vcmp.lt.s32.totalorder %v3282_v57, 0  ;;  %v3576_v9 = vmul.f32 %v3523_v11, %v3523_v11  ;;  %v3410_v0 = vadd.s32 24, %v3282_v57  ;;  %v3546_v52 = vadd.f32 %v3545_v44, %v3523_v11 }
 0x1e8   : > { %v3598_v33 = vadd.f32 %v3597_v30, %v3575_v39  ;;  %v3525_v38 = vsel %vm6476_vm7, %v6214_v48, 0.0  ;;  %v3315_v36 = vsub.s32 %v6034_v55, %v3314_v41  ;;  %vm3339_vm13 = vcmp.ne.s32.totalorder %v3293_v15, 0  ;;  %vm6527_vm2 = vmand %vm3362_vm1, %vm3338_vm11 }
 0x1e9   : > { %vm3363_vm5 = vcmp.lt.s32.totalorder %v3293_v15, 0  ;;  %v3577_v12 = vmul.f32 %v3524_v59, %v3524_v59  ;;  %vm3455_vm4 = vcmp.lt.s32.totalorder %v3431_v31, 16  ;;  %v3547_v28 = vadd.f32 %v3546_v52, %v3524_v59 }
 0x1ea   : > { %v3599_v2 = vadd.f32 %v3598_v33, %v3576_v9  ;;  %v3526_v16 = vsel %vm6496_vm6, %v6299_v43, 0.0  ;;  %vm3340_vm15 = vcmp.ne.s32.totalorder %v3304_v45, 0  ;;  %vm3364_vm3 = vcmp.lt.s32.totalorder %v3304_v45, 0  ;;  %vm6534_vm0 = vmand %vm3363_vm5, %vm3339_vm13 }
 0x1eb   : > { %v3411_v21 = vadd.s32 24, %v3293_v15  ;;  %v3578_v48 = vmul.f32 %v3525_v38, %v3525_v38  ;;  %v3412_v35 = vadd.s32 24, %v3304_v45  ;;  %v3548_v14 = vadd.f32 %v3547_v28, %v3525_v38  ;;  %vm6541_vm7 = vmand %vm3364_vm3, %vm3340_vm15 }
 0x1ec   : > { %v3600_v55 = vadd.f32 %v3599_v2, %v3577_v12  ;;  %v3527_v49 = vsel %vm3455_vm4, %v6346_v60, 0.0  ;;  %v3434_v24 = vsel %vm6527_vm2, %v3410_v0, %v3282_v57  ;;  %vm3341_vm14 = vcmp.ne.s32.totalorder %v3315_v36, 0 }
 0x1ed   : > { %vm3365_vm12 = vcmp.lt.s32.totalorder %v3315_v36, 0  ;;  %v3579_v22 = vmul.f32 %v3526_v16, %v3526_v16  ;;  %vm3457_vm10 = vcmp.lt.s32.totalorder %v3433_v46, 16  ;;  %v3549_v3 = vadd.f32 %v3548_v14, %v3526_v16 }
 0x1ee   : > { %v3601_v56 = vadd.f32 %v3600_v55, %v3578_v48  ;;  %v3528_v19 = vsel %vm6487_vm8, %v6285_v6, 0.0  ;;  %v3413_v32 = vadd.s32 24, %v3315_v36  ;;  %v3435_v60 = vsel %vm6534_vm0, %v3411_v21, %v3293_v15  ;;  %vm6550_vm9 = vmand %vm3365_vm12, %vm3341_vm14 }
 0x1ef   : > { %v3580_v18 = vmul.f32 %v3527_v49, %v3527_v49  ;;  %vm3458_vm6 = vcmp.lt.s32.totalorder %v3434_v24, 16  ;;  %v3550_v17 = vadd.f32 %v3549_v3, %v3527_v49  ;;  %v3529_v50 = vsel %vm3457_vm10, %v6329_v5, 0.0 }
 0x1f0   : > { %v3602_v4 = vadd.f32 %v3601_v56, %v3579_v22  ;;  %v3436_v8 = vsel %vm6541_vm7, %v3412_v35, %v3304_v45  ;;  %v3581_v37 = vmul.f32 %v3528_v19, %v3528_v19  ;;  %vm3459_vm11 = vcmp.lt.s32.totalorder %v3435_v60, 16 }
 0x1f1   : > { %v3551_v6 = vadd.f32 %v3550_v17, %v3528_v19  ;;  %v3530_v7 = vsel %vm3458_vm6, %v6396_v62, 0.0  ;;  %v3437_v34 = vsel %vm6550_vm9, %v3413_v32, %v3315_v36  ;;  %v3582_v26 = vmul.f32 %v3529_v50, %v3529_v50 }
 0x1f2   : > { %v3603_v54 = vadd.f32 %v3602_v4, %v3580_v18  ;;  %vm3460_vm8 = vcmp.lt.s32.totalorder %v3436_v8, 16  ;;  %v3531_v61 = vsel %vm3459_vm11, %v6441_v53, 0.0  ;;  %v3583_v5 = vmul.f32 %v3530_v7, %v3530_v7 }
 0x1f3   : > { %v3552_v51 = vadd.f32 %v3551_v6, %v3529_v50  ;;  %vm3461_vm1 = vcmp.lt.s32.totalorder %v3437_v34, 16  ;;  %v3532_v47 = vsel %vm3460_vm8, %v6365_v63, 0.0  ;;  %v3584_v62 = vmul.f32 %v3531_v61, %v3531_v61 }
 0x1f4   : > { %v3604_v57 = vadd.f32 %v3603_v54, %v3581_v37  ;;  %v3533_v23 = vsel %vm3461_vm1, %v6437_v40, 0.0  ;;  %v3585_v13 = vmul.f32 %v3532_v47, %v3532_v47  ;;  %vm3616_vm13 = vcmask 1040384  }
 0x1f5   : > { %v3553_v20 = vadd.f32 %v3552_v51, %v3530_v7  ;;  %v3586_v41 = vmul.f32 %v3533_v23, %v3533_v23 }
 0x1f6   : > { %v3605_v25 = vadd.f32 %v3604_v57, %v3582_v26 }
 0x1f7   : > { %v3554_v58 = vadd.f32 %v3553_v20, %v3531_v61 }
 0x1f8   : > { %v3606_v10 = vadd.f32 %v3605_v25, %v3583_v5 }
 0x1f9   : > { %v3555_v11 = vadd.f32 %v3554_v58, %v3532_v47 }
 0x1fa   : > { %v3607_v46 = vadd.f32 %v3606_v10, %v3584_v62 }
 0x1fb   : > { %v3556_v15 = vadd.f32 %v3555_v11, %v3533_v23 }
 0x1fc   : > { %v3608_v53 = vadd.f32 %v3607_v46, %v3585_v13 }
 0x1fd   : > { %v3557_v39 = vrot.slane %v3556_v15, 4 }
 0x1fe   : > { %v3609_v27 = vadd.f32 %v3608_v53, %v3586_v41 }
 0x1ff   : > { %v3558_v45 = vadd.f32 %v3557_v39, %v3556_v15 }
 0x200   : > { %v3610_v44 = vrot.slane %v3609_v27, 4 }
 0x201   : > { %v3559_v63 = vrot.slane %v3558_v45, 2 }
 0x202   : > { %v3611_v30 = vadd.f32 %v3610_v44, %v3609_v27 }
 0x203   : > { %v3560_v59 = vadd.f32 %v3559_v63, %v3558_v45 }
 0x204   : > { %v3612_v31 = vrot.slane %v3611_v30, 2 }
 0x205   : > { %v3561_v9 = vrot.slane %v3560_v59, 1 }
 0x206   : > { %v3613_v40 = vadd.f32 %v3612_v31, %v3611_v30 }
 0x207   : > { %v3562_v52 = vadd.f32 %v3561_v9, %v3560_v59 }
 0x208   : > { %v3614_v0 = vrot.slane %v3613_v40, 1 }
 0x20a   : > { %v3615_v33 = vadd.f32 %v3614_v0, %v3613_v40 }
 0x20c   : > { %v3617_v38 = vsel %vm3616_vm13, %v3562_v52, %v3615_v33 }
 0x20d   : > { %3618 = vst [vmem:[%s327_s6] sm:$0x3] %v3617_v38 }
 0x20e PF: > { %s15_s19 = sadd.s32 1, %s4989_s19   ;;  %s6738_s15 = smov %s4981_s17 }
 0x20f   : > { %p12_p10 = scmp.ge.s32.totalorder %s15_s19, 6   ;;  %s6739_s16 = smov %s4985_s18 }
 0x210   : > { %s6740_s17 = smov %s6743_s20  ;;  %s6741_s18 = smov %s6747_s21 }
 0x211   :  { %14 = sbr.rel (!%p12_p10) target bundleno = 3 (0x3), region = 85 }

</bundles_post_ra>
